<compile_context>
chip_gen: v7x
topology: tpu7x:2x2x1
jax: 0.10.0
libtpu: 0.0.40
codegen_flags: <defaults>
</compile_context>

<pallas_src>
import functools
import math

import jax
import jax.numpy as jnp
from jax.experimental import pallas as pl
from jax.experimental.pallas import tpu as pltpu


# 32 MiB scoped-VMEM cap: generous for these kernels (<4 MiB needed) and still
# leaves headroom on v7x's 64 MiB physical VMEM per TensorCore.
_VMEM_LIMIT = 32 * 1024 * 1024


# ------------------------------- helpers ----------------------------------- #

def _round_up(x, m):
    return (x + m - 1) // m * m


def _pick_tile(dim, pref, align):
    """Largest tile <= pref that is `align`-granular and (if possible) divides dim."""
    t = min(pref, _round_up(dim, align))
    while dim % t != 0 and t > align:
        t -= align
    return t


def _pad2(a, rows, cols):
    r, c = a.shape
    if (r, c) == (rows, cols):
        return a
    return jnp.pad(a, ((0, rows - r), (0, cols - c)))


# ----------------------- tiled matmul (logits projection) ------------------ #

def _matmul_kernel(x_ref, w_ref, o_ref, acc_ref):
    @pl.when(pl.program_id(2) == 0)
    def _():
        acc_ref[...] = jnp.zeros_like(acc_ref)

    acc_ref[...] += jnp.dot(x_ref[...], w_ref[...],
                            preferred_element_type=jnp.float32)

    @pl.when(pl.program_id(2) == pl.num_programs(2) - 1)
    def _():
        o_ref[...] = acc_ref[...].astype(o_ref.dtype)


def matmul(x, w, *, out_dtype=jnp.bfloat16, tm=128, tn=256, tk=512):
    """Tiled, pipelined x @ w with f32 accumulation.  Pads/slices if needed."""
    M, K = x.shape
    K2, N = w.shape
    assert K == K2
    tm = _pick_tile(M, tm, 16)    # bf16 packs [16,128] per vreg -> 16-row align
    tn = _pick_tile(N, tn, 128)
    tk = _pick_tile(K, tk, 128)
    Mp, Np, Kp = _round_up(M, tm), _round_up(N, tn), _round_up(K, tk)
    xp = _pad2(x, Mp, Kp)
    wp = _pad2(w, Kp, Np)
    out = pl.pallas_call(
        _matmul_kernel,
        out_shape=jax.ShapeDtypeStruct((Mp, Np), out_dtype),
        grid=(Mp // tm, Np // tn, Kp // tk),
        in_specs=[pl.BlockSpec((tm, tk), lambda i, j, k: (i, k)),
                  pl.BlockSpec((tk, tn), lambda i, j, k: (k, j))],
        out_specs=pl.BlockSpec((tm, tn), lambda i, j, k: (i, j)),
        scratch_shapes=[pltpu.VMEM((tm, tn), jnp.float32)],
        compiler_params=pltpu.CompilerParams(
            dimension_semantics=("parallel", "parallel", "arbitrary"),
            vmem_limit_bytes=_VMEM_LIMIT),
    )(xp, wp)
    if (Mp, Np) != (M, N):
        out = out[:M, :N]
    return out


# ----------------------- fused decoder layer (one call) --------------------- #

def _decoder_layer_kernel(x_ref, pad_ref, wqkv_ref, wo_ref, g1_ref, b1_ref,
                          w1_ref, w2_ref, g2_ref, b2_ref,
                          o_ref, attn_ref, *, n_heads, scale, eps):
    S = x_ref.shape[1]
    D = x_ref.shape[2]
    dk = D // n_heads

    x = x_ref[0]                                   # [S, D]  bf16
    pad = pad_ref[0]                               # [1, S]  f32 (1.0 = pad key)

    # --- fused QKV projection (no HBM round trip for qkv) --------------------
    qkv = jnp.dot(x, wqkv_ref[...],
                  preferred_element_type=jnp.float32).astype(x.dtype)  # [S, 3D]

    # --- causal + key-side pad mask, built in VMEM (no [B,S,S] HBM mask) ----
    row = jax.lax.broadcasted_iota(jnp.int32, (S, S), 0)
    col = jax.lax.broadcasted_iota(jnp.int32, (S, S), 1)
    masked = jnp.logical_or(col > row, pad > 0.0)

    # --- per-head scaled dot-product attention -------------------------------
    ctx_parts = []
    for h in range(n_heads):                       # heads unrolled (static)
        q = qkv[:, h * dk:(h + 1) * dk] * scale    # pre-scaled q: S*dk muls
        k = qkv[:, D + h * dk: D + (h + 1) * dk]
        v = qkv[:, 2 * D + h * dk: 2 * D + (h + 1) * dk]
        # scores = q @ k^T without an explicit transpose (contract last dims)
        s = jax.lax.dot_general(q, k, (((1,), (1,)), ((), ())),
                                preferred_element_type=jnp.float32)
        s = jnp.where(masked, jnp.float32(-1e9), s)      # masked_fill
        m = jnp.max(s, axis=-1, keepdims=True)
        e = jnp.exp(s - m)
        p = e / jnp.sum(e, axis=-1, keepdims=True)       # exact softmax
        ctx_parts.append(jnp.dot(p.astype(v.dtype), v,
                                 preferred_element_type=jnp.float32))
        attn_ref[0, h] = p.astype(attn_ref.dtype)        # bf16 writeback
    # single lane-dense [S, D] context instead of H sub-lane stores
    ctx = jnp.concatenate(ctx_parts, axis=-1)

    # --- output projection + residual + LayerNorm ----------------------------
    y = jnp.dot(ctx.astype(x.dtype), wo_ref[...],
                preferred_element_type=jnp.float32) + x.astype(jnp.float32)
    mean = jnp.mean(y, axis=-1, keepdims=True)
    var = jnp.mean(jnp.square(y - mean), axis=-1, keepdims=True)   # biased
    y = ((y - mean) * jax.lax.rsqrt(var + eps)
         * g1_ref[...].astype(jnp.float32) + b1_ref[...].astype(jnp.float32))
    y_bf = y.astype(x.dtype)

    # --- FFN: relu(y @ w1) @ w2 + residual + LayerNorm -----------------------
    hmid = jnp.dot(y_bf, w1_ref[...], preferred_element_type=jnp.float32)
    hmid = jnp.maximum(hmid, 0.0).astype(x.dtype)        # ReLU, bf16 for MXU
    z = jnp.dot(hmid, w2_ref[...], preferred_element_type=jnp.float32) + y
    mean = jnp.mean(z, axis=-1, keepdims=True)
    var = jnp.mean(jnp.square(z - mean), axis=-1, keepdims=True)   # biased
    z = ((z - mean) * jax.lax.rsqrt(var + eps)
         * g2_ref[...].astype(jnp.float32) + b2_ref[...].astype(jnp.float32))
    o_ref[0] = z.astype(o_ref.dtype)


def decoder_layer(x, pad, lp, *, n_heads, eps=1e-5):
    """x: [B, S, D] bf16; pad: [B, 1, S] f32 (1.0 = pad token)."""
    B, S, D = x.shape
    dk = D // n_heads
    F = lp["w1"].shape[1]
    kernel = functools.partial(_decoder_layer_kernel, n_heads=n_heads,
                               scale=1.0 / math.sqrt(dk), eps=eps)
    out, attn = pl.pallas_call(
        kernel,
        out_shape=(jax.ShapeDtypeStruct((B, S, D), x.dtype),
                   jax.ShapeDtypeStruct((B, n_heads, S, S), jnp.bfloat16)),
        grid=(B,),
        in_specs=[pl.BlockSpec((1, S, D), lambda b: (b, 0, 0)),
                  pl.BlockSpec((1, 1, S), lambda b: (b, 0, 0)),
                  pl.BlockSpec((D, 3 * D), lambda b: (0, 0)),
                  pl.BlockSpec((D, D), lambda b: (0, 0)),
                  pl.BlockSpec((1, D), lambda b: (0, 0)),
                  pl.BlockSpec((1, D), lambda b: (0, 0)),
                  pl.BlockSpec((D, F), lambda b: (0, 0)),
                  pl.BlockSpec((F, D), lambda b: (0, 0)),
                  pl.BlockSpec((1, D), lambda b: (0, 0)),
                  pl.BlockSpec((1, D), lambda b: (0, 0))],
        out_specs=(pl.BlockSpec((1, S, D), lambda b: (b, 0, 0)),
                   pl.BlockSpec((1, n_heads, S, S), lambda b: (b, 0, 0, 0))),
        compiler_params=pltpu.CompilerParams(
            dimension_semantics=("parallel",),
            vmem_limit_bytes=_VMEM_LIMIT),
    )(x, pad, lp["wqkv"], lp["wo"], lp["ln1_g"], lp["ln1_b"],
      lp["w1"], lp["w2"], lp["ln2_g"], lp["ln2_b"])
    return out, attn


# ------------------------------ Model (glue) -------------------------------- #

def sinusoidal_pos_encoding(max_len, d_model):
    pos = jnp.arange(max_len, dtype=jnp.float32)[:, None]
    div = jnp.exp(jnp.arange(0, d_model, 2, dtype=jnp.float32)
                  * (-math.log(10000.0) / d_model))
    pe = jnp.zeros((max_len, d_model), dtype=jnp.float32)
    pe = pe.at[:, 0::2].set(jnp.sin(pos * div))
    pe = pe.at[:, 1::2].set(jnp.cos(pos * div))
    return pe  # [max_len, d_model]


def init_params(key, *, d_model, n_layers, n_heads, ffn_hidden, tgt_voc_size,
                max_len):
    del n_heads  # head split happens inside the fused layer kernel
    vpad = _round_up(tgt_voc_size, 128)   # lane-dense logits projection
    ks = jax.random.split(key, 2 + 4 * n_layers)
    scale = 0.02
    wdt = jnp.bfloat16
    proj = scale * jax.random.normal(ks[1], (d_model, tgt_voc_size), jnp.float32)
    proj = jnp.pad(proj, ((0, 0), (0, vpad - tgt_voc_size)))
    params = {
        "tgt_emb": scale * jax.random.normal(ks[0], (tgt_voc_size, d_model),
                                             jnp.float32),
        "proj": proj.astype(wdt),
        "pos_enc": sinusoidal_pos_encoding(max_len, d_model),
        "layers": [],
    }
    for l in range(n_layers):
        kqkv, ko, k1, k2 = ks[2 + 4 * l: 2 + 4 * (l + 1)]
        params["layers"].append({
            # fused [D, 3D] QKV projection weight (bias=False)
            "wqkv": (scale * jax.random.normal(kqkv, (d_model, 3 * d_model),
                                               jnp.float32)).astype(wdt),
            "wo": (scale * jax.random.normal(ko, (d_model, d_model),
                                             jnp.float32)).astype(wdt),
            "ln1_g": jnp.ones((1, d_model), jnp.float32),
            "ln1_b": jnp.zeros((1, d_model), jnp.float32),
            "w1": (scale * jax.random.normal(k1, (d_model, ffn_hidden),
                                             jnp.float32)).astype(wdt),
            "w2": (scale * jax.random.normal(k2, (ffn_hidden, d_model),
                                             jnp.float32)).astype(wdt),
            "ln2_g": jnp.ones((1, d_model), jnp.float32),
            "ln2_b": jnp.zeros((1, d_model), jnp.float32),
        })
    return params


def gpt_forward(params, dec_inputs, *, n_heads, trg_pad_idx, tgt_voc_size):
    B, S = dec_inputs.shape
    # Decoder: embedding + positional encoding (dropout == identity, eval mode)
    x = jnp.take(params["tgt_emb"], dec_inputs, axis=0)      # [B, S, D] f32
    x = x + params["pos_enc"][None, :S, :]
    x = x.astype(jnp.bfloat16)                                # [B, S, D] bf16
    D = x.shape[-1]
    # key-side pad row; causal mask is built inside the fused layer kernel
    pad = (dec_inputs == trg_pad_idx).astype(jnp.float32).reshape(B, 1, S)
    attns = []
    for lp in params["layers"]:
        x, attn = decoder_layer(x, pad, lp, n_heads=n_heads)
        attns.append(attn)
    # final projection (bias=False, vocab padded to 128 lanes) and .view(-1, V)
    x2 = x.reshape(B * S, D)                                  # free row-major view
    logits = matmul(x2, params["proj"], out_dtype=jnp.float32)  # [B*S, Vpad]
    logits = logits[:, :tgt_voc_size]
    return logits, attns


# ---------------------------------- main ------------------------------------ #

if __name__ == "__main__":
    # Small but TPU-friendly config (lane dims are multiples of 128).
    B, S = 2, 128
    d_model, n_heads, n_layers = 128, 4, 2
    ffn_hidden, tgt_voc_size = 256, 50
    max_len, trg_pad_idx = 256, 0

    key = jax.random.PRNGKey(0)
    pkey, dkey = jax.random.split(key)
    params = init_params(pkey, d_model=d_model, n_layers=n_layers,
                         n_heads=n_heads, ffn_hidden=ffn_hidden,
                         tgt_voc_size=tgt_voc_size, max_len=max_len)

    # Tokens in [0, vocab); include pad tokens (== trg_pad_idx) to exercise the pad mask.
    dec_inputs = jax.random.randint(dkey, (B, S), 0, tgt_voc_size, dtype=jnp.int32)
    dec_inputs = dec_inputs.at[:, -2:].set(trg_pad_idx)

    fwd = jax.jit(functools.partial(gpt_forward, n_heads=n_heads,
                                    trg_pad_idx=trg_pad_idx,
                                    tgt_voc_size=tgt_voc_size))
    logits, attns = fwd(params, dec_inputs)
    jax.block_until_ready(logits)
    for a in attns:
        jax.block_until_ready(a)

    assert logits.shape == (B * S, tgt_voc_size)
    assert all(a.shape == (B, n_heads, S, S) for a in attns)
    assert bool(jnp.all(jnp.isfinite(logits)))
    assert all(bool(jnp.all(jnp.isfinite(a.astype(jnp.float32)))) for a in attns)
    print("KERNEL_OK")
</pallas_src>

<mosaic_0001>
module attributes {stable_mosaic.version = 11 : i64} {
  func.func @_matmul_kernel(%arg0: i32, %arg1: i32, %arg2: i32, %arg3: memref<128x128xbf16, #tpu.memory_space<vmem>>, %arg4: memref<128x128xbf16, #tpu.memory_space<vmem>>, %arg5: memref<128x128xf32, #tpu.memory_space<vmem>>, %arg6: memref<128x128xf32, #tpu.memory_space<vmem>>) attributes {dimension_semantics = [#tpu.dimension_semantics<parallel>, #tpu.dimension_semantics<parallel>, #tpu.dimension_semantics<arbitrary>], iteration_bounds = array<i64: 2, 1, 1>, scalar_prefetch = 0 : i64, scratch_operands = 1 : i64, tpu.core_type = #tpu.core_type<tc>, window_params = [{transform_indices = @transform_0, window_bounds = array<i64: 128, 128>}, {transform_indices = @transform_1, window_bounds = array<i64: 128, 128>}, {transform_indices = @transform_2, window_bounds = array<i64: 128, 128>}]} {
    %c0_i32 = arith.constant 0 : i32
    %0 = arith.cmpi eq, %arg2, %c0_i32 : i32
    %1 = arith.extui %0 : i1 to i32
    %c0_i32_0 = arith.constant 0 : i32
    %2 = arith.cmpi ne, %1, %c0_i32_0 : i32
    scf.if %2 {
      %cst_10 = arith.constant 0.000000e+00 : f32
      %12 = vector.broadcast %cst_10 : f32 to vector<128x128xf32>
      %c0_11 = arith.constant 0 : index
      %c0_12 = arith.constant 0 : index
      %13 = vector.load %arg6[%c0_11, %c0_12] : memref<128x128xf32, #tpu.memory_space<vmem>>, vector<128x128xf32>
      tpu.vector_store %arg6[%c0_11, %c0_12], %12 {strides = array<i32>} : memref<128x128xf32, #tpu.memory_space<vmem>>, vector<128x128xf32>,
    } else {
    }
    %c0 = arith.constant 0 : index
    %c0_1 = arith.constant 0 : index
    %3 = vector.load %arg6[%c0, %c0_1] : memref<128x128xf32, #tpu.memory_space<vmem>>, vector<128x128xf32>
    %c0_2 = arith.constant 0 : index
    %c0_3 = arith.constant 0 : index
    %4 = vector.load %arg3[%c0_2, %c0_3] : memref<128x128xbf16, #tpu.memory_space<vmem>>, vector<128x128xbf16>
    %c0_4 = arith.constant 0 : index
    %c0_5 = arith.constant 0 : index
    %5 = vector.load %arg4[%c0_4, %c0_5] : memref<128x128xbf16, #tpu.memory_space<vmem>>, vector<128x128xbf16>
    %cst = arith.constant dense<0.000000e+00> : vector<128x128xf32>
    %6 = tpu.matmul %4, %5, %cst {dimension_numbers = #tpu.dot_dimension_numbers<[1], [0], [0], [1], [0, 0, 1, 1], [], []>} : vector<128x128xbf16>, vector<128x128xbf16>, vector<128x128xf32> -> vector<128x128xf32>
    %7 = arith.addf %3, %6 : vector<128x128xf32>
    %c0_6 = arith.constant 0 : index
    %c0_7 = arith.constant 0 : index
    %8 = vector.load %arg6[%c0_6, %c0_7] : memref<128x128xf32, #tpu.memory_space<vmem>>, vector<128x128xf32>
    tpu.vector_store %arg6[%c0_6, %c0_7], %7 {strides = array<i32>} : memref<128x128xf32, #tpu.memory_space<vmem>>, vector<128x128xf32>,
    %c0_i32_8 = arith.constant 0 : i32
    %9 = arith.cmpi eq, %arg2, %c0_i32_8 : i32
    %10 = arith.extui %9 : i1 to i32
    %c0_i32_9 = arith.constant 0 : i32
    %11 = arith.cmpi ne, %10, %c0_i32_9 : i32
    scf.if %11 {
      %c0_10 = arith.constant 0 : index
      %c0_11 = arith.constant 0 : index
      %12 = vector.load %arg6[%c0_10, %c0_11] : memref<128x128xf32, #tpu.memory_space<vmem>>, vector<128x128xf32>
      %c0_12 = arith.constant 0 : index
      %c0_13 = arith.constant 0 : index
      %13 = vector.load %arg5[%c0_12, %c0_13] : memref<128x128xf32, #tpu.memory_space<vmem>>, vector<128x128xf32>
      tpu.vector_store %arg5[%c0_12, %c0_13], %12 {strides = array<i32>} : memref<128x128xf32, #tpu.memory_space<vmem>>, vector<128x128xf32>,
    } else {
    }
    return
  }
  func.func @transform_0(%arg0: i32, %arg1: i32, %arg2: i32) -> (i32, i32) {
    %c0_i32 = arith.constant 0 : i32
    return %arg0, %arg2 : i32, i32
  }
  func.func @transform_1(%arg0: i32, %arg1: i32, %arg2: i32) -> (i32, i32) {
    %c0_i32 = arith.constant 0 : i32
    return %arg2, %arg1 : i32, i32
  }
  func.func @transform_2(%arg0: i32, %arg1: i32, %arg2: i32) -> (i32, i32) {
    %c0_i32 = arith.constant 0 : i32
    return %arg0, %arg1 : i32, i32
  }
}

module attributes {stable_mosaic.version = 11 : i64} {
  func.func @_decoder_layer_kernel(%arg0: i32, %arg1: memref<1x128x128xbf16, #tpu.memory_space<vmem>>, %arg2: memref<1x1x128xf32, #tpu.memory_space<vmem>>, %arg3: memref<128x384xbf16, #tpu.memory_space<vmem>>, %arg4: memref<128x128xbf16, #tpu.memory_space<vmem>>, %arg5: memref<1x128xf32, #tpu.memory_space<vmem>>, %arg6: memref<1x128xf32, #tpu.memory_space<vmem>>, %arg7: memref<128x256xbf16, #tpu.memory_space<vmem>>, %arg8: memref<256x128xbf16, #tpu.memory_space<vmem>>, %arg9: memref<1x128xf32, #tpu.memory_space<vmem>>, %arg10: memref<1x128xf32, #tpu.memory_space<vmem>>, %arg11: memref<1x128x128xbf16, #tpu.memory_space<vmem>>, %arg12: memref<1x4x128x128xbf16, #tpu.memory_space<vmem>>) attributes {dimension_semantics = [#tpu.dimension_semantics<parallel>], iteration_bounds = array<i64: 2>, scalar_prefetch = 0 : i64, scratch_operands = 0 : i64, tpu.core_type = #tpu.core_type<tc>, window_params = [{transform_indices = @transform_0, window_bounds = array<i64: 1, 128, 128>}, {transform_indices = @transform_1, window_bounds = array<i64: 1, 1, 128>}, {pipeline_mode = #tpu.pipeline_mode<synchronous>, transform_indices = @transform_2, window_bounds = array<i64: 128, 384>}, {pipeline_mode = #tpu.pipeline_mode<synchronous>, transform_indices = @transform_3, window_bounds = array<i64: 128, 128>}, {pipeline_mode = #tpu.pipeline_mode<synchronous>, transform_indices = @transform_4, window_bounds = array<i64: 1, 128>}, {pipeline_mode = #tpu.pipeline_mode<synchronous>, transform_indices = @transform_5, window_bounds = array<i64: 1, 128>}, {pipeline_mode = #tpu.pipeline_mode<synchronous>, transform_indices = @transform_6, window_bounds = array<i64: 128, 256>}, {pipeline_mode = #tpu.pipeline_mode<synchronous>, transform_indices = @transform_7, window_bounds = array<i64: 256, 128>}, {pipeline_mode = #tpu.pipeline_mode<synchronous>, transform_indices = @transform_8, window_bounds = array<i64: 1, 128>}, {pipeline_mode = #tpu.pipeline_mode<synchronous>, transform_indices = @transform_9, window_bounds = array<i64: 1, 128>}, {transform_indices = @transform_10, window_bounds = array<i64: 1, 128, 128>}, {transform_indices = @transform_11, window_bounds = array<i64: 1, 4, 128, 128>}]} {
    %c0 = arith.constant 0 : index
    %c0_0 = arith.constant 0 : index
    %c0_1 = arith.constant 0 : index
    %0 = vector.load %arg1[%c0, %c0_0, %c0_1] : memref<1x128x128xbf16, #tpu.memory_space<vmem>>, vector<1x128x128xbf16>
    %1 = vector.shape_cast %0 : vector<1x128x128xbf16> to vector<128x128xbf16>
    %c0_2 = arith.constant 0 : index
    %c0_3 = arith.constant 0 : index
    %c0_4 = arith.constant 0 : index
    %2 = vector.load %arg2[%c0_2, %c0_3, %c0_4] : memref<1x1x128xf32, #tpu.memory_space<vmem>>, vector<1x1x128xf32>
    %3 = vector.shape_cast %2 : vector<1x1x128xf32> to vector<1x128xf32>
    %c0_5 = arith.constant 0 : index
    %c0_6 = arith.constant 0 : index
    %4 = vector.load %arg3[%c0_5, %c0_6] : memref<128x384xbf16, #tpu.memory_space<vmem>>, vector<128x384xbf16>
    %cst = arith.constant dense<0.000000e+00> : vector<128x384xf32>
    %5 = tpu.matmul %1, %4, %cst {dimension_numbers = #tpu.dot_dimension_numbers<[1], [0], [0], [1], [0, 0, 1, 1], [], []>} : vector<128x128xbf16>, vector<128x384xbf16>, vector<128x384xf32> -> vector<128x384xf32>
    %6 = arith.truncf %5 : vector<128x384xf32> to vector<128x384xbf16>
    %7 = tpu.iota {dimensions = array<i32: 0>} : vector<128x128xi32>
    %8 = tpu.iota {dimensions = array<i32: 1>} : vector<128x128xi32>
    %9 = arith.cmpi sgt, %8, %7 : vector<128x128xi32>
    %cst_7 = arith.constant 0.000000e+00 : f32
    %10 = vector.broadcast %cst_7 : f32 to vector<1x128xf32>
    %11 = arith.cmpf ogt, %3, %10 : vector<1x128xf32>
    %12 = vector.broadcast %11 : vector<1x128xi1> to vector<128x128xi1>
    %13 = arith.ori %9, %12 : vector<128x128xi1>
    %14 = vector.extract_strided_slice %6 {offsets = [0, 0], sizes = [128, 32], strides = [1, 1]} : vector<128x384xbf16> to vector<128x32xbf16>
    %cst_8 = arith.constant 1.767580e-01 : bf16
    %15 = vector.broadcast %cst_8 : bf16 to vector<128x32xbf16>
    %16 = arith.mulf %14, %15 : vector<128x32xbf16>
    %17 = vector.extract_strided_slice %6 {offsets = [0, 128], sizes = [128, 32], strides = [1, 1]} : vector<128x384xbf16> to vector<128x32xbf16>
    %18 = vector.extract_strided_slice %6 {offsets = [0, 256], sizes = [128, 32], strides = [1, 1]} : vector<128x384xbf16> to vector<128x32xbf16>
    %cst_9 = arith.constant dense<0.000000e+00> : vector<128x128xf32>
    %19 = tpu.matmul %16, %17, %cst_9 {dimension_numbers = #tpu.dot_dimension_numbers<[1], [1], [0], [0], [0, 0, 1, 0], [], []>} : vector<128x32xbf16>, vector<128x32xbf16>, vector<128x128xf32> -> vector<128x128xf32>
    %cst_10 = arith.constant -1.000000e+09 : f32
    %20 = vector.broadcast %cst_10 : f32 to vector<128x128xf32>
    %21 = arith.select %13, %20, %19 : vector<128x128xi1>, vector<128x128xf32>
    %cst_11 = arith.constant dense<0xFF800000> : vector<128xf32>
    %22 = vector.multi_reduction <maximumf>, %21, %cst_11 [1] : vector<128x128xf32> to vector<128xf32>
    %23 = vector.shape_cast %22 : vector<128xf32> to vector<128x1xf32>
    %24 = vector.broadcast %23 : vector<128x1xf32> to vector<128x128xf32>
    %25 = arith.subf %21, %24 : vector<128x128xf32>
    %26 = math.exp %25 : vector<128x128xf32>
    %cst_12 = arith.constant dense<0.000000e+00> : vector<128xf32>
    %27 = vector.multi_reduction <add>, %26, %cst_12 [1] : vector<128x128xf32> to vector<128xf32>
    %28 = vector.shape_cast %27 : vector<128xf32> to vector<128x1xf32>
    %29 = vector.broadcast %28 : vector<128x1xf32> to vector<128x128xf32>
    %30 = arith.divf %26, %29 : vector<128x128xf32>
    %31 = arith.truncf %30 : vector<128x128xf32> to vector<128x128xbf16>
    %cst_13 = arith.constant dense<0.000000e+00> : vector<128x32xf32>
    %32 = tpu.matmul %31, %18, %cst_13 {dimension_numbers = #tpu.dot_dimension_numbers<[1], [0], [0], [1], [0, 0, 1, 1], [], []>} : vector<128x128xbf16>, vector<128x32xbf16>, vector<128x32xf32> -> vector<128x32xf32>
    %33 = arith.truncf %30 : vector<128x128xf32> to vector<128x128xbf16>
    %c0_14 = arith.constant 0 : index
    %c0_15 = arith.constant 0 : index
    %c0_16 = arith.constant 0 : index
    %c0_17 = arith.constant 0 : index
    %34 = vector.load %arg12[%c0_14, %c0_15, %c0_16, %c0_17] : memref<1x4x128x128xbf16, #tpu.memory_space<vmem>>, vector<1x1x128x128xbf16>
    %35 = vector.shape_cast %34 : vector<1x1x128x128xbf16> to vector<128x128xbf16>
    %36 = vector.shape_cast %33 : vector<128x128xbf16> to vector<1x1x128x128xbf16>
    tpu.vector_store %arg12[%c0_14, %c0_15, %c0_16, %c0_17], %36 {strides = array<i32>} : memref<1x4x128x128xbf16, #tpu.memory_space<vmem>>, vector<1x1x128x128xbf16>,
    %37 = vector.extract_strided_slice %6 {offsets = [0, 32], sizes = [128, 32], strides = [1, 1]} : vector<128x384xbf16> to vector<128x32xbf16>
    %cst_18 = arith.constant 1.767580e-01 : bf16
    %38 = vector.broadcast %cst_18 : bf16 to vector<128x32xbf16>
    %39 = arith.mulf %37, %38 : vector<128x32xbf16>
    %40 = vector.extract_strided_slice %6 {offsets = [0, 160], sizes = [128, 32], strides = [1, 1]} : vector<128x384xbf16> to vector<128x32xbf16>
    %41 = vector.extract_strided_slice %6 {offsets = [0, 288], sizes = [128, 32], strides = [1, 1]} : vector<128x384xbf16> to vector<128x32xbf16>
    %cst_19 = arith.constant dense<0.000000e+00> : vector<128x128xf32>
    %42 = tpu.matmul %39, %40, %cst_19 {dimension_numbers = #tpu.dot_dimension_numbers<[1], [1], [0], [0], [0, 0, 1, 0], [], []>} : vector<128x32xbf16>, vector<128x32xbf16>, vector<128x128xf32> -> vector<128x128xf32>
    %cst_20 = arith.constant -1.000000e+09 : f32
    %43 = vector.broadcast %cst_20 : f32 to vector<128x128xf32>
    %44 = arith.select %13, %43, %42 : vector<128x128xi1>, vector<128x128xf32>
    %cst_21 = arith.constant dense<0xFF800000> : vector<128xf32>
    %45 = vector.multi_reduction <maximumf>, %44, %cst_21 [1] : vector<128x128xf32> to vector<128xf32>
    %46 = vector.shape_cast %45 : vector<128xf32> to vector<128x1xf32>
    %47 = vector.broadcast %46 : vector<128x1xf32> to vector<128x128xf32>
    %48 = arith.subf %44, %47 : vector<128x128xf32>
    %49 = math.exp %48 : vector<128x128xf32>
    %cst_22 = arith.constant dense<0.000000e+00> : vector<128xf32>
    %50 = vector.multi_reduction <add>, %49, %cst_22 [1] : vector<128x128xf32> to vector<128xf32>
    %51 = vector.shape_cast %50 : vector<128xf32> to vector<128x1xf32>
    %52 = vector.broadcast %51 : vector<128x1xf32> to vector<128x128xf32>
    %53 = arith.divf %49, %52 : vector<128x128xf32>
    %54 = arith.truncf %53 : vector<128x128xf32> to vector<128x128xbf16>
    %cst_23 = arith.constant dense<0.000000e+00> : vector<128x32xf32>
    %55 = tpu.matmul %54, %41, %cst_23 {dimension_numbers = #tpu.dot_dimension_numbers<[1], [0], [0], [1], [0, 0, 1, 1], [], []>} : vector<128x128xbf16>, vector<128x32xbf16>, vector<128x32xf32> -> vector<128x32xf32>
    %56 = arith.truncf %53 : vector<128x128xf32> to vector<128x128xbf16>
    %c0_24 = arith.constant 0 : index
    %c1 = arith.constant 1 : index
    %c0_25 = arith.constant 0 : index
    %c0_26 = arith.constant 0 : index
    %57 = vector.load %arg12[%c0_24, %c1, %c0_25, %c0_26] : memref<1x4x128x128xbf16, #tpu.memory_space<vmem>>, vector<1x1x128x128xbf16>
    %58 = vector.shape_cast %57 : vector<1x1x128x128xbf16> to vector<128x128xbf16>
    %59 = vector.shape_cast %56 : vector<128x128xbf16> to vector<1x1x128x128xbf16>
    tpu.vector_store %arg12[%c0_24, %c1, %c0_25, %c0_26], %59 {strides = array<i32>} : memref<1x4x128x128xbf16, #tpu.memory_space<vmem>>, vector<1x1x128x128xbf16>,
    %60 = vector.extract_strided_slice %6 {offsets = [0, 64], sizes = [128, 32], strides = [1, 1]} : vector<128x384xbf16> to vector<128x32xbf16>
    %cst_27 = arith.constant 1.767580e-01 : bf16
    %61 = vector.broadcast %cst_27 : bf16 to vector<128x32xbf16>
    %62 = arith.mulf %60, %61 : vector<128x32xbf16>
    %63 = vector.extract_strided_slice %6 {offsets = [0, 192], sizes = [128, 32], strides = [1, 1]} : vector<128x384xbf16> to vector<128x32xbf16>
    %64 = vector.extract_strided_slice %6 {offsets = [0, 320], sizes = [128, 32], strides = [1, 1]} : vector<128x384xbf16> to vector<128x32xbf16>
    %cst_28 = arith.constant dense<0.000000e+00> : vector<128x128xf32>
    %65 = tpu.matmul %62, %63, %cst_28 {dimension_numbers = #tpu.dot_dimension_numbers<[1], [1], [0], [0], [0, 0, 1, 0], [], []>} : vector<128x32xbf16>, vector<128x32xbf16>, vector<128x128xf32> -> vector<128x128xf32>
    %cst_29 = arith.constant -1.000000e+09 : f32
    %66 = vector.broadcast %cst_29 : f32 to vector<128x128xf32>
    %67 = arith.select %13, %66, %65 : vector<128x128xi1>, vector<128x128xf32>
    %cst_30 = arith.constant dense<0xFF800000> : vector<128xf32>
    %68 = vector.multi_reduction <maximumf>, %67, %cst_30 [1] : vector<128x128xf32> to vector<128xf32>
    %69 = vector.shape_cast %68 : vector<128xf32> to vector<128x1xf32>
    %70 = vector.broadcast %69 : vector<128x1xf32> to vector<128x128xf32>
    %71 = arith.subf %67, %70 : vector<128x128xf32>
    %72 = math.exp %71 : vector<128x128xf32>
    %cst_31 = arith.constant dense<0.000000e+00> : vector<128xf32>
    %73 = vector.multi_reduction <add>, %72, %cst_31 [1] : vector<128x128xf32> to vector<128xf32>
    %74 = vector.shape_cast %73 : vector<128xf32> to vector<128x1xf32>
    %75 = vector.broadcast %74 : vector<128x1xf32> to vector<128x128xf32>
    %76 = arith.divf %72, %75 : vector<128x128xf32>
    %77 = arith.truncf %76 : vector<128x128xf32> to vector<128x128xbf16>
    %cst_32 = arith.constant dense<0.000000e+00> : vector<128x32xf32>
    %78 = tpu.matmul %77, %64, %cst_32 {dimension_numbers = #tpu.dot_dimension_numbers<[1], [0], [0], [1], [0, 0, 1, 1], [], []>} : vector<128x128xbf16>, vector<128x32xbf16>, vector<128x32xf32> -> vector<128x32xf32>
    %79 = arith.truncf %76 : vector<128x128xf32> to vector<128x128xbf16>
    %c0_33 = arith.constant 0 : index
    %c2 = arith.constant 2 : index
    %c0_34 = arith.constant 0 : index
    %c0_35 = arith.constant 0 : index
    %80 = vector.load %arg12[%c0_33, %c2, %c0_34, %c0_35] : memref<1x4x128x128xbf16, #tpu.memory_space<vmem>>, vector<1x1x128x128xbf16>
    %81 = vector.shape_cast %80 : vector<1x1x128x128xbf16> to vector<128x128xbf16>
    %82 = vector.shape_cast %79 : vector<128x128xbf16> to vector<1x1x128x128xbf16>
    tpu.vector_store %arg12[%c0_33, %c2, %c0_34, %c0_35], %82 {strides = array<i32>} : memref<1x4x128x128xbf16, #tpu.memory_space<vmem>>, vector<1x1x128x128xbf16>,
    %83 = vector.extract_strided_slice %6 {offsets = [0, 96], sizes = [128, 32], strides = [1, 1]} : vector<128x384xbf16> to vector<128x32xbf16>
    %cst_36 = arith.constant 1.767580e-01 : bf16
    %84 = vector.broadcast %cst_36 : bf16 to vector<128x32xbf16>
    %85 = arith.mulf %83, %84 : vector<128x32xbf16>
    %86 = vector.extract_strided_slice %6 {offsets = [0, 224], sizes = [128, 32], strides = [1, 1]} : vector<128x384xbf16> to vector<128x32xbf16>
    %87 = vector.extract_strided_slice %6 {offsets = [0, 352], sizes = [128, 32], strides = [1, 1]} : vector<128x384xbf16> to vector<128x32xbf16>
    %cst_37 = arith.constant dense<0.000000e+00> : vector<128x128xf32>
    %88 = tpu.matmul %85, %86, %cst_37 {dimension_numbers = #tpu.dot_dimension_numbers<[1], [1], [0], [0], [0, 0, 1, 0], [], []>} : vector<128x32xbf16>, vector<128x32xbf16>, vector<128x128xf32> -> vector<128x128xf32>
    %cst_38 = arith.constant -1.000000e+09 : f32
    %89 = vector.broadcast %cst_38 : f32 to vector<128x128xf32>
    %90 = arith.select %13, %89, %88 : vector<128x128xi1>, vector<128x128xf32>
    %cst_39 = arith.constant dense<0xFF800000> : vector<128xf32>
    %91 = vector.multi_reduction <maximumf>, %90, %cst_39 [1] : vector<128x128xf32> to vector<128xf32>
    %92 = vector.shape_cast %91 : vector<128xf32> to vector<128x1xf32>
    %93 = vector.broadcast %92 : vector<128x1xf32> to vector<128x128xf32>
    %94 = arith.subf %90, %93 : vector<128x128xf32>
    %95 = math.exp %94 : vector<128x128xf32>
    %cst_40 = arith.constant dense<0.000000e+00> : vector<128xf32>
    %96 = vector.multi_reduction <add>, %95, %cst_40 [1] : vector<128x128xf32> to vector<128xf32>
    %97 = vector.shape_cast %96 : vector<128xf32> to vector<128x1xf32>
    %98 = vector.broadcast %97 : vector<128x1xf32> to vector<128x128xf32>
    %99 = arith.divf %95, %98 : vector<128x128xf32>
    %100 = arith.truncf %99 : vector<128x128xf32> to vector<128x128xbf16>
    %cst_41 = arith.constant dense<0.000000e+00> : vector<128x32xf32>
    %101 = tpu.matmul %100, %87, %cst_41 {dimension_numbers = #tpu.dot_dimension_numbers<[1], [0], [0], [1], [0, 0, 1, 1], [], []>} : vector<128x128xbf16>, vector<128x32xbf16>, vector<128x32xf32> -> vector<128x32xf32>
    %102 = arith.truncf %99 : vector<128x128xf32> to vector<128x128xbf16>
    %c0_42 = arith.constant 0 : index
    %c3 = arith.constant 3 : index
    %c0_43 = arith.constant 0 : index
    %c0_44 = arith.constant 0 : index
    %103 = vector.load %arg12[%c0_42, %c3, %c0_43, %c0_44] : memref<1x4x128x128xbf16, #tpu.memory_space<vmem>>, vector<1x1x128x128xbf16>
    %104 = vector.shape_cast %103 : vector<1x1x128x128xbf16> to vector<128x128xbf16>
    %105 = vector.shape_cast %102 : vector<128x128xbf16> to vector<1x1x128x128xbf16>
    tpu.vector_store %arg12[%c0_42, %c3, %c0_43, %c0_44], %105 {strides = array<i32>} : memref<1x4x128x128xbf16, #tpu.memory_space<vmem>>, vector<1x1x128x128xbf16>,
    %106 = tpu.concatenate %32, %55, %78, %101 in 1 : vector<128x32xf32>, vector<128x32xf32>, vector<128x32xf32>, vector<128x32xf32> -> vector<128x128xf32>
    %107 = arith.truncf %106 : vector<128x128xf32> to vector<128x128xbf16>
    %c0_45 = arith.constant 0 : index
    %c0_46 = arith.constant 0 : index
    %108 = vector.load %arg4[%c0_45, %c0_46] : memref<128x128xbf16, #tpu.memory_space<vmem>>, vector<128x128xbf16>
    %cst_47 = arith.constant dense<0.000000e+00> : vector<128x128xf32>
    %109 = tpu.matmul %107, %108, %cst_47 {dimension_numbers = #tpu.dot_dimension_numbers<[1], [0], [0], [1], [0, 0, 1, 1], [], []>} : vector<128x128xbf16>, vector<128x128xbf16>, vector<128x128xf32> -> vector<128x128xf32>
    %110 = arith.extf %1 : vector<128x128xbf16> to vector<128x128xf32>
    %111 = arith.addf %109, %110 : vector<128x128xf32>
    %cst_48 = arith.constant dense<0.000000e+00> : vector<128xf32>
    %112 = vector.multi_reduction <add>, %111, %cst_48 [1] : vector<128x128xf32> to vector<128xf32>
    %113 = vector.shape_cast %112 : vector<128xf32> to vector<128x1xf32>
    %cst_49 = arith.constant 1.280000e+02 : f32
    %114 = vector.broadcast %cst_49 : f32 to vector<128x1xf32>
    %115 = arith.divf %113, %114 : vector<128x1xf32>
    %116 = vector.broadcast %115 : vector<128x1xf32> to vector<128x128xf32>
    %117 = arith.subf %111, %116 : vector<128x128xf32>
    %118 = arith.mulf %117, %117 : vector<128x128xf32>
    %cst_50 = arith.constant dense<0.000000e+00> : vector<128xf32>
    %119 = vector.multi_reduction <add>, %118, %cst_50 [1] : vector<128x128xf32> to vector<128xf32>
    %120 = vector.shape_cast %119 : vector<128xf32> to vector<128x1xf32>
    %cst_51 = arith.constant 1.280000e+02 : f32
    %121 = vector.broadcast %cst_51 : f32 to vector<128x1xf32>
    %122 = arith.divf %120, %121 : vector<128x1xf32>
    %123 = vector.broadcast %115 : vector<128x1xf32> to vector<128x128xf32>
    %124 = arith.subf %111, %123 : vector<128x128xf32>
    %cst_52 = arith.constant 9.99999974E-6 : f32
    %125 = vector.broadcast %cst_52 : f32 to vector<128x1xf32>
    %126 = arith.addf %122, %125 : vector<128x1xf32>
    %127 = math.rsqrt %126 : vector<128x1xf32>
    %128 = vector.broadcast %127 : vector<128x1xf32> to vector<128x128xf32>
    %129 = arith.mulf %124, %128 : vector<128x128xf32>
    %c0_53 = arith.constant 0 : index
    %c0_54 = arith.constant 0 : index
    %130 = vector.load %arg5[%c0_53, %c0_54] : memref<1x128xf32, #tpu.memory_space<vmem>>, vector<1x128xf32>
    %131 = vector.broadcast %130 : vector<1x128xf32> to vector<128x128xf32>
    %132 = arith.mulf %129, %131 : vector<128x128xf32>
    %c0_55 = arith.constant 0 : index
    %c0_56 = arith.constant 0 : index
    %133 = vector.load %arg6[%c0_55, %c0_56] : memref<1x128xf32, #tpu.memory_space<vmem>>, vector<1x128xf32>
    %134 = vector.broadcast %133 : vector<1x128xf32> to vector<128x128xf32>
    %135 = arith.addf %132, %134 : vector<128x128xf32>
    %136 = arith.truncf %135 : vector<128x128xf32> to vector<128x128xbf16>
    %c0_57 = arith.constant 0 : index
    %c0_58 = arith.constant 0 : index
    %137 = vector.load %arg7[%c0_57, %c0_58] : memref<128x256xbf16, #tpu.memory_space<vmem>>, vector<128x256xbf16>
    %cst_59 = arith.constant dense<0.000000e+00> : vector<128x256xf32>
    %138 = tpu.matmul %136, %137, %cst_59 {dimension_numbers = #tpu.dot_dimension_numbers<[1], [0], [0], [1], [0, 0, 1, 1], [], []>} : vector<128x128xbf16>, vector<128x256xbf16>, vector<128x256xf32> -> vector<128x256xf32>
    %cst_60 = arith.constant 0.000000e+00 : f32
    %139 = vector.broadcast %cst_60 : f32 to vector<128x256xf32>
    %140 = arith.maximumf %138, %139 : vector<128x256xf32>
    %141 = arith.truncf %140 : vector<128x256xf32> to vector<128x256xbf16>
    %c0_61 = arith.constant 0 : index
    %c0_62 = arith.constant 0 : index
    %142 = vector.load %arg8[%c0_61, %c0_62] : memref<256x128xbf16, #tpu.memory_space<vmem>>, vector<256x128xbf16>
    %cst_63 = arith.constant dense<0.000000e+00> : vector<128x128xf32>
    %143 = tpu.matmul %141, %142, %cst_63 {dimension_numbers = #tpu.dot_dimension_numbers<[1], [0], [0], [1], [0, 0, 1, 1], [], []>} : vector<128x256xbf16>, vector<256x128xbf16>, vector<128x128xf32> -> vector<128x128xf32>
    %144 = arith.addf %143, %135 : vector<128x128xf32>
    %cst_64 = arith.constant dense<0.000000e+00> : vector<128xf32>
    %145 = vector.multi_reduction <add>, %144, %cst_64 [1] : vector<128x128xf32> to vector<128xf32>
    %146 = vector.shape_cast %145 : vector<128xf32> to vector<128x1xf32>
    %cst_65 = arith.constant 1.280000e+02 : f32
    %147 = vector.broadcast %cst_65 : f32 to vector<128x1xf32>
    %148 = arith.divf %146, %147 : vector<128x1xf32>
    %149 = vector.broadcast %148 : vector<128x1xf32> to vector<128x128xf32>
    %150 = arith.subf %144, %149 : vector<128x128xf32>
    %151 = arith.mulf %150, %150 : vector<128x128xf32>
    %cst_66 = arith.constant dense<0.000000e+00> : vector<128xf32>
    %152 = vector.multi_reduction <add>, %151, %cst_66 [1] : vector<128x128xf32> to vector<128xf32>
    %153 = vector.shape_cast %152 : vector<128xf32> to vector<128x1xf32>
    %cst_67 = arith.constant 1.280000e+02 : f32
    %154 = vector.broadcast %cst_67 : f32 to vector<128x1xf32>
    %155 = arith.divf %153, %154 : vector<128x1xf32>
    %156 = vector.broadcast %148 : vector<128x1xf32> to vector<128x128xf32>
    %157 = arith.subf %144, %156 : vector<128x128xf32>
    %cst_68 = arith.constant 9.99999974E-6 : f32
    %158 = vector.broadcast %cst_68 : f32 to vector<128x1xf32>
    %159 = arith.addf %155, %158 : vector<128x1xf32>
    %160 = math.rsqrt %159 : vector<128x1xf32>
    %161 = vector.broadcast %160 : vector<128x1xf32> to vector<128x128xf32>
    %162 = arith.mulf %157, %161 : vector<128x128xf32>
    %c0_69 = arith.constant 0 : index
    %c0_70 = arith.constant 0 : index
    %163 = vector.load %arg9[%c0_69, %c0_70] : memref<1x128xf32, #tpu.memory_space<vmem>>, vector<1x128xf32>
    %164 = vector.broadcast %163 : vector<1x128xf32> to vector<128x128xf32>
    %165 = arith.mulf %162, %164 : vector<128x128xf32>
    %c0_71 = arith.constant 0 : index
    %c0_72 = arith.constant 0 : index
    %166 = vector.load %arg10[%c0_71, %c0_72] : memref<1x128xf32, #tpu.memory_space<vmem>>, vector<1x128xf32>
    %167 = vector.broadcast %166 : vector<1x128xf32> to vector<128x128xf32>
    %168 = arith.addf %165, %167 : vector<128x128xf32>
    %169 = arith.truncf %168 : vector<128x128xf32> to vector<128x128xbf16>
    %c0_73 = arith.constant 0 : index
    %c0_74 = arith.constant 0 : index
    %c0_75 = arith.constant 0 : index
    %170 = vector.load %arg11[%c0_73, %c0_74, %c0_75] : memref<1x128x128xbf16, #tpu.memory_space<vmem>>, vector<1x128x128xbf16>
    %171 = vector.shape_cast %170 : vector<1x128x128xbf16> to vector<128x128xbf16>
    %172 = vector.shape_cast %169 : vector<128x128xbf16> to vector<1x128x128xbf16>
    tpu.vector_store %arg11[%c0_73, %c0_74, %c0_75], %172 {strides = array<i32>} : memref<1x128x128xbf16, #tpu.memory_space<vmem>>, vector<1x128x128xbf16>,
    return
  }
  func.func @transform_0(%arg0: i32) -> (i32, i32, i32) {
    %c0_i32 = arith.constant 0 : i32
    %c0_i32_0 = arith.constant 0 : i32
    %c0_i32_1 = arith.constant 0 : i32
    return %arg0, %c0_i32, %c0_i32_0 : i32, i32, i32
  }
  func.func @transform_1(%arg0: i32) -> (i32, i32, i32) {
    %c0_i32 = arith.constant 0 : i32
    %c0_i32_0 = arith.constant 0 : i32
    %c0_i32_1 = arith.constant 0 : i32
    return %arg0, %c0_i32, %c0_i32_0 : i32, i32, i32
  }
  func.func @transform_2(%arg0: i32) -> (i32, i32) {
    %c0_i32 = arith.constant 0 : i32
    %c0_i32_0 = arith.constant 0 : i32
    %c0_i32_1 = arith.constant 0 : i32
    return %c0_i32, %c0_i32_0 : i32, i32
  }
  func.func @transform_3(%arg0: i32) -> (i32, i32) {
    %c0_i32 = arith.constant 0 : i32
    %c0_i32_0 = arith.constant 0 : i32
    %c0_i32_1 = arith.constant 0 : i32
    return %c0_i32, %c0_i32_0 : i32, i32
  }
  func.func @transform_4(%arg0: i32) -> (i32, i32) {
    %c0_i32 = arith.constant 0 : i32
    %c0_i32_0 = arith.constant 0 : i32
    %c0_i32_1 = arith.constant 0 : i32
    return %c0_i32, %c0_i32_0 : i32, i32
  }
  func.func @transform_5(%arg0: i32) -> (i32, i32) {
    %c0_i32 = arith.constant 0 : i32
    %c0_i32_0 = arith.constant 0 : i32
    %c0_i32_1 = arith.constant 0 : i32
    return %c0_i32, %c0_i32_0 : i32, i32
  }
  func.func @transform_6(%arg0: i32) -> (i32, i32) {
    %c0_i32 = arith.constant 0 : i32
    %c0_i32_0 = arith.constant 0 : i32
    %c0_i32_1 = arith.constant 0 : i32
    return %c0_i32, %c0_i32_0 : i32, i32
  }
  func.func @transform_7(%arg0: i32) -> (i32, i32) {
    %c0_i32 = arith.constant 0 : i32
    %c0_i32_0 = arith.constant 0 : i32
    %c0_i32_1 = arith.constant 0 : i32
    return %c0_i32, %c0_i32_0 : i32, i32
  }
  func.func @transform_8(%arg0: i32) -> (i32, i32) {
    %c0_i32 = arith.constant 0 : i32
    %c0_i32_0 = arith.constant 0 : i32
    %c0_i32_1 = arith.constant 0 : i32
    return %c0_i32, %c0_i32_0 : i32, i32
  }
  func.func @transform_9(%arg0: i32) -> (i32, i32) {
    %c0_i32 = arith.constant 0 : i32
    %c0_i32_0 = arith.constant 0 : i32
    %c0_i32_1 = arith.constant 0 : i32
    return %c0_i32, %c0_i32_0 : i32, i32
  }
  func.func @transform_10(%arg0: i32) -> (i32, i32, i32) {
    %c0_i32 = arith.constant 0 : i32
    %c0_i32_0 = arith.constant 0 : i32
    %c0_i32_1 = arith.constant 0 : i32
    return %arg0, %c0_i32, %c0_i32_0 : i32, i32, i32
  }
  func.func @transform_11(%arg0: i32) -> (i32, i32, i32, i32) {
    %c0_i32 = arith.constant 0 : i32
    %c0_i32_0 = arith.constant 0 : i32
    %c0_i32_1 = arith.constant 0 : i32
    %c0_i32_2 = arith.constant 0 : i32
    return %arg0, %c0_i32, %c0_i32_0, %c0_i32_1 : i32, i32, i32, i32
  }
}

</mosaic_0001>

<bundles_post_ra>
// kernel: gpt_forward.5
= control target key start
LH: loop header
LB: loop body
LE: loop exit
PB: predicated region body
PF: predicated region fallthrough
CT: control target
= control target key end

     0   :  { %s817_s9 = smov 0   ;;  %s819_s10 = smov 0   ;;  %s906_s0 = inlined_call_operand.vmem [shape: bf16[256,128], index: 0, kind: input, shape index: {}]   ;;  %s907_s1 = inlined_call_operand.vmem [shape: bf16[128,128], index: 1, kind: input, shape index: {}]   ;;  %s908_s2 = inlined_call_operand.vmem [shape: f32[256,128], index: 2, kind: output, shape index: {}]  }
   0x1   :  { %s821_s11 = smov 0  }
   0x2 LB: > { %s31_s12 = sadd.s32 1, %s796_s10  ;;  %p651_p0 = scmp.ge.s32.totalorder %s800_s11, 1  ;;  %s800_s11 = sphi %s821_s11, %s12_s11   ;;  %s796_s10 = sphi %s819_s10, %s910_s10   ;;  %s792_s9 = sphi %s817_s9, %s909_s9  }
   0x3   : > { %p33_p1 = scmp.ge.s32.totalorder %s31_s12, 2  ;;  %p155_p2 = scmp.lt.s32.totalorder %s800_s11, 3 }
   0x5   : > { %s912_s12 = smov (%p33_p1, %s31_s12), 0  ;;  %p156_p3 = pnand %p651_p0, %p155_p2 }
   0x6   : > { %v762_v0 = vld [vmem:[%s907_s1] sm:$0xff] (!%p156_p3)   ;;  %s652_s15 = sshll.u32 (!%p156_p3), %s792_s9, 4  ;;  %v763_v1 = vld [vmem:[%s907_s1 + $0x8] sm:$0xff] (!%p156_p3)   ;;  %v764_v2 = vld [vmem:[%s907_s1 + $0x10] sm:$0xff] (!%p156_p3)  }
   0x7   : > { %159 = sbr.rel (%p156_p3) target bundleno = 263 (0x107), region = 28  ;;  %p192_p4 = scmp.lt.s32.totalorder (!%p156_p3), %s652_s15, 31  ;;  %690 = vmatprep.subr.bf16.mxu0 (!%p156_p3), %v762_v0  ;;  %722 = vmatprep.subr.bf16.mxu1 (!%p156_p3), %v762_v0  ;;  %v765_v3 = vld [vmem:[%s907_s1 + $0x18] sm:$0xff] (!%p156_p3)   ;;  %v766_v6 = vld [vmem:[%s907_s1 + $0x20] sm:$0xff] (!%p156_p3)   ;;  %v767_v7 = vld [vmem:[%s907_s1 + $0x28] sm:$0xff] (!%p156_p3)  }
   0x8   : > { %691 = vmatpush3.bf16.msra.mxu0 (!%p156_p3), %v762_v0  ;;  %730 = vmatpush3.bf16.msra.mxu1 (!%p156_p3), %v762_v0  ;;  %v768_v8 = vld [vmem:[%s907_s1 + $0x30] sm:$0xff] (!%p156_p3)   ;;  %v769_v9 = vld [vmem:[%s907_s1 + $0x38] sm:$0xff] (!%p156_p3)  }
   0x9   : > { %692 = vmatprep.subr.bf16.mxu0 (!%p156_p3), %v763_v1  ;;  %723 = vmatprep.subr.bf16.mxu1 (!%p156_p3), %v763_v1 }
   0xc   : > { %693 = vmatpush3.bf16.msra.mxu0 (!%p156_p3), %v763_v1  ;;  %731 = vmatpush3.bf16.msra.mxu1 (!%p156_p3), %v763_v1 }
   0xd   : > { %694 = vmatprep.subr.bf16.mxu0 (!%p156_p3), %v764_v2  ;;  %724 = vmatprep.subr.bf16.mxu1 (!%p156_p3), %v764_v2 }
   0xe   : > { %s914_s15 = smov (!%p192_p4, %s652_s15), 31 }
   0xf   : > { %s653_s20 = sshll.u32 %s914_s15, 2  ;;  %s655_s6 = sshll.u32 %s914_s15, 3 }
  0x10   : > { %s850_s23 = scalar_lea.vmem %s906_s0, %s653_s20  ;;  %695 = vmatpush3.bf16.msra.mxu0 %v764_v2  ;;  %732 = vmatpush3.bf16.msra.mxu1 %v764_v2  ;;  %s879_s9 = scalar_lea.vmem %s908_s2, %s655_s6 }
  0x11   : > { %v770_v4 = vld [vmem:[%s850_s23] sm:$0xff]   ;;  %696 = vmatprep.subr.bf16.mxu0 %v765_v3  ;;  %725 = vmatprep.subr.bf16.mxu1 %v765_v3  ;;  %v772_v10 = vld [vmem:[%s850_s23 + $0x8] sm:$0xff]   ;;  %v774_v12 = vld [vmem:[%s850_s23 + $0x10] sm:$0xff]  }
  0x12   : > { %v771_v5 = vld [vmem:[%s850_s23 + $0x20] sm:$0xff]   ;;  %706 = vmatprep.mubr.bf16.mxu0 %v770_v4  ;;  %v773_v11 = vld [vmem:[%s850_s23 + $0x28] sm:$0xff]   ;;  %v775_v13 = vld [vmem:[%s850_s23 + $0x30] sm:$0xff]  }
  0x13   : > { %714 = vmatprep.mubr.bf16.mxu1 %v771_v5  ;;  %v776_v14 = vld [vmem:[%s850_s23 + $0x18] sm:$0xff]  }
  0x14   : > { %697 = vmatpush3.bf16.msra.mxu0 %v765_v3  ;;  %733 = vmatpush3.bf16.msra.mxu1 %v765_v3  ;;  %v777_v15 = vld [vmem:[%s850_s23 + $0x38] sm:$0xff]  }
  0x15   : > { %698 = vmatprep.subr.bf16.mxu0 %v766_v6  ;;  %726 = vmatprep.subr.bf16.mxu1 %v766_v6 }
  0x18   : > { %699 = vmatpush3.bf16.msra.mxu0 %v766_v6  ;;  %734 = vmatpush3.bf16.msra.mxu1 %v766_v6 }
  0x19   : > { %700 = vmatprep.subr.bf16.mxu0 %v767_v7  ;;  %727 = vmatprep.subr.bf16.mxu1 %v767_v7 }
  0x1c   : > { %701 = vmatpush3.bf16.msra.mxu0 %v767_v7  ;;  %735 = vmatpush3.bf16.msra.mxu1 %v767_v7 }
  0x1d   : > { %702 = vmatprep.subr.bf16.mxu0 %v768_v8  ;;  %728 = vmatprep.subr.bf16.mxu1 %v768_v8 }
  0x20   : > { %703 = vmatpush3.bf16.msra.mxu0 %v768_v8  ;;  %736 = vmatpush3.bf16.msra.mxu1 %v768_v8 }
  0x21   : > { %704 = vmatprep.subr.bf16.mxu0 %v769_v9  ;;  %729 = vmatprep.subr.bf16.mxu1 %v769_v9 }
  0x24   : > { %705 = vmatpush3.bf16.msra.mxu0 %v769_v9  ;;  %737 = vmatpush3.bf16.msra.mxu1 %v769_v9 }
  0x27   : > { %707 = vmatmul.mubr.bf16.vlgmr.msra.gmra.mrb[0].mxu0 %v772_v10  ;;  %715 = vmatmul.mubr.bf16.vlgmr.msra.gmra.mrb[0].mxu1 %v773_v11 }
  0x28   : > { %710 = vmatprep.mubr.bf16.mxu0 %v774_v12  ;;  %718 = vmatprep.mubr.bf16.mxu1 %v775_v13 }
  0x2f   : > { %711 = vmatmul.mubr.bf16.gmra.mrb[4].mxu0 %v776_v14  ;;  %719 = vmatmul.mubr.bf16.gmra.mrb[4].mxu1 %v777_v15 }
  0xfa   : > { %v708_v16 = vpop.f32.mrb[0].mxu0  ;;  %v716_v17 = vpop.f32.mrb[0].mxu1 }
  0xfb   : > { %533 = vst [vmem:[%s879_s9 + $0x10] sm:$0xff] %v708_v16  ;;  %541 = vst [vmem:[%s879_s9 + $0x50] sm:$0xff] %v716_v17  ;;  %v417_v18 = vpop.f32.mrb[1].mxu0  ;;  %v449_v19 = vpop.f32.mrb[1].mxu1 }
  0xfc   : > { %531 = vst [vmem:[%s879_s9] sm:$0xff] %v417_v18  ;;  %539 = vst [vmem:[%s879_s9 + $0x40] sm:$0xff] %v449_v19  ;;  %v709_v20 = vpop.f32.mrb[2].mxu0  ;;  %v717_v21 = vpop.f32.mrb[2].mxu1 }
  0xfd   : > { %534 = vst [vmem:[%s879_s9 + $0x18] sm:$0xff] %v709_v20  ;;  %542 = vst [vmem:[%s879_s9 + $0x58] sm:$0xff] %v717_v21  ;;  %v420_v22 = vpop.f32.mrb[3].mxu0  ;;  %v452_v23 = vpop.f32.mrb[3].mxu1 }
  0xfe   : > { %532 = vst [vmem:[%s879_s9 + $0x8] sm:$0xff] %v420_v22  ;;  %540 = vst [vmem:[%s879_s9 + $0x48] sm:$0xff] %v452_v23 }
 0x102   : > { %v712_v24 = vpop.f32.mrb[4].mxu0  ;;  %v720_v25 = vpop.f32.mrb[4].mxu1 }
 0x103   : > { %537 = vst [vmem:[%s879_s9 + $0x30] sm:$0xff] %v712_v24  ;;  %545 = vst [vmem:[%s879_s9 + $0x70] sm:$0xff] %v720_v25  ;;  %v433_v26 = vpop.f32.mrb[5].mxu0  ;;  %v465_v27 = vpop.f32.mrb[5].mxu1 }
 0x104   : > { %535 = vst [vmem:[%s879_s9 + $0x20] sm:$0xff] %v433_v26  ;;  %543 = vst [vmem:[%s879_s9 + $0x60] sm:$0xff] %v465_v27  ;;  %v713_v28 = vpop.f32.mrb[6].mxu0  ;;  %v721_v29 = vpop.f32.mrb[6].mxu1 }
 0x105   : > { %538 = vst [vmem:[%s879_s9 + $0x38] sm:$0xff] %v713_v28  ;;  %546 = vst [vmem:[%s879_s9 + $0x78] sm:$0xff] %v721_v29  ;;  %v436_v30 = vpop.f32.mrb[7].mxu0  ;;  %v468_v31 = vpop.f32.mrb[7].mxu1 }
 0x106   : > { %536 = vst [vmem:[%s879_s9 + $0x28] sm:$0xff] %v436_v30  ;;  %544 = vst [vmem:[%s879_s9 + $0x68] sm:$0xff] %v468_v31 }
 0x107 PF: > { %s12_s11 = sadd.s32 1, %s800_s11   ;;  %s909_s9 = smov %s796_s10 }
 0x108   : > { %p9_p5 = scmp.ge.s32.totalorder %s12_s11, 4   ;;  %s910_s10 = smov %s912_s12 }
 0x10a   :  { %11 = sbr.rel (!%p9_p5) target bundleno = 2 (0x2), region = 69 }

// kernel: gpt_forward.3
= control target key start
LH: loop header
LB: loop body
LE: loop exit
PB: predicated region body
PF: predicated region fallthrough
CT: control target
= control target key end

     0   :  { %s8750_s0 = inlined_call_operand.vmem [shape: bf16[2,128,128], index: 0, kind: input, shape index: {}]   ;;  %s8751_s1 = inlined_call_operand.vmem [shape: f32[2,1,128], index: 1, kind: input, shape index: {}]   ;;  %s8752_s2 = inlined_call_operand.vmem [shape: bf16[128,384], index: 2, kind: input, shape index: {}]   ;;  %s8753_s3 = inlined_call_operand.vmem [shape: bf16[128,128], index: 3, kind: input, shape index: {}]   ;;  %s8754_s4 = inlined_call_operand.vmem [shape: f32[1,128], index: 4, kind: input, shape index: {}]   ;;  %s8755_s5 = inlined_call_operand.vmem [shape: f32[1,128], index: 5, kind: input, shape index: {}]   ;;  %s8756_s6 = inlined_call_operand.vmem [shape: bf16[128,256], index: 6, kind: input, shape index: {}]   ;;  %s8757_s7 = inlined_call_operand.vmem [shape: bf16[256,128], index: 7, kind: input, shape index: {}]   ;;  %s8758_s8 = inlined_call_operand.vmem [shape: f32[1,128], index: 8, kind: input, shape index: {}]   ;;  %s8759_s9 = inlined_call_operand.vmem [shape: f32[1,128], index: 9, kind: input, shape index: {}]   ;;  %s8760_s10 = inlined_call_operand.vmem [shape: bf16[2,128,128], index: 10, kind: output, shape index: {0}]   ;;  %s8761_s11 = inlined_call_operand.hbm [shape: bf16[2,4,128,128], index: 11, kind: output, shape index: {1}]  }
   0x1   :  { %8833 = sst [smem:[#allocation54_spill]] %s8750_s0 }
   0x2   :  { %8834 = sst [smem:[#allocation55_spill]] %s8751_s1 }
   0x3   :  { %17 = vsyncpa [#allocation3], 0 }
   0x4   :  { %19 = vsyncpa [#allocation3 + $0x1], 0  ;;  %s6504_s17 = smov 0   ;;  %s6506_s18 = smov 0  }
   0x5   :  { %s6508_s19 = smov 0   ;;  %s6510_s20 = smov 0  }
   0x6 LB: > { %s6525_s21 = sadd.s32 4294967295, %s6436_s20   ;;  %s4623_s22 = sadd.s32 4294967294, %s6436_s20   ;;  %s6436_s20 = sphi %s6510_s20, %s9099_s20   ;;  %s6432_s19 = sphi %s6508_s19, %s9098_s19   ;;  %s6428_s18 = sphi %s6506_s18, %s9097_s18   ;;  %s6424_s17 = sphi %s6504_s17, %s9096_s17  }
   0x7   : > { %s6529_s23 = sadd.s32 1, %s6436_s20   ;;  %s278_s24 = sadd.s32 1, %s6432_s19 }
   0x8   : > { %s275_s25 = ssub.s32 %s6436_s20, %s6529_s23  ;;  %p288_p0 = scmp.ne.s32.totalorder %s6432_s19, %s6428_s18 }
   0x9   : > { %p276_p1 = scmp.eq.s32.totalorder %s275_s25, 0  ;;  %p289_p2 = scmp.eq.s32.totalorder %s6525_s21, 1 }
   0xa   : > { %p294_p3 = scmp.ne.s32.totalorder %s6428_s18, %s6424_s17  ;;  %p295_p4 = scmp.eq.s32.totalorder %s4623_s22, 1 }
   0xb   : > { %s6540_s26 = scalar_select %p276_p1, %s6432_s19, %s278_s24  }
   0xc   : > { %p6542_p5 = por %p289_p2, %p288_p0  ;;  %p6546_p6 = por %p295_p4, %p294_p3 }
   0xd   : > { %8835 = sst [smem:[#allocation5_spill]] %s6540_s26  ;;  %p4626_p7 = scmp.ge.s32.totalorder %s6436_s20, 1 }
   0xe   : > { %p351_p8 = scmp.lt.s32.totalorder %s6436_s20, 3 }
  0x10   : > { %p352_p9 = pnand %p4626_p7, %p351_p8 }
  0x12   : > { %355 = sbr.rel (%p352_p9) target bundleno = 4455 (0x1167), region = 60 }
  0x19   : > { %v5950_v0 = vld [vmem:[%s8752_s2 + $0x4] ss:$12 sps:$4 sm:$0xff]   ;;  %p399_p10 = scmp.lt.s32.totalorder %s6525_s21, 1  ;;  %v5952_v1 = vld [vmem:[%s8752_s2] ss:$12 sps:$4 sm:$0xff]   ;;  %v8768_v2 = vmov 0  }
  0x1a   : > { %671 = vmatprep.mubr.bf16.mxu0 %v8768_v2  ;;  %639 = vmatprep.subr.bf16.mxu0 %v5950_v0  ;;  %v5953_v3 = vld [vmem:[%s8752_s2 + $0x1c] ss:$12 sps:$4 sm:$0xff]   ;;  %v5955_v4 = vld [vmem:[%s8752_s2 + $0x18] ss:$12 sps:$4 sm:$0xff]   ;;  %v5956_v5 = vld [vmem:[%s8752_s2 + $0x34] ss:$12 sps:$4 sm:$0xff]  }
  0x1b   : > { %s6564_s16 = scalar_select %p399_p10, %s6525_s21, 1  ;;  %640 = vmatpush1.bf16.msra.mxu0 %v5952_v1  ;;  %v5958_v6 = vld [vmem:[%s8752_s2 + $0x30] ss:$12 sps:$4 sm:$0xff]   ;;  %v5959_v7 = vld [vmem:[%s8752_s2 + $0x4c] ss:$12 sps:$4 sm:$0xff]   ;;  %vm8763_vm0 = vcmask 261120  }
  0x1c   : > { %641 = vmatprep.subr.bf16.mxu0 %v5953_v3  ;;  %s8838_s0 = sld [smem:[#allocation54_spill]]  ;;  %v5961_v9 = vld [vmem:[%s8752_s2 + $0x48] ss:$12 sps:$4 sm:$0xff]   ;;  %v5962_v10 = vld [vmem:[%s8752_s2 + $0x64] ss:$12 sps:$4 sm:$0xff]   ;;  %s8847_s1 = sld [smem:[#allocation55_spill]] }
  0x1d   : > { %s8762_s30 = sshll.u32 %s6564_s16, 6  ;;  %v5981_v11 = vld [vmem:[%s8752_s2 + $0x8] ss:$12 sps:$4 sm:$0xff]   ;;  %v5964_v12 = vld [vmem:[%s8752_s2 + $0x60] ss:$12 sps:$4 sm:$0xff]   ;;  %s8829_s22 = smov 64  }
  0x1e   : > { %5418 = vmatprep.subr.bf16.mxu1 %v5981_v11  ;;  %v5983_v13 = vld [vmem:[%s8752_s2 + $0x20] ss:$12 sps:$4 sm:$0xff]   ;;  %v5965_v14 = vld [vmem:[%s8752_s2 + $0x7c] ss:$12 sps:$4 sm:$0xff]   ;;  %v5984_v15 = vld [vmem:[%s8752_s2 + $0x38] ss:$12 sps:$4 sm:$0xff]  }
  0x1f   : > { %642 = vmatpush1.bf16.msra.mxu0 %v5955_v4  ;;  %5419 = vmatpush3.bf16.msra.mxu1 %v5981_v11  ;;  %v5967_v16 = vld [vmem:[%s8752_s2 + $0x78] ss:$12 sps:$4 sm:$0xff]   ;;  %v5968_v17 = vld [vmem:[%s8752_s2 + $0x94] ss:$12 sps:$4 sm:$0xff]   ;;  %v5970_v18 = vld [vmem:[%s8752_s2 + $0x90] ss:$12 sps:$4 sm:$0xff]  }
  0x20   : > { %643 = vmatprep.subr.bf16.mxu0 %v5956_v5  ;;  %5420 = vmatprep.subr.bf16.mxu1 %v5983_v13  ;;  %v5985_v19 = vld [vmem:[%s8752_s2 + $0x50] ss:$12 sps:$4 sm:$0xff]   ;;  %v5971_v20 = vld [vmem:[%s8752_s2 + $0xac] ss:$12 sps:$4 sm:$0xff]   ;;  %v5986_v21 = vld [vmem:[%s8752_s2 + $0x68] ss:$12 sps:$4 sm:$0xff]  }
  0x21   : > { %v5973_v22 = vld [vmem:[%s8752_s2 + $0xa8] ss:$12 sps:$4 sm:$0xff]   ;;  %v5987_v23 = vld [vmem:[%s8752_s2 + $0x80] ss:$12 sps:$4 sm:$0xff]   ;;  %v5988_v24 = vld [vmem:[%s8752_s2 + $0x98] ss:$12 sps:$4 sm:$0xff]  }
  0x22   : > { %s6581_s26 = scalar_lea.vmem %s8838_s0, %s8762_s30  ;;  %v5989_v26 = vld [vmem:[%s8752_s2 + $0xb0] ss:$12 sps:$4 sm:$0xff]   ;;  %s6439_s0 = smov 96  }
  0x23   : > { %v414_v8 = vld [vmem:[%s6581_s26] sm:$0xff]   ;;  %644 = vmatpush1.bf16.msra.mxu0 %v5958_v6  ;;  %5421 = vmatpush3.bf16.msra.mxu1 %v5983_v13  ;;  %v416_v25 = vld [vmem:[%s6581_s26 + $0x8] sm:$0xff]   ;;  %v418_v27 = vld [vmem:[%s6581_s26 + $0x10] sm:$0xff]   ;;  %s406_s15 = scalar_lea.vmem %s8847_s1, %s6564_s16  ;;  %s8828_s24 = sand.u32 1, %s6428_s18  }
  0x24   : > { %645 = vmatprep.subr.bf16.mxu0 %v5959_v7  ;;  %5434 = vmatprep.mubr.bf16.mxu1 %v414_v8  ;;  %v420_v28 = vld [vmem:[%s6581_s26 + $0x18] sm:$0xff]   ;;  %v422_v29 = vld [vmem:[%s6581_s26 + $0x20] sm:$0xff]   ;;  %v424_v30 = vld [vmem:[%s6581_s26 + $0x28] sm:$0xff]   ;;  %s4627_s25 = sshll.u32 %s8828_s24, 8  ;;  %s8831_s12 = smov 32  }
  0x25   : > { %5422 = vmatprep.subr.bf16.mxu1 %v5984_v15  ;;  %v426_v31 = vld [vmem:[%s6581_s26 + $0x30] sm:$0xff]   ;;  %v428_v32 = vld [vmem:[%s6581_s26 + $0x38] sm:$0xff]   ;;  %s7143_s29 = scalar_lea.vmem [#allocation2], %s4627_s25  ;;  %s9042_s13 = smov 32  }
  0x26   : > { %s9049_s30 = smov 64   ;;  %s9093_s24 = sand.u32 1, %s6428_s18  }
  0x27   : > { %646 = vmatpush1.bf16.msra.mxu0 %v5961_v9  ;;  %5423 = vmatpush3.bf16.msra.mxu1 %v5984_v15  ;;  %s8634_s25 = scalar_lea.sflag [#allocation3], %s9093_s24 }
  0x28   : > { %647 = vmatprep.subr.bf16.mxu0 %v5962_v10  ;;  %5424 = vmatprep.subr.bf16.mxu1 %v5985_v19 }
  0x2b   : > { %648 = vmatpush1.bf16.msra.mxu0 %v5964_v12  ;;  %5425 = vmatpush3.bf16.msra.mxu1 %v5985_v19 }
  0x2c   : > { %649 = vmatprep.subr.bf16.mxu0 %v5965_v14  ;;  %5426 = vmatprep.subr.bf16.mxu1 %v5986_v21 }
  0x2f   : > { %650 = vmatpush1.bf16.msra.mxu0 %v5967_v16  ;;  %5427 = vmatpush3.bf16.msra.mxu1 %v5986_v21 }
  0x30   : > { %651 = vmatprep.subr.bf16.mxu0 %v5968_v17  ;;  %5428 = vmatprep.subr.bf16.mxu1 %v5987_v23 }
  0x33   : > { %652 = vmatpush1.bf16.msra.mxu0 %v5970_v18  ;;  %5429 = vmatpush3.bf16.msra.mxu1 %v5987_v23 }
  0x34   : > { %653 = vmatprep.subr.bf16.mxu0 %v5971_v20  ;;  %5430 = vmatprep.subr.bf16.mxu1 %v5988_v24 }
  0x37   : > { %654 = vmatpush1.bf16.msra.mxu0 %v5973_v22  ;;  %5431 = vmatpush3.bf16.msra.mxu1 %v5988_v24 }
  0x38   : > { %5432 = vmatprep.subr.bf16.mxu1 %v5989_v26 }
  0x3a   : > { %672 = vmatmul.mubr.bf16.vlgmr.msra.gmra.mrb[0].mxu0 %v414_v8 }
  0x3b   : > { %681 = vmatprep.mubr.bf16.mxu0 %v8768_v2  ;;  %5433 = vmatpush3.bf16.msra.mxu1 %v5989_v26 }
  0x3e   : > { %5435 = vmatmul.mubr.bf16.vlgmr.msra.gmra.mrb[0].mxu1 %v416_v25 }
  0x3f   : > { %5438 = vmatprep.mubr.bf16.mxu1 %v418_v27 }
  0x42   : > { %682 = vmatmul.mubr.bf16.gmra.mrb[4].mxu0 %v416_v25 }
  0x43   : > { %691 = vmatprep.mubr.bf16.mxu0 %v8768_v2 }
  0x46   : > { %5439 = vmatmul.mubr.bf16.gmra.mrb[4].mxu1 %v420_v28 }
  0x47   : > { %5442 = vmatprep.mubr.bf16.mxu1 %v422_v29 }
  0x4a   : > { %692 = vmatmul.mubr.bf16.gmra.mrb[8].mxu0 %v418_v27 }
  0x4b   : > { %701 = vmatprep.mubr.bf16.mxu0 %v8768_v2 }
  0x4e   : > { %5443 = vmatmul.mubr.bf16.gmra.mrb[8].mxu1 %v424_v30 }
  0x4f   : > { %5446 = vmatprep.mubr.bf16.mxu1 %v426_v31 }
  0x52   : > { %702 = vmatmul.mubr.bf16.gmra.mrb[12].mxu0 %v420_v28 }
  0x53   : > { %711 = vmatprep.mubr.bf16.mxu0 %v8768_v2 }
  0x56   : > { %5447 = vmatmul.mubr.bf16.gmra.mrb[12].mxu1 %v428_v32 }
  0x5a   : > { %712 = vmatmul.mubr.bf16.gmra.mrb[16].mxu0 %v422_v29 }
  0x5b   : > { %721 = vmatprep.mubr.bf16.mxu0 %v8768_v2 }
  0x62   : > { %722 = vmatmul.mubr.bf16.gmra.mrb[20].mxu0 %v424_v30 }
  0x63   : > { %731 = vmatprep.mubr.bf16.mxu0 %v8768_v2 }
  0x6a   : > { %732 = vmatmul.mubr.bf16.gmra.mrb[24].mxu0 %v426_v31 }
  0x6b   : > { %741 = vmatprep.mubr.bf16.mxu0 %v8768_v2 }
  0x72   : > { %742 = vmatmul.mubr.bf16.gmra.mrb[28].mxu0 %v428_v32 }
 0x10d   : > { %v673_v33 = vpop.f32.mrb[0].mxu0 }
 0x10e   : > { %v675_v34 = vpop.f32.mrb[1].mxu0 }
 0x10f   : > { %v677_v35 = vpop.f32.mrb[2].mxu0 }
 0x110   : > { %v849_v36 = vpack.c.bf16 %v677_v35, %v673_v33  ;;  %v679_v37 = vpop.f32.mrb[3].mxu0 }
 0x111   : > { %v6652_v38 = vpack.c.bf16 %v679_v37, %v675_v34  ;;  %v5436_v47 = vpop.f32.mrb[0].mxu1 }
 0x112   : > { %v6654_v39 = vmul.bf16 1043676725, %v849_v36  ;;  %v786_v49 = vpop.f32.mrb[1].mxu1 }
 0x113   : > { %1454 = vrot.lane.b32.xlu0 %v6652_v38, %s6439_s0  ;;  %5754 = vmatprep.subr.msk.bf16.mxu0 %vm8763_vm0, %v6652_v38  ;;  %v965_v40 = vsel %vm8763_vm0, %v6652_v38, 0  ;;  %v5437_v50 = vpop.f32.mrb[2].mxu1 }
 0x114   : > { %5451 = vmatpush3.bf16.xpose.msra.mxu0 %v965_v40  ;;  %5466 = vmatprep.mubr.msk.bf16.mxu0 %vm8763_vm0, %v6654_v39  ;;  %v6680_v52 = vpack.c.bf16 %v5437_v50, %v5436_v47  ;;  %v789_v53 = vpop.f32.mrb[3].mxu1 }
 0x115   : > { %v6664_v41 = vpop.f32.mrb[4].mxu0  ;;  %v6682_v55 = vpack.c.bf16 %v789_v53, %v786_v49 }
 0x116   : > { %v685_v42 = vpop.f32.mrb[5].mxu0 }
 0x117   : > { %v6666_v43 = vpop.f32.mrb[6].mxu0  ;;  %5482 = vmatprep.subr.bf16.mxu1 %v6682_v55 }
 0x118   : > { %v852_v44 = vpack.c.bf16 %v6666_v43, %v6664_v41  ;;  %v689_v45 = vpop.f32.mrb[7].mxu0  ;;  %5483 = vmatpush3.bf16.msra.mxu1 %v6682_v55 }
 0x119   : > { %v6670_v46 = vpack.c.bf16 %v689_v45, %v685_v42  ;;  %v5440_v60 = vpop.f32.mrb[4].mxu1  ;;  %5484 = vmatprep.subr.bf16.mxu1 %v6680_v52 }
 0x11a   : > { %v802_v62 = vpop.f32.mrb[5].mxu1 }
 0x11b   : > { %1456 = vrot.lane.b32.xlu1 %v6670_v46, %s6439_s0  ;;  %5755 = vmatprep.subr.msk.bf16.mxu0 %vm8763_vm0, %v6670_v46  ;;  %v968_v48 = vsel %vm8763_vm0, %v6670_v46, 0  ;;  %v5441_v63 = vpop.f32.mrb[6].mxu1 }
 0x11c   : > { %5453 = vmatpush3.bf16.xpose.msra.mxu0 %v968_v48  ;;  %v6699_v1 = vpack.c.bf16 %v5441_v63, %v5440_v60  ;;  %v805_v3 = vpop.f32.mrb[7].mxu1  ;;  %5485 = vmatpush3.bf16.msra.mxu1 %v6680_v52  ;;  %v6761_v63 = vmul.bf16 1043676725, %v852_v44 }
 0x11d   : > { %v6678_v51 = vpop.f32.mrb[8].mxu0  ;;  %v6702_v5 = vpack.c.bf16 %v805_v3, %v802_v62 }
 0x11e   : > { %v695_v54 = vpop.f32.mrb[9].mxu0 }
 0x11f   : > { %v6684_v56 = vpop.f32.mrb[10].mxu0  ;;  %5486 = vmatprep.subr.bf16.mxu1 %v6702_v5 }
 0x120   : > { %v855_v57 = vpack.c.bf16 %v6684_v56, %v6678_v51  ;;  %v699_v58 = vpop.f32.mrb[11].mxu0  ;;  %5487 = vmatpush3.bf16.msra.mxu1 %v6702_v5 }
 0x121   : > { %v6689_v59 = vpack.c.bf16 %v699_v58, %v695_v54  ;;  %v5444_v10 = vpop.f32.mrb[8].mxu1  ;;  %5488 = vmatprep.subr.bf16.mxu1 %v6699_v1 }
 0x122   : > { %v818_v12 = vpop.f32.mrb[9].mxu1  ;;  %v6766_v3 = vmul.bf16 1043676725, %v855_v57  ;;  %v873_v57 = vlaneseq }
 0x123   : > { %8839 = vst [vmem:[#allocation6_spill] sm:$0xff] %v6689_v59  ;;  %5756 = vmatprep.subr.msk.bf16.mxu0 %vm8763_vm0, %v6689_v59  ;;  %v971_v61 = vsel %vm8763_vm0, %v6689_v59, 0  ;;  %v5445_v13 = vpop.f32.mrb[10].mxu1 }
 0x124   : > { %5455 = vmatpush3.bf16.xpose.msra.mxu0 %v971_v61  ;;  %v6717_v15 = vpack.c.bf16 %v5445_v13, %v5444_v10  ;;  %v821_v16 = vpop.f32.mrb[11].mxu1  ;;  %5489 = vmatpush3.bf16.msra.mxu1 %v6699_v1 }
 0x125   : > { %v6697_v0 = vpop.f32.mrb[12].mxu0  ;;  %v6720_v18 = vpack.c.bf16 %v821_v16, %v818_v12  ;;  %v8851_v16 = vmov 0 }
 0x126   : > { %v705_v4 = vpop.f32.mrb[13].mxu0  ;;  %8841 = vst [vmem:[#allocation8_spill] sm:$0xff] %v6717_v15 }
 0x127   : > { %v6704_v6 = vpop.f32.mrb[14].mxu0  ;;  %8842 = vst [vmem:[#allocation9_spill] sm:$0xff] %v6720_v18  ;;  %5490 = vmatprep.subr.bf16.mxu1 %v6720_v18 }
 0x128   : > { %v858_v7 = vpack.c.bf16 %v6704_v6, %v6697_v0  ;;  %v709_v8 = vpop.f32.mrb[15].mxu0  ;;  %5491 = vmatpush3.bf16.msra.mxu1 %v6720_v18  ;;  %v430_v0 = vld [vmem:[%s406_s15] sm:$0x1]  ;;  %v6803_v6 = vshrl.u32 %v873_v57, 7 }
 0x129   : > { %v6709_v9 = vpack.c.bf16 %v709_v8, %v705_v4  ;;  %v5448_v23 = vpop.f32.mrb[12].mxu1  ;;  %5492 = vmatprep.subr.bf16.mxu1 %v6717_v15  ;;  %vm908_vm1 = vcmp.gt.f32.partialorder %v430_v0, 0.0 }
 0x12a   : > { %v834_v25 = vpop.f32.mrb[13].mxu1  ;;  %v6775_v4 = vmul.bf16 1043676725, %v858_v7  ;;  %v912_v7 = vsub.s32 0, %v6803_v6  ;;  %v909_v8 = vsel %vm908_vm1, 1, %v8768_v2  ;;  %v889_v12 = vadd.s32 120, %v6803_v6 }
 0x12b   : > { %8840 = vst [vmem:[#allocation7_spill] sm:$0xff] %v6709_v9  ;;  %5757 = vmatprep.subr.msk.bf16.mxu0 %vm8763_vm0, %v6709_v9  ;;  %v974_v11 = vsel %vm8763_vm0, %v6709_v9, 0  ;;  %v5449_v26 = vpop.f32.mrb[14].mxu1  ;;  %v887_v13 = vadd.s32 104, %v6803_v6 }
 0x12c   : > { %5457 = vmatpush3.bf16.xpose.msra.mxu0 %v974_v11  ;;  %v6731_v28 = vpack.c.bf16 %v5449_v26, %v5448_v23  ;;  %v837_v29 = vpop.f32.mrb[15].mxu1  ;;  %5493 = vmatpush3.bf16.msra.mxu1 %v6717_v15  ;;  %v6807_v10 = vrot.slane %v909_v8, %v912_v7  ;;  %v6809_v11 = vand.u32 127, %v873_v57  ;;  %v8866_v7 = vmov 0 }
 0x12d   : > { %v713_v14 = vpop.f32.mrb[16].mxu0  ;;  %v6734_v31 = vpack.c.bf16 %v837_v29, %v834_v25  ;;  %v881_v29 = vadd.s32 56, %v6803_v6 }
 0x12e   : > { %v715_v17 = vpop.f32.mrb[17].mxu0  ;;  %8844 = vst [vmem:[#allocation11_spill] sm:$0xff] %v6731_v28  ;;  %vm914_vm2 = vcmp.eq.s32.totalorder %v6807_v10, 1  ;;  %vm907_vm3 = vcmp.gt.s32.totalorder %v6809_v11, %v889_v12  ;;  %vm905_vm5 = vcmp.gt.s32.totalorder %v6809_v11, %v887_v13  ;;  %vm892_vm8 = vcmp.gt.s32.totalorder %v6809_v11, %v6803_v6 }
 0x12f   : > { %v717_v19 = vpop.f32.mrb[18].mxu0  ;;  %8845 = vst [vmem:[#allocation12_spill] sm:$0xff] %v6734_v31  ;;  %5494 = vmatprep.subr.bf16.mxu1 %v6734_v31  ;;  %vm6817_vm4 = vmor %vm907_vm3, %vm914_vm2  ;;  %vm899_vm1 = vcmp.gt.s32.totalorder %v6809_v11, %v881_v29  ;;  %v882_v12 = vadd.s32 64, %v6803_v6  ;;  %v883_v13 = vadd.s32 72, %v6803_v6 }
 0x130   : > { %v861_v20 = vpack.c.bf16 %v717_v19, %v713_v14  ;;  %v719_v21 = vpop.f32.mrb[19].mxu0  ;;  %5495 = vmatpush3.bf16.msra.mxu1 %v6734_v31  ;;  %v8848_v14 = vmov 0  ;;  %vm6824_vm6 = vmor %vm905_vm5, %vm914_vm2  ;;  %v877_v19 = vadd.s32 24, %v6803_v6 }
 0x131   : > { %v6723_v22 = vpack.c.bf16 %v719_v21, %v715_v17  ;;  %5496 = vmatprep.subr.bf16.mxu1 %v6731_v28  ;;  %v8849_v14 = vsel %vm6817_vm4, 4294967295, %v8848_v14  ;;  %v8852_v16 = vsel %vm6824_vm6, 4294967295, %v8851_v16  ;;  %v876_v17 = vadd.s32 16, %v6803_v6  ;;  %vm6842_vm10 = vmor %vm892_vm8, %vm914_vm2 }
 0x132   : > { %v6777_v41 = vmul.bf16 1043676725, %v861_v20  ;;  %8850 = vst [vmem:[#allocation14_spill] sm:$0xff] %v8849_v14  ;;  %8853 = vst [vmem:[#allocation15_spill] sm:$0xff] %v8852_v16  ;;  %v875_v20 = vadd.s32 8, %v6803_v6  ;;  %vm895_vm11 = vcmp.gt.s32.totalorder %v6809_v11, %v877_v19  ;;  %v8871_v19 = vmov 0 }
 0x133   : > { %8843 = vst [vmem:[#allocation10_spill] sm:$0xff] %v6723_v22  ;;  %5758 = vmatprep.subr.msk.bf16.mxu0 %vm8763_vm0, %v6723_v22  ;;  %v977_v24 = vsel %vm8763_vm0, %v6723_v22, 0  ;;  %vm894_vm7 = vcmp.gt.s32.totalorder %v6809_v11, %v876_v17  ;;  %vm6861_vm13 = vmor %vm895_vm11, %vm914_vm2 }
 0x134   : > { %5459 = vmatpush3.bf16.xpose.msra.mxu0 %v977_v24  ;;  %5497 = vmatpush3.bf16.msra.mxu1 %v6731_v28  ;;  %vm6836_vm9 = vmor %vm894_vm7, %vm914_vm2  ;;  %v880_v24 = vadd.s32 48, %v6803_v6  ;;  %vm893_vm12 = vcmp.gt.s32.totalorder %v6809_v11, %v875_v20 }
 0x135   : > { %v723_v27 = vpop.f32.mrb[20].mxu0  ;;  %vm6868_vm14 = vmor %vm893_vm12, %vm914_vm2 }
 0x136   : > { %v725_v30 = vpop.f32.mrb[21].mxu0  ;;  %vm898_vm15 = vcmp.gt.s32.totalorder %v6809_v11, %v880_v24  ;;  %vm6895_vm5 = vmor %vm899_vm1, %vm914_vm2  ;;  %v888_v24 = vadd.s32 112, %v6803_v6 }
 0x137   : > { %v727_v32 = vpop.f32.mrb[22].mxu0  ;;  %vm6887_vm3 = vmor %vm898_vm15, %vm914_vm2 }
 0x138   : > { %v864_v33 = vpack.c.bf16 %v727_v32, %v723_v27  ;;  %v729_v34 = vpop.f32.mrb[23].mxu0 }
 0x139   : > { %v6737_v35 = vpack.c.bf16 %v729_v34, %v725_v30 }
 0x13a   : > { %v6783_v43 = vmul.bf16 1043676725, %v864_v33 }
 0x13b   : > { %8846 = vst [vmem:[#allocation13_spill] sm:$0xff] %v6737_v35  ;;  %5759 = vmatprep.subr.msk.bf16.mxu0 %vm8763_vm0, %v6737_v35  ;;  %v980_v36 = vsel %vm8763_vm0, %v6737_v35, 0 }
 0x13c   : > { %5461 = vmatpush3.bf16.xpose.msra.mxu0 %v980_v36 }
 0x13d   : > { %v733_v37 = vpop.f32.mrb[24].mxu0 }
 0x13e   : > { %v735_v40 = vpop.f32.mrb[25].mxu0 }
 0x13f   : > { %v737_v42 = vpop.f32.mrb[26].mxu0 }
 0x140   : > { %v867_v45 = vpack.c.bf16 %v737_v42, %v733_v37  ;;  %v739_v47 = vpop.f32.mrb[27].mxu0  ;;  %v878_v37 = vadd.s32 32, %v6803_v6  ;;  %v879_v42 = vadd.s32 40, %v6803_v6 }
 0x141   : > { %v6746_v48 = vpack.c.bf16 %v739_v47, %v735_v40 }
 0x142   : > { %v6785_v44 = vmul.bf16 1043676725, %v867_v45  ;;  %vm896_vm7 = vcmp.gt.s32.totalorder %v6809_v11, %v878_v37  ;;  %vm897_vm8 = vcmp.gt.s32.totalorder %v6809_v11, %v879_v42 }
 0x143   : > { %5760 = vmatprep.subr.msk.bf16.mxu0 %vm8763_vm0, %v6746_v48  ;;  %v983_v49 = vsel %vm8763_vm0, %v6746_v48, 0  ;;  %vm6913_vm11 = vmor %vm896_vm7, %vm914_vm2 }
 0x144   : > { %5463 = vmatpush3.bf16.xpose.msra.mxu0 %v983_v49  ;;  %v884_v49 = vadd.s32 80, %v6803_v6  ;;  %v8867_v7 = vsel %vm6913_vm11, 4294967295, %v8866_v7  ;;  %vm6921_vm15 = vmor %vm897_vm8, %vm914_vm2 }
 0x145   : > { %v743_v50 = vpop.f32.mrb[28].mxu0  ;;  %8868 = vst [vmem:[#allocation16_spill] sm:$0xff] %v8867_v7 }
 0x146   : > { %v745_v53 = vpop.f32.mrb[29].mxu0  ;;  %vm902_vm12 = vcmp.gt.s32.totalorder %v6809_v11, %v884_v49  ;;  %v8877_v49 = vmov 0 }
 0x147   : > { %v747_v54 = vpop.f32.mrb[30].mxu0  ;;  %vm6934_vm7 = vmor %vm902_vm12, %vm914_vm2  ;;  %vm900_vm12 = vcmp.gt.s32.totalorder %v6809_v11, %v882_v12 }
 0x148   : > { %v870_v58 = vpack.c.bf16 %v747_v54, %v743_v50  ;;  %v749_v60 = vpop.f32.mrb[31].mxu0  ;;  %v8872_v19 = vsel %vm6934_vm7, 4294967295, %v8871_v19 }
 0x149   : > { %v6752_v61 = vpack.c.bf16 %v749_v60, %v745_v53  ;;  %v885_v60 = vadd.s32 88, %v6803_v6  ;;  %8873 = vst [vmem:[#allocation17_spill] sm:$0xff] %v8872_v19 }
 0x14a   : > { %v6791_v51 = vmul.bf16 1043676725, %v870_v58 }
 0x14b   : > { %5761 = vmatprep.subr.msk.bf16.mxu0 %vm8763_vm0, %v6752_v61  ;;  %v986_v62 = vsel %vm8763_vm0, %v6752_v61, 0  ;;  %vm903_vm1 = vcmp.gt.s32.totalorder %v6809_v11, %v885_v60 }
 0x14c   : > { %5465 = vmatpush3.bf16.xpose.msra.mxu0 %v986_v62  ;;  %vm6947_vm8 = vmor %vm903_vm1, %vm914_vm2 }
 0x14d   : > { %vm6964_vm1 = vmor %vm900_vm12, %vm914_vm2 }
 0x14e   : > { %v8878_v49 = vsel %vm6964_vm1, 4294967295, %v8877_v49 }
 0x14f   : > { %8879 = vst [vmem:[#allocation19_spill] sm:$0xff] %v8878_v49 }
 0x153   : > { %5467 = vmatmul.mubr.msk.bf16.vlgmr.msra.gmra.mrb[32].mxu0 %vm8763_vm0, %v6761_v63 }
 0x154   : > { %5470 = vmatprep.mubr.msk.bf16.mxu0 %vm8763_vm0, %v6766_v3 }
 0x15b   : > { %5471 = vmatmul.mubr.msk.bf16.gmra.mrb[36].mxu0 %vm8763_vm0, %v6775_v4 }
 0x15c   : > { %5474 = vmatprep.mubr.msk.bf16.mxu0 %vm8763_vm0, %v6777_v41 }
 0x163   : > { %5475 = vmatmul.mubr.msk.bf16.gmra.mrb[40].mxu0 %vm8763_vm0, %v6783_v43 }
 0x164   : > { %5478 = vmatprep.mubr.msk.bf16.mxu0 %vm8763_vm0, %v6785_v44 }
 0x16b   : > { %5479 = vmatmul.mubr.msk.bf16.gmra.mrb[44].mxu0 %vm8763_vm0, %v6791_v51 }
 0x185   : > { %v6795_v56 = vpop.permute.xlu0 %1454 }
 0x186   : > { %5762 = vmatprep.subr.msk.bf16.mxu1 %vm8763_vm0, %v6795_v56  ;;  %vm901_vm0 = vcmp.gt.s32.totalorder %v6809_v11, %v883_v13 }
 0x226   : > { %v5468_v25 = vpop.f32.mrb[32].mxu0 }
 0x227   : > { %v1022_v26 = vpop.f32.mrb[33].mxu0  ;;  %v6851_v27 = vsel %vm6836_vm9, -1e+09, %v5468_v25 }
 0x228   : > { %1105 = vmax.xlane.f32.xlu1 %v6851_v27  ;;  %v5469_v30 = vpop.f32.mrb[34].mxu0  ;;  %v6857_v32 = vsel %vm6842_vm10, -1e+09, %v1022_v26  ;;  %v8874_v26 = vmov 0 }
 0x229   : > { %1101 = vmax.xlane.f32.xlu0 %v6857_v32  ;;  %v1025_v34 = vpop.f32.mrb[35].mxu0  ;;  %v6876_v40 = vsel %vm6861_vm13, -1e+09, %v5469_v30  ;;  %v8875_v26 = vsel %vm6947_vm8, 4294967295, %v8874_v26 }
 0x22a   : > { %v6883_v45 = vsel %vm6868_vm14, -1e+09, %v1025_v34  ;;  %8876 = vst [vmem:[#allocation18_spill] sm:$0xff] %v8875_v26 }
 0x22c   : > { %1107 = vmax.xlane.f32.xlu1 %v6876_v40 }
 0x22d   : > { %1103 = vmax.xlane.f32.xlu0 %v6883_v45 }
 0x22e   : > { %v5472_v50 = vpop.f32.mrb[36].mxu0 }
 0x22f   : > { %v1038_v54 = vpop.f32.mrb[37].mxu0  ;;  %v6902_v58 = vsel %vm6887_vm3, -1e+09, %v5472_v50  ;;  %v8880_v50 = vmov 0 }
 0x230   : > { %v5473_v62 = vpop.f32.mrb[38].mxu0  ;;  %v6930_v17 = vsel %vm6913_vm11, -1e+09, %v1038_v54  ;;  %vm906_vm11 = vcmp.gt.s32.totalorder %v6809_v11, %v888_v24  ;;  %v886_v54 = vadd.s32 96, %v6803_v6 }
 0x231   : > { %1113 = vmax.xlane.f32.xlu0 %v6902_v58  ;;  %v1041_v57 = vpop.f32.mrb[39].mxu0  ;;  %v6909_v0 = vsel %vm6895_vm5, -1e+09, %v5473_v62  ;;  %vm6983_vm12 = vmor %vm906_vm11, %vm914_vm2  ;;  %v8883_v62 = vmov 0 }
 0x232   : > { %1115 = vmax.xlane.f32.xlu1 %v6909_v0  ;;  %v6941_v20 = vsel %vm6921_vm15, -1e+09, %v1041_v57  ;;  %v8884_v62 = vsel %vm6983_vm12, 4294967295, %v8883_v62 }
 0x233   : > { %8885 = vst [vmem:[#allocation21_spill] sm:$0xff] %v8884_v62 }
 0x235   : > { %1109 = vmax.xlane.f32.xlu0 %v6930_v17 }
 0x236   : > { %1111 = vmax.xlane.f32.xlu1 %v6941_v20  ;;  %v5476_v25 = vpop.f32.mrb[40].mxu0 }
 0x237   : > { %v1054_v29 = vpop.f32.mrb[41].mxu0  ;;  %v6954_v30 = vsel %vm6934_vm7, -1e+09, %v5476_v25  ;;  %vm6972_vm7 = vmor %vm901_vm0, %vm914_vm2  ;;  %vm904_vm0 = vcmp.gt.s32.totalorder %v6809_v11, %v886_v54 }
 0x238   : > { %v5477_v34 = vpop.f32.mrb[42].mxu0  ;;  %v8881_v50 = vsel %vm6972_vm7, 4294967295, %v8880_v50  ;;  %v6979_v60 = vsel %vm6964_vm1, -1e+09, %v1054_v29  ;;  %vm7001_vm11 = vmor %vm904_vm0, %vm914_vm2  ;;  %v8886_v29 = vmov 0  ;;  %vm8889_vm2 = vcmask 261120  }
 0x239   : > { %1121 = vmax.xlane.f32.xlu0 %v6954_v30  ;;  %v1057_v37 = vpop.f32.mrb[43].mxu0  ;;  %v6960_v42 = vsel %vm6947_vm8, -1e+09, %v5477_v34  ;;  %8882 = vst [vmem:[#allocation20_spill] sm:$0xff] %v8881_v50  ;;  %v8887_v29 = vsel %vm7001_vm11, 4294967295, %v8886_v29  ;;  %vm8890_vm0 = vmmov %vm8889_vm2 }
 0x23a   : > { %1123 = vmax.xlane.f32.xlu1 %v6960_v42  ;;  %v6990_v57 = vsel %vm6972_vm7, -1e+09, %v1057_v37  ;;  %8888 = vst [vmem:[#allocation22_spill] sm:$0xff] %v8887_v29  ;;  %v7024_v37 = vpop.permute.xlu1 %1456  ;;  %vm8895_vm1 = vmmov %vm8890_vm0 }
 0x23d   : > { %1117 = vmax.xlane.f32.xlu0 %v6979_v60 }
 0x23e   : > { %1119 = vmax.xlane.f32.xlu1 %v6990_v57  ;;  %v5480_v12 = vpop.f32.mrb[44].mxu0 }
 0x23f   : > { %v1070_v6 = vpop.f32.mrb[45].mxu0  ;;  %v6996_v13 = vsel %vm6983_vm12, -1e+09, %v5480_v12  ;;  %vm8894_vm12 = vmmov %vm8890_vm0 }
 0x240   : > { %v5481_v24 = vpop.f32.mrb[46].mxu0  ;;  %v7007_v34 = vsel %vm7001_vm11, -1e+09, %v1070_v6  ;;  %vm8893_vm11 = vmmov %vm8890_vm0 }
 0x241   : > { %1129 = vmax.xlane.f32.xlu0 %v6996_v13  ;;  %v1073_v25 = vpop.f32.mrb[47].mxu0  ;;  %v7016_v11 = vsel %vm6817_vm4, -1e+09, %v5481_v24  ;;  %vm8892_vm4 = vmmov %vm8890_vm0 }
 0x242   : > { %v7021_v10 = vsel %vm6824_vm6, -1e+09, %v1073_v25  ;;  %vm8891_vm6 = vmmov %vm8890_vm0 }
 0x245   : > { %1125 = vmax.xlane.f32.xlu0 %v7007_v34 }
 0x24f   : > { %1460 = vrot.lane.b32.xlu1 %v6709_v9, %s6439_s0 }
 0x25b   : > { %1458 = vrot.lane.b32.xlu0 %v6689_v59, %s6439_s0 }
 0x273   : > { %1131 = vmax.xlane.f32.xlu1 %v7016_v11 }
 0x277   : > { %1127 = vmax.xlane.f32.xlu1 %v7021_v10 }
 0x2b5   : > { %v1106_v54 = vpop.xlane.xlu1 %1105 }
 0x2b6   : > { %v1135_v12 = vsub.f32 %v6851_v27, %v1106_v54  ;;  %v1102_v6 = vpop.xlane.xlu0 %1101 }
 0x2b7   : > { %v1133_v2 = vsub.f32 %v6857_v32, %v1102_v6 }
 0x2b8   : > { %v1153_v59 = vmul.f32 1.442695, %v1135_v12 }
 0x2b9   : > { %v1149_v14 = vmul.f32 1.442695, %v1133_v2  ;;  %v1108_v24 = vpop.xlane.xlu1 %1107 }
 0x2ba   : > { %6046 = vpow2.f32 %v1153_v59  ;;  %v1136_v9 = vsub.f32 %v6876_v40, %v1108_v24  ;;  %v1104_v29 = vpop.xlane.xlu0 %1103 }
 0x2bb   : > { %v1134_v25 = vsub.f32 %v6883_v45, %v1104_v29  ;;  %6048 = vpow2.f32 %v1149_v14 }
 0x2bc   : > { %v1155_v16 = vmul.f32 1.442695, %v1136_v9 }
 0x2bd   : > { %v1151_v62 = vmul.f32 1.442695, %v1134_v25 }
 0x2be   : > { %6050 = vpow2.f32 %v1155_v16  ;;  %v1114_v59 = vpop.xlane.xlu0 %1113 }
 0x2bf   : > { %6052 = vpow2.f32 %v1151_v62  ;;  %v1116_v16 = vpop.xlane.xlu1 %1115  ;;  %v1139_v62 = vsub.f32 %v6902_v58, %v1114_v59 }
 0x2c0   : > { %v1140_v25 = vsub.f32 %v6909_v0, %v1116_v16 }
 0x2c1   : > { %v1161_v12 = vmul.f32 1.442695, %v1139_v62 }
 0x2c2   : > { %v1110_v9 = vpop.xlane.xlu0 %1109  ;;  %v1163_v26 = vmul.f32 1.442695, %v1140_v25 }
 0x2c3   : > { %v1112_v45 = vpop.xlane.xlu1 %1111  ;;  %v1137_v29 = vsub.f32 %v6930_v17, %v1110_v9  ;;  %6054 = vpow2.f32 %v1161_v12 }
 0x2c4   : > { %v7030_v49 = vpop.eup %6046  ;;  %v1138_v6 = vsub.f32 %v6941_v20, %v1112_v45 }
 0x2c5   : > { %1185 = vadd.xlane.f32.xlu0 %v7030_v49  ;;  %v7033_v27 = vpop.eup %6048  ;;  %v1157_v50 = vmul.f32 1.442695, %v1137_v29 }
 0x2c6   : > { %v1122_v14 = vpop.xlane.xlu0 %1121 }
 0x2c7   : > { %v1124_v24 = vpop.xlane.xlu1 %1123  ;;  %6056 = vpow2.f32 %v1157_v50  ;;  %v1143_v7 = vsub.f32 %v6954_v30, %v1122_v14 }
 0x2c8   : > { %v7035_v32 = vpop.eup %6050  ;;  %v1144_v30 = vsub.f32 %v6960_v42, %v1124_v24 }
 0x2c9   : > { %1181 = vadd.xlane.f32.xlu0 %v7033_v27  ;;  %1187 = vadd.xlane.f32.xlu1 %v7035_v32  ;;  %v7039_v2 = vpop.eup %6052  ;;  %v1169_v20 = vmul.f32 1.442695, %v1143_v7 }
 0x2ca   : > { %v1118_v40 = vpop.xlane.xlu0 %1117 }
 0x2cb   : > { %v1120_v58 = vpop.xlane.xlu1 %1119  ;;  %v1141_v9 = vsub.f32 %v6979_v60, %v1118_v40 }
 0x2cc   : > { %v1142_v60 = vsub.f32 %v6990_v57, %v1120_v58 }
 0x2cd   : > { %1183 = vadd.xlane.f32.xlu1 %v7039_v2  ;;  %v7056_v45 = vpop.eup %6054  ;;  %v1165_v50 = vmul.f32 1.442695, %v1141_v9 }
 0x2ce   : > { %v1130_v54 = vpop.xlane.xlu0 %1129 }
 0x2cf   : > { %v7054_v16 = vpop.permute.xlu1 %1460 }
 0x2d2   : > { %v1126_v19 = vpop.xlane.xlu0 %1125 }
 0x2d3   : > { %v1145_v59 = vsub.f32 %v7007_v34, %v1126_v19 }
 0x2d5   : > { %v1173_v0 = vmul.f32 1.442695, %v1145_v59 }
 0x2d6   : > { %v1459_v25 = vpop.permute.xlu0 %1458 }
 0x2de   : > { %1464 = vrot.lane.b32.xlu1 %v6737_v35, %s6439_s0  ;;  %v1159_v35 = vmul.f32 1.442695, %v1138_v6 }
 0x2df   : > { %1462 = vrot.lane.b32.xlu0 %v6723_v22, %s6439_s0  ;;  %v1147_v22 = vsub.f32 %v6996_v13, %v1130_v54 }
 0x2e0   : > { %6058 = vpow2.f32 %v1159_v35 }
 0x2e1   : > { %v1177_v17 = vmul.f32 1.442695, %v1147_v22  ;;  %6060 = vpow2.f32 %v1163_v26  ;;  %v7060_v22 = vpop.eup %6056  ;;  %v1171_v26 = vmul.f32 1.442695, %v1144_v30 }
 0x2e3   : > { %6062 = vpow2.f32 %v1177_v17 }
 0x2e4   : > { %6064 = vpow2.f32 %v1169_v20 }
 0x2e5   : > { %6066 = vpow2.f32 %v1173_v0 }
 0x2e6   : > { %6068 = vpow2.f32 %v1165_v50 }
 0x2ea   : > { %v7062_v19 = vpop.eup %6058 }
 0x2eb   : > { %v7068_v34 = vpop.eup %6060 }
 0x2ed   : > { %v7070_v14 = vpop.eup %6062 }
 0x2ee   : > { %v7075_v62 = vpop.eup %6064 }
 0x2ef   : > { %v7077_v29 = vpop.eup %6066 }
 0x2f0   : > { %v7081_v54 = vpop.eup %6068 }
 0x2fe   : > { %1193 = vadd.xlane.f32.xlu0 %v7056_v45 }
 0x300   : > { %v1132_v35 = vpop.xlane.xlu1 %1131 }
 0x301   : > { %v1148_v7 = vsub.f32 %v7016_v11, %v1132_v35  ;;  %v1167_v11 = vmul.f32 1.442695, %v1142_v60 }
 0x302   : > { %1191 = vadd.xlane.f32.xlu0 %v7062_v19  ;;  %1189 = vadd.xlane.f32.xlu1 %v7060_v22 }
 0x303   : > { %v1179_v13 = vmul.f32 1.442695, %v1148_v7 }
 0x304   : > { %v1128_v42 = vpop.xlane.xlu1 %1127 }
 0x305   : > { %6070 = vpow2.f32 %v1179_v13  ;;  %v1146_v40 = vsub.f32 %v7021_v10, %v1128_v42 }
 0x306   : > { %1209 = vadd.xlane.f32.xlu0 %v7070_v14  ;;  %1195 = vadd.xlane.f32.xlu1 %v7068_v34  ;;  %6072 = vpow2.f32 %v1171_v26 }
 0x307   : > { %6074 = vpow2.f32 %v1167_v11  ;;  %v1175_v57 = vmul.f32 1.442695, %v1146_v40 }
 0x309   : > { %6076 = vpow2.f32 %v1175_v57 }
 0x30a   : > { %1205 = vadd.xlane.f32.xlu0 %v7077_v29  ;;  %1201 = vadd.xlane.f32.xlu1 %v7075_v62 }
 0x30e   : > { %1197 = vadd.xlane.f32.xlu1 %v7081_v54 }
 0x30f   : > { %v7084_v12 = vpop.eup %6070 }
 0x310   : > { %1211 = vadd.xlane.f32.xlu0 %v7084_v12  ;;  %v7087_v10 = vpop.eup %6072 }
 0x311   : > { %v7090_v6 = vpop.eup %6074 }
 0x312   : > { %1203 = vadd.xlane.f32.xlu1 %v7087_v10 }
 0x313   : > { %v7093_v24 = vpop.eup %6076 }
 0x316   : > { %1199 = vadd.xlane.f32.xlu1 %v7090_v6 }
 0x31a   : > { %1207 = vadd.xlane.f32.xlu1 %v7093_v24 }
 0x326   : > { %1466 = vrot.lane.b32.xlu0 %v6746_v48, %s6439_s0 }
 0x32a   : > { %1430 = vrot.lane.b32.xlu0 %v6654_v39, %s6439_s0 }
 0x32b   : > { %1468 = vrot.lane.b32.xlu1 %v6752_v61, %s6439_s0 }
 0x32e   : > { %1434 = vrot.lane.b32.xlu0 %v6766_v3, %s6439_s0 }
 0x32f   : > { %1432 = vrot.lane.b32.xlu1 %v6761_v63, %s6439_s0 }
 0x332   : > { %1438 = vrot.lane.b32.xlu0 %v6777_v41, %s6439_s0 }
 0x333   : > { %1436 = vrot.lane.b32.xlu1 %v6775_v4, %s6439_s0 }
 0x336   : > { %1442 = vrot.lane.b32.xlu0 %v6785_v44, %s6439_s0 }
 0x337   : > { %1440 = vrot.lane.b32.xlu1 %v6783_v43, %s6439_s0 }
 0x33a   : > { %1791 = vrot.lane.b32.xlu0 %v6682_v55, %s6439_s0 }
 0x33b   : > { %1444 = vrot.lane.b32.xlu1 %v6791_v51, %s6439_s0 }
 0x33e   : > { %1795 = vrot.lane.b32.xlu0 %v6702_v5, %s6439_s0 }
 0x33f   : > { %1793 = vrot.lane.b32.xlu1 %v6680_v52, %s6439_s0 }
 0x342   : > { %1799 = vrot.lane.b32.xlu0 %v6720_v18, %s6439_s0 }
 0x343   : > { %1797 = vrot.lane.b32.xlu1 %v6699_v1, %s6439_s0 }
 0x346   : > { %1803 = vrot.lane.b32.xlu0 %v6734_v31, %s6439_s0 }
 0x347   : > { %1801 = vrot.lane.b32.xlu1 %v6717_v15, %s6439_s0 }
 0x34a   : > { %2001 = vrot.lane.b32.xlu0 %v6652_v38, %s8829_s22 }
 0x34b   : > { %1805 = vrot.lane.b32.xlu1 %v6731_v28, %s6439_s0 }
 0x34f   : > { %2003 = vrot.lane.b32.xlu1 %v6670_v46, %s8829_s22 }
 0x352   : > { %v1186_v58 = vpop.xlane.xlu0 %1185 }
 0x353   : > { %6078 = vrcp.f32 %v1186_v58 }
 0x356   : > { %v1182_v17 = vpop.xlane.xlu0 %1181  ;;  %v1188_v59 = vpop.xlane.xlu1 %1187 }
 0x357   : > { %6080 = vrcp.f32 %v1188_v59 }
 0x358   : > { %6082 = vrcp.f32 %v1182_v17 }
 0x35a   : > { %v1184_v20 = vpop.xlane.xlu1 %1183 }
 0x35b   : > { %6084 = vrcp.f32 %v1184_v20 }
 0x35d   : > { %v6079_v9 = vpop.eup %6078 }
 0x35e   : > { %v1218_v50 = vmul.f32 %v6079_v9, %v7030_v49  ;;  %v1495_v49 = vsel %vm8889_vm2, %v6795_v56, 0  ;;  %v1463_v56 = vpop.permute.xlu0 %1462  ;;  %vm8896_vm2 = vmmov %vm8890_vm0  ;;  %v1465_v11 = vpop.permute.xlu1 %1464 }
 0x361   : > { %v6081_v0 = vpop.eup %6080 }
 0x362   : > { %v6083_v30 = vpop.eup %6082  ;;  %v1220_v35 = vmul.f32 %v6081_v0, %v7035_v32  ;;  %v1501_v32 = vsel %vm8893_vm11, %v1459_v25, 0  ;;  %vm8901_vm11 = vmmov %vm8890_vm0 }
 0x363   : > { %v1214_v60 = vmul.f32 %v6083_v30, %v7033_v27  ;;  %v1498_v27 = vsel %vm8891_vm6, %v7024_v37, 0  ;;  %vm8897_vm6 = vmmov %vm8890_vm0 }
 0x364   : > { %v1246_v26 = vpack.c.bf16 %v1220_v35, %v1218_v50 }
 0x365   : > { %v6085_v7 = vpop.eup %6084 }
 0x366   : > { %v1216_v13 = vmul.f32 %v6085_v7, %v7039_v2  ;;  %5156 = vst [vmem:[%s7143_s29 + $0x8] sm:$0xff] %v1246_v26   ;;  %v1504_v2 = vsel %vm8895_vm1, %v7054_v16, 0  ;;  %vm8899_vm1 = vmmov %vm8890_vm0 }
 0x368   : > { %v1245_v42 = vpack.c.bf16 %v1216_v13, %v1214_v60 }
 0x36a   : > { %5498 = vmatprep.mubr.bf16.mxu1 %v1245_v42  ;;  %4960 = vst [vmem:[%s7143_s29] sm:$0xff] %v1245_v42  }
 0x36b   : > { %5499 = vmatmul.mubr.bf16.vlgmr.msra.gmra.mrb[16].mxu1 %v1246_v26 }
 0x36c   : > { %5515 = vmatpush3.bf16.xpose.msra.mxu1 %v1495_v49 }
 0x36d   : > { %5763 = vmatprep.subr.msk.bf16.mxu1 %vm8890_vm0, %v7024_v37  ;;  %v1507_v37 = vsel %vm8890_vm0, %v1463_v56, 0 }
 0x374   : > { %5517 = vmatpush3.bf16.xpose.msra.mxu1 %v1498_v27 }
 0x375   : > { %5764 = vmatprep.subr.msk.bf16.mxu1 %vm8892_vm4, %v1459_v25  ;;  %vm8898_vm4 = vmmov %vm8890_vm0 }
 0x376   : > { %v1510_v17 = vsel %vm8898_vm4, %v1465_v11, 0  ;;  %vm8904_vm4 = vmmov %vm8890_vm0 }
 0x37c   : > { %5519 = vmatpush3.bf16.xpose.msra.mxu1 %v1501_v32 }
 0x37d   : > { %5765 = vmatprep.subr.msk.bf16.mxu1 %vm8894_vm12, %v7054_v16  ;;  %vm8900_vm12 = vmmov %vm8890_vm0 }
 0x384   : > { %5521 = vmatpush3.bf16.xpose.msra.mxu1 %v1504_v2 }
 0x385   : > { %5766 = vmatprep.subr.msk.bf16.mxu1 %vm8896_vm2, %v1463_v56  ;;  %vm8902_vm2 = vmmov %vm8890_vm0 }
 0x38b   : > { %v1194_v40 = vpop.xlane.xlu0 %1193 }
 0x38c   : > { %5523 = vmatpush3.bf16.xpose.msra.mxu1 %v1507_v37 }
 0x38d   : > { %5767 = vmatprep.subr.msk.bf16.mxu1 %vm8897_vm6, %v1465_v11  ;;  %vm8903_vm6 = vmmov %vm8890_vm0 }
 0x38f   : > { %v1192_v57 = vpop.xlane.xlu0 %1191  ;;  %v1190_v25 = vpop.xlane.xlu1 %1189 }
 0x390   : > { %6086 = vrcp.f32 %v1192_v57 }
 0x391   : > { %6088 = vrcp.f32 %v1190_v25 }
 0x392   : > { %6090 = vrcp.f32 %v1194_v40 }
 0x393   : > { %v1210_v58 = vpop.xlane.xlu0 %1209  ;;  %v1196_v16 = vpop.xlane.xlu1 %1195 }
 0x394   : > { %5525 = vmatpush3.bf16.xpose.msra.mxu1 %v1510_v17  ;;  %6092 = vrcp.f32 %v1196_v16 }
 0x395   : > { %6094 = vrcp.f32 %v1210_v58 }
 0x397   : > { %v1202_v59 = vpop.xlane.xlu1 %1201  ;;  %v1206_v20 = vpop.xlane.xlu0 %1205 }
 0x398   : > { %6096 = vrcp.f32 %v1202_v59 }
 0x39a   : > { %v6087_v9 = vpop.eup %6086 }
 0x39b   : > { %v6089_v0 = vpop.eup %6088  ;;  %v1198_v30 = vpop.xlane.xlu1 %1197  ;;  %v1224_v50 = vmul.f32 %v6087_v9, %v7062_v19 }
 0x39c   : > { %v1222_v35 = vmul.f32 %v6089_v0, %v7060_v22  ;;  %v6091_v7 = vpop.eup %6090 }
 0x39d   : > { %v1212_v26 = vpop.xlane.xlu0 %1211  ;;  %v1226_v49 = vmul.f32 %v6091_v7, %v7056_v45 }
 0x39e   : > { %6098 = vrcp.f32 %v1212_v26  ;;  %v1247_v60 = vpack.c.bf16 %v1224_v50, %v1222_v35  ;;  %v6093_v13 = vpop.eup %6092 }
 0x39f   : > { %v1204_v42 = vpop.xlane.xlu1 %1203  ;;  %v1228_v27 = vmul.f32 %v6093_v13, %v7068_v34  ;;  %v6095_v11 = vpop.eup %6094 }
 0x3a0   : > { %5502 = vmatprep.mubr.bf16.mxu1 %v1247_v60  ;;  %5157 = vst [vmem:[%s7143_s29 + $0x10] sm:$0xff] %v1247_v60   ;;  %6100 = vrcp.f32 %v1204_v42  ;;  %v1242_v57 = vmul.f32 %v6095_v11, %v7070_v14 }
 0x3a1   : > { %v1467_v32 = vpop.permute.xlu0 %1466  ;;  %6102 = vrcp.f32 %v1198_v30  ;;  %v1248_v22 = vpack.c.bf16 %v1228_v27, %v1226_v49 }
 0x3a2   : > { %5768 = vmatprep.subr.msk.bf16.mxu1 %vm8899_vm1, %v1467_v32  ;;  %v1513_v19 = vsel %vm8900_vm12, %v1467_v32, 0  ;;  %v6097_v40 = vpop.eup %6096  ;;  %vm8905_vm1 = vmmov %vm8890_vm0 }
 0x3a3   : > { %5527 = vmatpush3.bf16.xpose.msra.mxu1 %v1513_v19  ;;  %v1200_v2 = vpop.xlane.xlu1 %1199  ;;  %5158 = vst [vmem:[%s7143_s29 + $0x18] sm:$0xff] %v1248_v22   ;;  %v1234_v16 = vmul.f32 %v6097_v40, %v7075_v62  ;;  %vm8906_vm12 = vmmov %vm8890_vm0 }
 0x3a4   : > { %5503 = vmatmul.mubr.bf16.gmra.mrb[20].mxu1 %v1248_v22  ;;  %6104 = vrcp.f32 %v1200_v2 }
 0x3a5   : > { %v1431_v56 = vpop.permute.xlu0 %1430  ;;  %6106 = vrcp.f32 %v1206_v20 }
 0x3a7   : > { %v1208_v37 = vpop.xlane.xlu1 %1207 }
 0x3a8   : > { %v6099_v45 = vpop.eup %6098  ;;  %6108 = vrcp.f32 %v1208_v37 }
 0x3a9   : > { %v1435_v34 = vpop.permute.xlu0 %1434  ;;  %v1244_v25 = vmul.f32 %v6099_v45, %v7084_v12 }
 0x3aa   : > { %v6101_v58 = vpop.eup %6100 }
 0x3ab   : > { %v1469_v17 = vpop.permute.xlu1 %1468  ;;  %v1236_v59 = vmul.f32 %v6101_v58, %v7087_v10  ;;  %v1252_v9 = vpack.c.bf16 %v1244_v25, %v1242_v57  ;;  %v6103_v0 = vpop.eup %6102 }
 0x3ac   : > { %5769 = vmatprep.subr.msk.bf16.mxu1 %vm8901_vm11, %v1469_v17  ;;  %v1516_v20 = vsel %vm8902_vm2, %v1469_v17, 0  ;;  %v1230_v35 = vmul.f32 %v6103_v0, %v7081_v54  ;;  %vm8907_vm11 = vmmov %vm8890_vm0 }
 0x3ad   : > { %v1439_v30 = vpop.permute.xlu0 %1438  ;;  %5529 = vmatpush3.bf16.xpose.msra.mxu1 %v1516_v20  ;;  %v1250_v50 = vpack.c.bf16 %v1236_v59, %v1234_v16  ;;  %5162 = vst [vmem:[%s7143_s29 + $0x38] sm:$0xff] %v1252_v9   ;;  %vm8908_vm2 = vmmov %vm8890_vm0 }
 0x3ae   : > { %v6105_v14 = vpop.eup %6104 }
 0x3af   : > { %v1433_v12 = vpop.permute.xlu1 %1432  ;;  %v1232_v7 = vmul.f32 %v6105_v14, %v7090_v6  ;;  %5160 = vst [vmem:[%s7143_s29 + $0x28] sm:$0xff] %v1250_v50   ;;  %v6107_v62 = vpop.eup %6106 }
 0x3b0   : > { %v1238_v42 = vmul.f32 %v6107_v62, %v7077_v29 }
 0x3b1   : > { %v1443_v10 = vpop.permute.xlu0 %1442  ;;  %v1249_v26 = vpack.c.bf16 %v1232_v7, %v1230_v35 }
 0x3b2   : > { %v6109_v60 = vpop.eup %6108 }
 0x3b3   : > { %5506 = vmatprep.mubr.bf16.mxu1 %v1249_v26  ;;  %5159 = vst [vmem:[%s7143_s29 + $0x20] sm:$0xff] %v1249_v26   ;;  %v1437_v13 = vpop.permute.xlu1 %1436  ;;  %v1240_v49 = vmul.f32 %v6109_v60, %v7093_v24 }
 0x3b4   : > { %5507 = vmatmul.mubr.bf16.gmra.mrb[24].mxu1 %v1250_v50 }
 0x3b5   : > { %v1792_v27 = vpop.permute.xlu0 %1791  ;;  %v1251_v32 = vpack.c.bf16 %v1240_v49, %v1238_v42 }
 0x3b6   : > { %5546 = vmatprep.subr.bf16.mxu0 %v1792_v27 }
 0x3b7   : > { %5510 = vmatprep.mubr.bf16.mxu1 %v1251_v32  ;;  %5161 = vst [vmem:[%s7143_s29 + $0x30] sm:$0xff] %v1251_v32   ;;  %v1441_v54 = vpop.permute.xlu1 %1440  ;;  %5547 = vmatpush3.bf16.msra.mxu0 %v1792_v27 }
 0x3b9   : > { %v1796_v19 = vpop.permute.xlu0 %1795 }
 0x3bb   : > { %v1445_v6 = vpop.permute.xlu1 %1444 }
 0x3bc   : > { %5511 = vmatmul.mubr.bf16.gmra.mrb[28].mxu1 %v1252_v9 }
 0x3bd   : > { %5530 = vmatprep.mubr.msk.bf16.mxu1 %vm8890_vm0, %v1431_v56  ;;  %v1800_v24 = vpop.permute.xlu0 %1799 }
 0x3bf   : > { %v1794_v22 = vpop.permute.xlu1 %1793 }
 0x3c0   : > { %5548 = vmatprep.subr.bf16.mxu0 %v1794_v22 }
 0x3c1   : > { %5549 = vmatpush3.bf16.msra.mxu0 %v1794_v22  ;;  %v1804_v56 = vpop.permute.xlu0 %1803 }
 0x3c2   : > { %5550 = vmatprep.subr.bf16.mxu0 %v1796_v19 }
 0x3c3   : > { %v1798_v29 = vpop.permute.xlu1 %1797 }
 0x3c4   : > { %5531 = vmatmul.mubr.msk.bf16.vlgmr.msra.gmra.mrb[32].mxu1 %vm8903_vm6, %v1433_v12  ;;  %vm8909_vm6 = vmmov %vm8890_vm0 }
 0x3c5   : > { %5534 = vmatprep.mubr.msk.bf16.mxu1 %vm8904_vm4, %v1435_v34  ;;  %5551 = vmatpush3.bf16.msra.mxu0 %v1796_v19  ;;  %v7192_v40 = vpop.permute.xlu0 %2001 }
 0x3c6   : > { %5552 = vmatprep.subr.bf16.mxu0 %v1798_v29 }
 0x3c7   : > { %v1802_v2 = vpop.permute.xlu1 %1801 }
 0x3c9   : > { %5553 = vmatpush3.bf16.msra.mxu0 %v1798_v29 }
 0x3ca   : > { %5554 = vmatprep.subr.bf16.mxu0 %v1800_v24 }
 0x3cb   : > { %v1806_v11 = vpop.permute.xlu1 %1805 }
 0x3cc   : > { %5535 = vmatmul.mubr.msk.bf16.gmra.mrb[36].mxu1 %vm8905_vm1, %v1437_v13 }
 0x3cd   : > { %5538 = vmatprep.mubr.msk.bf16.mxu1 %vm8906_vm12, %v1439_v30  ;;  %5555 = vmatpush3.bf16.msra.mxu0 %v1800_v24 }
 0x3ce   : > { %5556 = vmatprep.subr.bf16.mxu0 %v1802_v2 }
 0x3d1   : > { %5557 = vmatpush3.bf16.msra.mxu0 %v1802_v2  ;;  %v8926_v2 = vld [vmem:[#allocation16_spill] sm:$0xff] }
 0x3d2   : > { %5558 = vmatprep.subr.bf16.mxu0 %v1804_v56  ;;  %vm8927_vm4 = vnez %v8926_v2 }
 0x3d4   : > { %5539 = vmatmul.mubr.msk.bf16.gmra.mrb[40].mxu1 %vm8907_vm11, %v1441_v54 }
 0x3d5   : > { %5542 = vmatprep.mubr.msk.bf16.mxu1 %vm8908_vm2, %v1443_v10  ;;  %5559 = vmatpush3.bf16.msra.mxu0 %v1804_v56 }
 0x3d6   : > { %5560 = vmatprep.subr.bf16.mxu0 %v1806_v11 }
 0x3d9   : > { %5561 = vmatpush3.bf16.msra.mxu0 %v1806_v11 }
 0x3da   : > { %5770 = vmatprep.subr.msk.bf16.mxu0 %vm8890_vm0, %v7192_v40 }
 0x3dc   : > { %5543 = vmatmul.mubr.msk.bf16.gmra.mrb[44].mxu1 %vm8909_vm6, %v1445_v6 }
 0x43e   : > { %v7197_v37 = vpop.f32.mrb[16].mxu1 }
 0x43f   : > { %8910 = vst [vmem:[#allocation23_spill] sm:$0xff] %v7197_v37  ;;  %v7199_v45 = vpop.f32.mrb[17].mxu1 }
 0x440   : > { %8911 = vst [vmem:[#allocation24_spill] sm:$0xff] %v7199_v45  ;;  %v7201_v34 = vpop.f32.mrb[18].mxu1 }
 0x441   : > { %8912 = vst [vmem:[#allocation25_spill] sm:$0xff] %v7201_v34  ;;  %v7203_v57 = vpop.f32.mrb[19].mxu1 }
 0x442   : > { %8913 = vst [vmem:[#allocation26_spill] sm:$0xff] %v7203_v57 }
 0x477   : > { %v7205_v25 = vpop.f32.mrb[20].mxu1 }
 0x478   : > { %8914 = vst [vmem:[#allocation27_spill] sm:$0xff] %v7205_v25  ;;  %v7207_v58 = vpop.f32.mrb[21].mxu1 }
 0x479   : > { %8915 = vst [vmem:[#allocation28_spill] sm:$0xff] %v7207_v58  ;;  %v7209_v17 = vpop.f32.mrb[22].mxu1 }
 0x47a   : > { %8916 = vst [vmem:[#allocation29_spill] sm:$0xff] %v7209_v17  ;;  %v7211_v16 = vpop.f32.mrb[23].mxu1 }
 0x47b   : > { %8917 = vst [vmem:[#allocation30_spill] sm:$0xff] %v7211_v16 }
 0x487   : > { %v7213_v59 = vpop.f32.mrb[24].mxu1 }
 0x488   : > { %8918 = vst [vmem:[#allocation31_spill] sm:$0xff] %v7213_v59  ;;  %v7215_v9 = vpop.f32.mrb[25].mxu1  ;;  %v8938_v59 = vld [vmem:[#allocation7_spill] sm:$0xff] }
 0x489   : > { %8919 = vst [vmem:[#allocation32_spill] sm:$0xff] %v7215_v9  ;;  %v7217_v0 = vpop.f32.mrb[26].mxu1 }
 0x48a   : > { %8920 = vst [vmem:[#allocation33_spill] sm:$0xff] %v7217_v0  ;;  %v7219_v20 = vpop.f32.mrb[27].mxu1  ;;  %v8940_v0 = vld [vmem:[#allocation14_spill] sm:$0xff] }
 0x48b   : > { %8921 = vst [vmem:[#allocation34_spill] sm:$0xff] %v7219_v20  ;;  %vm8941_vm0 = vnez %v8940_v0 }
 0x48f   : > { %v7221_v30 = vpop.f32.mrb[28].mxu1 }
 0x490   : > { %8922 = vst [vmem:[#allocation35_spill] sm:$0xff] %v7221_v30  ;;  %v7223_v50 = vpop.f32.mrb[29].mxu1 }
 0x491   : > { %8923 = vst [vmem:[#allocation36_spill] sm:$0xff] %v7223_v50  ;;  %v7225_v14 = vpop.f32.mrb[30].mxu1 }
 0x492   : > { %8924 = vst [vmem:[#allocation37_spill] sm:$0xff] %v7225_v14  ;;  %v7227_v12 = vpop.f32.mrb[31].mxu1 }
 0x493   : > { %8925 = vst [vmem:[#allocation38_spill] sm:$0xff] %v7227_v12  ;;  %v8932_v12 = vld [vmem:[#allocation19_spill] sm:$0xff] }
 0x494   : > { %vm8933_vm12 = vnez %v8932_v12 }
 0x497   : > { %v5532_v35 = vpop.f32.mrb[32].mxu1 }
 0x498   : > { %v1552_v7 = vpop.f32.mrb[33].mxu1  ;;  %v1617_v62 = vsel %vm6836_vm9, -1e+09, %v5532_v35 }
 0x499   : > { %1635 = vmax.xlane.f32.xlu0 %v1617_v62  ;;  %v5533_v10 = vpop.f32.mrb[34].mxu1  ;;  %v1615_v13 = vsel %vm6842_vm10, -1e+09, %v1552_v7 }
 0x49a   : > { %v1555_v26 = vpop.f32.mrb[35].mxu1  ;;  %v1618_v27 = vsel %vm6861_vm13, -1e+09, %v5533_v10 }
 0x49b   : > { %v1616_v60 = vsel %vm6868_vm14, -1e+09, %v1555_v26  ;;  %v8929_v26 = vld [vmem:[#allocation17_spill] sm:$0xff] }
 0x49c   : > { %1633 = vmax.xlane.f32.xlu1 %v1616_v60  ;;  %vm8930_vm1 = vnez %v8929_v26 }
 0x49d   : > { %1631 = vmax.xlane.f32.xlu0 %v1615_v13 }
 0x49f   : > { %v5536_v42 = vpop.f32.mrb[36].mxu1 }
 0x4a0   : > { %v1568_v49 = vpop.f32.mrb[37].mxu1  ;;  %v7244_v22 = vsel %vm6887_vm3, -1e+09, %v5536_v42 }
 0x4a1   : > { %1637 = vmax.xlane.f32.xlu0 %v1618_v27  ;;  %v5537_v32 = vpop.f32.mrb[38].mxu1  ;;  %v7254_v56 = vsel %vm8927_vm4, -1e+09, %v1568_v49 }
 0x4a2   : > { %v1571_v54 = vpop.f32.mrb[39].mxu1  ;;  %v7239_v6 = vsel %vm6895_vm5, -1e+09, %v5537_v32 }
 0x4a3   : > { %1645 = vmax.xlane.f32.xlu1 %v7239_v6  ;;  %v7249_v19 = vsel %vm6921_vm15, -1e+09, %v1571_v54 }
 0x4a5   : > { %1643 = vmax.xlane.f32.xlu0 %v7244_v22 }
 0x4a7   : > { %1641 = vmax.xlane.f32.xlu1 %v7249_v19  ;;  %v5540_v29 = vpop.f32.mrb[40].mxu1 }
 0x4a8   : > { %v1584_v24 = vpop.f32.mrb[41].mxu1  ;;  %v7264_v42 = vsel %vm8930_vm1, -1e+09, %v5540_v29  ;;  %v8934_v29 = vld [vmem:[#allocation21_spill] sm:$0xff] }
 0x4a9   : > { %1639 = vmax.xlane.f32.xlu0 %v7254_v56  ;;  %v5541_v11 = vpop.f32.mrb[42].mxu1  ;;  %vm8935_vm11 = vnez %v8934_v29 }
 0x4aa   : > { %v1587_v35 = vpop.f32.mrb[43].mxu1  ;;  %v7259_v10 = vsel %vm6947_vm8, -1e+09, %v5541_v11  ;;  %v7274_v11 = vsel %vm8933_vm12, -1e+09, %v1584_v24  ;;  %v8939_v24 = vld [vmem:[#allocation6_spill] sm:$0xff] }
 0x4ab   : > { %1653 = vmax.xlane.f32.xlu1 %v7259_v10  ;;  %v7269_v49 = vsel %vm6972_vm7, -1e+09, %v1587_v35  ;;  %v8936_v35 = vld [vmem:[#allocation22_spill] sm:$0xff] }
 0x4ac   : > { %vm8937_vm2 = vnez %v8936_v35 }
 0x4ad   : > { %1651 = vmax.xlane.f32.xlu0 %v7264_v42 }
 0x4af   : > { %1649 = vmax.xlane.f32.xlu1 %v7269_v49  ;;  %v5544_v54 = vpop.f32.mrb[44].mxu1 }
 0x4b0   : > { %v1600_v50 = vpop.f32.mrb[45].mxu1  ;;  %v7279_v9 = vsel %vm8935_vm11, -1e+09, %v5544_v54  ;;  %v8942_v54 = vld [vmem:[#allocation15_spill] sm:$0xff] }
 0x4b1   : > { %1647 = vmax.xlane.f32.xlu0 %v7274_v11  ;;  %v5545_v30 = vpop.f32.mrb[46].mxu1  ;;  %v7284_v20 = vsel %vm8937_vm2, -1e+09, %v1600_v50  ;;  %vm8943_vm6 = vnez %v8942_v54  ;;  %v7301_v50 = vpop.permute.xlu1 %2003 }
 0x4b2   : > { %v1603_v14 = vpop.f32.mrb[47].mxu1  ;;  %v7293_v58 = vsel %vm8941_vm0, -1e+09, %v5545_v30 }
 0x4b3   : > { %v7298_v16 = vsel %vm8943_vm6, -1e+09, %v1603_v14  ;;  %vm8946_vm6 = vcmask 261120  }
 0x4b4   : > { %vm8947_vm0 = vmmov %vm8946_vm6 }
 0x4b5   : > { %1659 = vmax.xlane.f32.xlu0 %v7279_v9  ;;  %vm8948_vm2 = vmmov %vm8947_vm0 }
 0x4b6   : > { %vm8949_vm11 = vmmov %vm8947_vm0 }
 0x4b7   : > { %vm8950_vm12 = vmmov %vm8947_vm0 }
 0x4b8   : > { %vm8951_vm7 = vmmov %vm8947_vm0 }
 0x4b9   : > { %1655 = vmax.xlane.f32.xlu0 %v7284_v20  ;;  %vm8952_vm1 = vmmov %vm8947_vm0 }
 0x4c0   : > { %2007 = vrot.lane.b32.xlu1 %v8938_v59, %s8829_s22 }
 0x4cf   : > { %2005 = vrot.lane.b32.xlu0 %v8939_v24, %s8829_s22 }
 0x4e4   : > { %1661 = vmax.xlane.f32.xlu1 %v7293_v58 }
 0x4e8   : > { %1657 = vmax.xlane.f32.xlu1 %v7298_v16 }
 0x526   : > { %v1636_v25 = vpop.xlane.xlu0 %1635 }
 0x527   : > { %v1665_v17 = vsub.f32 %v1617_v62, %v1636_v25 }
 0x529   : > { %v1683_v37 = vmul.f32 1.442695, %v1665_v17  ;;  %v1634_v34 = vpop.xlane.xlu1 %1633 }
 0x52a   : > { %v1664_v45 = vsub.f32 %v1616_v60, %v1634_v34  ;;  %v1632_v57 = vpop.xlane.xlu0 %1631  ;;  %v8944_v34 = vld [vmem:[#allocation13_spill] sm:$0xff] }
 0x52b   : > { %6110 = vpow2.f32 %v1683_v37  ;;  %v1663_v0 = vsub.f32 %v1615_v13, %v1632_v57  ;;  %v8945_v57 = vld [vmem:[#allocation10_spill] sm:$0xff] }
 0x52c   : > { %v1681_v30 = vmul.f32 1.442695, %v1664_v45 }
 0x52d   : > { %v1679_v24 = vmul.f32 1.442695, %v1663_v0 }
 0x52e   : > { %6112 = vpow2.f32 %v1681_v30  ;;  %v1638_v59 = vpop.xlane.xlu0 %1637 }
 0x52f   : > { %6114 = vpow2.f32 %v1679_v24  ;;  %v1666_v54 = vsub.f32 %v1618_v27, %v1638_v59 }
 0x530   : > { %v1646_v59 = vpop.xlane.xlu1 %1645 }
 0x531   : > { %v1685_v14 = vmul.f32 1.442695, %v1666_v54  ;;  %v1670_v12 = vsub.f32 %v7239_v6, %v1646_v59 }
 0x532   : > { %v1644_v45 = vpop.xlane.xlu0 %1643 }
 0x533   : > { %6116 = vpow2.f32 %v1685_v14  ;;  %v1669_v62 = vsub.f32 %v7244_v22, %v1644_v45  ;;  %v1693_v26 = vmul.f32 1.442695, %v1670_v12 }
 0x534   : > { %v1642_v60 = vpop.xlane.xlu1 %1641 }
 0x535   : > { %v7303_v35 = vpop.eup %6110  ;;  %v1691_v27 = vmul.f32 1.442695, %v1669_v62  ;;  %v1668_v54 = vsub.f32 %v7249_v19, %v1642_v60 }
 0x536   : > { %1715 = vadd.xlane.f32.xlu1 %v7303_v35  ;;  %v1640_v17 = vpop.xlane.xlu0 %1639 }
 0x537   : > { %v1667_v24 = vsub.f32 %v7254_v56, %v1640_v17  ;;  %6118 = vpow2.f32 %v1691_v27  ;;  %v1689_v32 = vmul.f32 1.442695, %v1668_v54 }
 0x538   : > { %v7306_v29 = vpop.eup %6112  ;;  %v1654_v30 = vpop.xlane.xlu1 %1653 }
 0x539   : > { %v7308_v25 = vpop.eup %6114  ;;  %1713 = vadd.xlane.f32.xlu0 %v7306_v29  ;;  %v1674_v6 = vsub.f32 %v7259_v10, %v1654_v30 }
 0x53a   : > { %1711 = vadd.xlane.f32.xlu1 %v7308_v25  ;;  %v1652_v0 = vpop.xlane.xlu0 %1651 }
 0x53c   : > { %v1650_v7 = vpop.xlane.xlu1 %1649 }
 0x53d   : > { %v7312_v37 = vpop.eup %6116 }
 0x53e   : > { %1717 = vadd.xlane.f32.xlu1 %v7312_v37  ;;  %v1648_v13 = vpop.xlane.xlu0 %1647 }
 0x53f   : > { %v1671_v56 = vsub.f32 %v7274_v11, %v1648_v13 }
 0x540   : > { %v7330_v12 = vpop.permute.xlu1 %2007 }
 0x541   : > { %v1695_v59 = vmul.f32 1.442695, %v1671_v56  ;;  %v7328_v60 = vpop.eup %6118 }
 0x542   : > { %v1660_v14 = vpop.xlane.xlu0 %1659 }
 0x543   : > { %v1677_v22 = vsub.f32 %v7279_v9, %v1660_v14 }
 0x545   : > { %v1707_v19 = vmul.f32 1.442695, %v1677_v22 }
 0x546   : > { %v1656_v17 = vpop.xlane.xlu0 %1655 }
 0x547   : > { %v1675_v62 = vsub.f32 %v7284_v20, %v1656_v17 }
 0x549   : > { %v1703_v9 = vmul.f32 1.442695, %v1675_v62 }
 0x54f   : > { %2011 = vrot.lane.b32.xlu1 %v8944_v34, %s8829_s22  ;;  %2009 = vrot.lane.b32.xlu0 %v8945_v57, %s8829_s22  ;;  %v1687_v34 = vmul.f32 1.442695, %v1667_v24  ;;  %v1673_v57 = vsub.f32 %v7264_v42, %v1652_v0  ;;  %v1701_v42 = vmul.f32 1.442695, %v1674_v6 }
 0x551   : > { %6120 = vpow2.f32 %v1687_v34  ;;  %v1699_v45 = vmul.f32 1.442695, %v1673_v57 }
 0x552   : > { %6122 = vpow2.f32 %v1689_v32  ;;  %v1672_v32 = vsub.f32 %v7269_v49, %v1650_v7 }
 0x553   : > { %6124 = vpow2.f32 %v1693_v26 }
 0x554   : > { %6126 = vpow2.f32 %v1699_v45  ;;  %v1697_v34 = vmul.f32 1.442695, %v1672_v32  ;;  %v2006_v45 = vpop.permute.xlu0 %2005 }
 0x555   : > { %6128 = vpow2.f32 %v1707_v19 }
 0x556   : > { %6130 = vpow2.f32 %v1695_v59 }
 0x557   : > { %6132 = vpow2.f32 %v1703_v9 }
 0x558   : > { %6134 = vpow2.f32 %v1701_v42 }
 0x55b   : > { %v7334_v26 = vpop.eup %6120 }
 0x55c   : > { %v7336_v20 = vpop.eup %6122 }
 0x55d   : > { %v7341_v0 = vpop.eup %6124 }
 0x55e   : > { %v7343_v7 = vpop.eup %6126 }
 0x55f   : > { %v7348_v27 = vpop.eup %6128 }
 0x560   : > { %v7350_v24 = vpop.eup %6130 }
 0x561   : > { %v7354_v54 = vpop.eup %6132 }
 0x562   : > { %v7356_v30 = vpop.eup %6134 }
 0x56e   : > { %1723 = vadd.xlane.f32.xlu0 %v7328_v60 }
 0x571   : > { %v1662_v11 = vpop.xlane.xlu1 %1661 }
 0x572   : > { %v1678_v10 = vsub.f32 %v7293_v58, %v1662_v11  ;;  %1719 = vadd.xlane.f32.xlu0 %v7334_v26 }
 0x573   : > { %1721 = vadd.xlane.f32.xlu1 %v7336_v20 }
 0x574   : > { %v1709_v57 = vmul.f32 1.442695, %v1678_v10 }
 0x575   : > { %v1658_v13 = vpop.xlane.xlu1 %1657 }
 0x576   : > { %6136 = vpow2.f32 %v1709_v57  ;;  %v1676_v49 = vsub.f32 %v7298_v16, %v1658_v13  ;;  %1725 = vadd.xlane.f32.xlu0 %v7341_v0  ;;  %v2042_v57 = vsel %vm8946_vm6, %v7192_v40, 0  ;;  %vm8953_vm6 = vmmov %vm8947_vm0 }
 0x577   : > { %1731 = vadd.xlane.f32.xlu1 %v7343_v7  ;;  %6138 = vpow2.f32 %v1697_v34 }
 0x578   : > { %v1705_v58 = vmul.f32 1.442695, %v1676_v49 }
 0x57a   : > { %1739 = vadd.xlane.f32.xlu0 %v7348_v27  ;;  %6140 = vpow2.f32 %v1705_v58 }
 0x57b   : > { %1727 = vadd.xlane.f32.xlu1 %v7350_v24 }
 0x57e   : > { %1735 = vadd.xlane.f32.xlu0 %v7354_v54 }
 0x57f   : > { %1733 = vadd.xlane.f32.xlu1 %v7356_v30 }
 0x580   : > { %v7360_v16 = vpop.eup %6136 }
 0x581   : > { %v7362_v14 = vpop.eup %6138 }
 0x582   : > { %1741 = vadd.xlane.f32.xlu0 %v7360_v16 }
 0x583   : > { %1729 = vadd.xlane.f32.xlu1 %v7362_v14 }
 0x584   : > { %v7366_v22 = vpop.eup %6140 }
 0x587   : > { %1737 = vadd.xlane.f32.xlu1 %v7366_v22 }
 0x598   : > { %2013 = vrot.lane.b32.xlu0 %v6746_v48, %s8829_s22  ;;  %2015 = vrot.lane.b32.xlu1 %v6752_v61, %s8829_s22 }
 0x59c   : > { %1985 = vrot.lane.b32.xlu0 %v6654_v39, %s8829_s22  ;;  %1987 = vrot.lane.b32.xlu1 %v6761_v63, %s8829_s22 }
 0x5a0   : > { %1989 = vrot.lane.b32.xlu0 %v6766_v3, %s8829_s22  ;;  %1991 = vrot.lane.b32.xlu1 %v6775_v4, %s8829_s22 }
 0x5a4   : > { %1993 = vrot.lane.b32.xlu0 %v6777_v41, %s8829_s22  ;;  %1995 = vrot.lane.b32.xlu1 %v6783_v43, %s8829_s22 }
 0x5a8   : > { %1997 = vrot.lane.b32.xlu0 %v6785_v44, %s8829_s22  ;;  %1999 = vrot.lane.b32.xlu1 %v6791_v51, %s8829_s22 }
 0x5ac   : > { %2330 = vrot.lane.b32.xlu0 %v6682_v55, %s8829_s22  ;;  %2332 = vrot.lane.b32.xlu1 %v6680_v52, %s8829_s22 }
 0x5b0   : > { %2334 = vrot.lane.b32.xlu0 %v6702_v5, %s8829_s22  ;;  %2336 = vrot.lane.b32.xlu1 %v6699_v1, %s8829_s22 }
 0x5b4   : > { %2338 = vrot.lane.b32.xlu0 %v6720_v18, %s8829_s22  ;;  %2340 = vrot.lane.b32.xlu1 %v6717_v15, %s8829_s22 }
 0x5b8   : > { %2342 = vrot.lane.b32.xlu0 %v6734_v31, %s8829_s22  ;;  %2344 = vrot.lane.b32.xlu1 %v6731_v28, %s8829_s22 }
 0x5bc   : > { %2540 = vrot.lane.b32.xlu0 %v6652_v38, %s8831_s12  ;;  %2542 = vrot.lane.b32.xlu1 %v6670_v46, %s8831_s12 }
 0x5c3   : > { %v1716_v56 = vpop.xlane.xlu1 %1715 }
 0x5c6   : > { %v1714_v17 = vpop.xlane.xlu0 %1713 }
 0x5c7   : > { %6142 = vrcp.f32 %v1714_v17  ;;  %v1712_v19 = vpop.xlane.xlu1 %1711 }
 0x5c8   : > { %6144 = vrcp.f32 %v1712_v19 }
 0x5c9   : > { %6146 = vrcp.f32 %v1716_v56 }
 0x5ca   : > { %v2010_v40 = vpop.permute.xlu0 %2009 }
 0x5cb   : > { %v1718_v62 = vpop.xlane.xlu1 %1717  ;;  %v2054_v13 = vsel %vm8947_vm0, %v2010_v40, 0 }
 0x5cc   : > { %6148 = vrcp.f32 %v1718_v62 }
 0x5d1   : > { %v6143_v6 = vpop.eup %6142 }
 0x5d2   : > { %v6145_v59 = vpop.eup %6144  ;;  %v1746_v9 = vmul.f32 %v6143_v6, %v7306_v29  ;;  %v2045_v29 = vsel %vm8948_vm2, %v7301_v50, 0  ;;  %vm8954_vm2 = vmmov %vm8947_vm0 }
 0x5d3   : > { %v1744_v38 = vmul.f32 %v6145_v59, %v7308_v25  ;;  %v6147_v42 = vpop.eup %6146  ;;  %v2051_v25 = vsel %vm8952_vm1, %v7330_v12, 0  ;;  %vm8956_vm1 = vmmov %vm8947_vm0 }
 0x5d4   : > { %v1748_v11 = vmul.f32 %v6147_v42, %v7303_v35  ;;  %v2048_v35 = vsel %vm8950_vm12, %v2006_v45, 0  ;;  %vm8957_vm12 = vmmov %vm8947_vm0 }
 0x5d5   : > { %v1775_v32 = vpack.c.bf16 %v1746_v9, %v1744_v38 }
 0x5d6   : > { %v6149_v46 = vpop.eup %6148 }
 0x5d7   : > { %v1750_v10 = vmul.f32 %v6149_v46, %v7312_v37  ;;  %5562 = vmatprep.mubr.bf16.mxu0 %v1775_v32  ;;  %5163 = vst [vmem:[%s7143_s29 + $0x40] sm:$0xff] %v1775_v32  }
 0x5d9   : > { %v1776_v34 = vpack.c.bf16 %v1750_v10, %v1748_v11 }
 0x5db   : > { %5563 = vmatmul.mubr.bf16.vlgmr.msra.gmra.mrb[48].mxu0 %v1776_v34  ;;  %5164 = vst [vmem:[%s7143_s29 + $0x48] sm:$0xff] %v1776_v34  }
 0x5dc   : > { %5579 = vmatpush3.bf16.xpose.msra.mxu0 %v2042_v57 }
 0x5dd   : > { %5771 = vmatprep.subr.msk.bf16.mxu0 %vm8947_vm0, %v7301_v50  ;;  %v2012_v50 = vpop.permute.xlu1 %2011 }
 0x5e4   : > { %5581 = vmatpush3.bf16.xpose.msra.mxu0 %v2045_v29 }
 0x5e5   : > { %5772 = vmatprep.subr.msk.bf16.mxu0 %vm8949_vm11, %v2006_v45  ;;  %vm8958_vm11 = vmmov %vm8947_vm0 }
 0x5ec   : > { %5583 = vmatpush3.bf16.xpose.msra.mxu0 %v2048_v35 }
 0x5ed   : > { %5773 = vmatprep.subr.msk.bf16.mxu0 %vm8951_vm7, %v7330_v12  ;;  %vm8955_vm7 = vmmov %vm8947_vm0 }
 0x5ee   : > { %v2057_v56 = vsel %vm8955_vm7, %v2012_v50, 0  ;;  %vm8961_vm7 = vmmov %vm8947_vm0 }
 0x5f4   : > { %5585 = vmatpush3.bf16.xpose.msra.mxu0 %v2051_v25 }
 0x5f5   : > { %5774 = vmatprep.subr.msk.bf16.mxu0 %vm8953_vm6, %v2010_v40  ;;  %vm8959_vm6 = vmmov %vm8947_vm0 }
 0x5fb   : > { %v1724_v37 = vpop.xlane.xlu0 %1723 }
 0x5fc   : > { %5587 = vmatpush3.bf16.xpose.msra.mxu0 %v2054_v13 }
 0x5fd   : > { %5775 = vmatprep.subr.msk.bf16.mxu0 %vm8954_vm2, %v2012_v50  ;;  %vm8960_vm2 = vmmov %vm8947_vm0 }
 0x5ff   : > { %v1720_v49 = vpop.xlane.xlu0 %1719 }
 0x600   : > { %6150 = vrcp.f32 %v1720_v49  ;;  %v1722_v58 = vpop.xlane.xlu1 %1721 }
 0x601   : > { %6152 = vrcp.f32 %v1722_v58 }
 0x602   : > { %6154 = vrcp.f32 %v1724_v37 }
 0x603   : > { %v1726_v45 = vpop.xlane.xlu0 %1725 }
 0x604   : > { %6156 = vrcp.f32 %v1726_v45  ;;  %5589 = vmatpush3.bf16.xpose.msra.mxu0 %v2057_v56  ;;  %v1732_v12 = vpop.xlane.xlu1 %1731 }
 0x605   : > { %6158 = vrcp.f32 %v1732_v12 }
 0x607   : > { %v1740_v17 = vpop.xlane.xlu0 %1739 }
 0x608   : > { %v1728_v19 = vpop.xlane.xlu1 %1727 }
 0x60a   : > { %v6151_v62 = vpop.eup %6150 }
 0x60b   : > { %v6153_v6 = vpop.eup %6152  ;;  %v1736_v59 = vpop.xlane.xlu0 %1735  ;;  %v1752_v9 = vmul.f32 %v6151_v62, %v7334_v26 }
 0x60c   : > { %v6155_v38 = vpop.eup %6154  ;;  %v1734_v42 = vpop.xlane.xlu1 %1733  ;;  %v1754_v32 = vmul.f32 %v6153_v6, %v7336_v20 }
 0x60d   : > { %6160 = vrcp.f32 %v1734_v42  ;;  %v1756_v34 = vmul.f32 %v6155_v38, %v7328_v60 }
 0x60e   : > { %v6157_v46 = vpop.eup %6156  ;;  %6162 = vrcp.f32 %v1740_v17  ;;  %v1777_v11 = vpack.c.bf16 %v1754_v32, %v1752_v9 }
 0x60f   : > { %6164 = vrcp.f32 %v1728_v19  ;;  %v1742_v10 = vpop.xlane.xlu0 %1741  ;;  %v1758_v57 = vmul.f32 %v6157_v46, %v7341_v0  ;;  %v6159_v40 = vpop.eup %6158 }
 0x610   : > { %6166 = vrcp.f32 %v1742_v10  ;;  %5566 = vmatprep.mubr.bf16.mxu0 %v1777_v11  ;;  %5165 = vst [vmem:[%s7143_s29 + $0x50] sm:$0xff] %v1777_v11   ;;  %v1730_v29 = vpop.xlane.xlu1 %1729  ;;  %v1764_v50 = vmul.f32 %v6159_v40, %v7343_v7 }
 0x611   : > { %6168 = vrcp.f32 %v1730_v29  ;;  %v1778_v26 = vpack.c.bf16 %v1758_v57, %v1756_v34 }
 0x612   : > { %6170 = vrcp.f32 %v1736_v59 }
 0x613   : > { %v2014_v35 = vpop.permute.xlu0 %2013  ;;  %5567 = vmatmul.mubr.bf16.gmra.mrb[52].mxu0 %v1778_v26  ;;  %5166 = vst [vmem:[%s7143_s29 + $0x58] sm:$0xff] %v1778_v26  }
 0x614   : > { %5776 = vmatprep.subr.msk.bf16.mxu0 %vm8956_vm1, %v2014_v35  ;;  %v1738_v20 = vpop.xlane.xlu1 %1737  ;;  %v2060_v25 = vsel %vm8957_vm12, %v2014_v35, 0  ;;  %vm8962_vm1 = vmmov %vm8947_vm0 }
 0x615   : > { %6172 = vrcp.f32 %v1738_v20  ;;  %5591 = vmatpush3.bf16.xpose.msra.mxu0 %v2060_v25  ;;  %vm8963_vm12 = vmmov %vm8947_vm0 }
 0x617   : > { %v6161_v60 = vpop.eup %6160  ;;  %v1986_v0 = vpop.permute.xlu0 %1985 }
 0x618   : > { %v6163_v37 = vpop.eup %6162  ;;  %v2016_v13 = vpop.permute.xlu1 %2015  ;;  %v1766_v49 = vmul.f32 %v6161_v60, %v7356_v30 }
 0x619   : > { %v6165_v58 = vpop.eup %6164  ;;  %5777 = vmatprep.subr.msk.bf16.mxu0 %vm8958_vm11, %v2016_v13  ;;  %v1772_v19 = vmul.f32 %v6163_v37, %v7348_v27  ;;  %v2063_v59 = vsel %vm8959_vm6, %v2016_v13, 0  ;;  %vm8964_vm11 = vmmov %vm8947_vm0 }
 0x61a   : > { %v6167_v45 = vpop.eup %6166  ;;  %v1780_v56 = vpack.c.bf16 %v1766_v49, %v1764_v50  ;;  %v1760_v7 = vmul.f32 %v6165_v58, %v7350_v24  ;;  %vm8965_vm6 = vmmov %vm8947_vm0  ;;  %v8988_v49 = vld [vmem:[#allocation19_spill] sm:$0xff] }
 0x61b   : > { %v6169_v12 = vpop.eup %6168  ;;  %v1990_v17 = vpop.permute.xlu0 %1989  ;;  %v1774_v62 = vmul.f32 %v6167_v45, %v7360_v16 }
 0x61c   : > { %v1988_v6 = vpop.permute.xlu1 %1987  ;;  %v1762_v30 = vmul.f32 %v6169_v12, %v7362_v14  ;;  %5168 = vst [vmem:[%s7143_s29 + $0x68] sm:$0xff] %v1780_v56   ;;  %v6171_v9 = vpop.eup %6170 }
 0x61d   : > { %5593 = vmatpush3.bf16.xpose.msra.mxu0 %v2063_v59  ;;  %v1782_v38 = vpack.c.bf16 %v1774_v62, %v1772_v19  ;;  %v1768_v16 = vmul.f32 %v6171_v9, %v7354_v54  ;;  %v8986_v19 = vld [vmem:[#allocation20_spill] sm:$0xff] }
 0x61e   : > { %v1779_v42 = vpack.c.bf16 %v1762_v30, %v1760_v7 }
 0x61f   : > { %v6173_v32 = vpop.eup %6172  ;;  %v1994_v46 = vpop.permute.xlu0 %1993  ;;  %5170 = vst [vmem:[%s7143_s29 + $0x78] sm:$0xff] %v1782_v38  }
 0x620   : > { %5570 = vmatprep.mubr.bf16.mxu0 %v1779_v42  ;;  %5167 = vst [vmem:[%s7143_s29 + $0x60] sm:$0xff] %v1779_v42   ;;  %v1992_v27 = vpop.permute.xlu1 %1991  ;;  %v1770_v11 = vmul.f32 %v6173_v32, %v7366_v22 }
 0x621   : > { %5571 = vmatmul.mubr.bf16.gmra.mrb[56].mxu0 %v1780_v56 }
 0x622   : > { %v1781_v24 = vpack.c.bf16 %v1770_v11, %v1768_v16 }
 0x623   : > { %v1998_v10 = vpop.permute.xlu0 %1997 }
 0x624   : > { %5574 = vmatprep.mubr.bf16.mxu0 %v1781_v24  ;;  %5169 = vst [vmem:[%s7143_s29 + $0x70] sm:$0xff] %v1781_v24   ;;  %v1996_v14 = vpop.permute.xlu1 %1995 }
 0x627   : > { %v2331_v34 = vpop.permute.xlu0 %2330 }
 0x628   : > { %5610 = vmatprep.subr.bf16.mxu1 %v2331_v34  ;;  %v2000_v57 = vpop.permute.xlu1 %1999 }
 0x629   : > { %5575 = vmatmul.mubr.bf16.gmra.mrb[60].mxu0 %v1782_v38  ;;  %5611 = vmatpush3.bf16.msra.mxu1 %v2331_v34 }
 0x62a   : > { %5594 = vmatprep.mubr.msk.bf16.mxu0 %vm8947_vm0, %v1986_v0 }
 0x62b   : > { %v2335_v26 = vpop.permute.xlu0 %2334 }
 0x62c   : > { %v2333_v29 = vpop.permute.xlu1 %2332 }
 0x62d   : > { %5612 = vmatprep.subr.bf16.mxu1 %v2333_v29 }
 0x62e   : > { %5613 = vmatpush3.bf16.msra.mxu1 %v2333_v29 }
 0x62f   : > { %5614 = vmatprep.subr.bf16.mxu1 %v2335_v26  ;;  %v2339_v22 = vpop.permute.xlu0 %2338 }
 0x630   : > { %v2337_v54 = vpop.permute.xlu1 %2336 }
 0x631   : > { %5595 = vmatmul.mubr.msk.bf16.vlgmr.msra.gmra.mrb[64].mxu0 %vm8960_vm2, %v1988_v6  ;;  %vm8966_vm2 = vmmov %vm8947_vm0 }
 0x632   : > { %5598 = vmatprep.mubr.msk.bf16.mxu0 %vm8961_vm7, %v1990_v17  ;;  %5615 = vmatpush3.bf16.msra.mxu1 %v2335_v26 }
 0x633   : > { %5616 = vmatprep.subr.bf16.mxu1 %v2337_v54  ;;  %v2343_v20 = vpop.permute.xlu0 %2342 }
 0x634   : > { %v2341_v35 = vpop.permute.xlu1 %2340 }
 0x636   : > { %5617 = vmatpush3.bf16.msra.mxu1 %v2337_v54 }
 0x637   : > { %5618 = vmatprep.subr.bf16.mxu1 %v2339_v22  ;;  %v7460_v40 = vpop.permute.xlu0 %2540 }
 0x638   : > { %v2345_v25 = vpop.permute.xlu1 %2344 }
 0x639   : > { %5599 = vmatmul.mubr.msk.bf16.gmra.mrb[68].mxu0 %vm8962_vm1, %v1992_v27  ;;  %vm8987_vm1 = vnez %v8986_v19 }
 0x63a   : > { %5602 = vmatprep.mubr.msk.bf16.mxu0 %vm8963_vm12, %v1994_v46  ;;  %5619 = vmatpush3.bf16.msra.mxu1 %v2339_v22  ;;  %vm8989_vm12 = vnez %v8988_v49 }
 0x63b   : > { %5620 = vmatprep.subr.bf16.mxu1 %v2341_v35 }
 0x63e   : > { %5621 = vmatpush3.bf16.msra.mxu1 %v2341_v35 }
 0x63f   : > { %5622 = vmatprep.subr.bf16.mxu1 %v2343_v20 }
 0x641   : > { %5603 = vmatmul.mubr.msk.bf16.gmra.mrb[72].mxu0 %vm8964_vm11, %v1996_v14 }
 0x642   : > { %5606 = vmatprep.mubr.msk.bf16.mxu0 %vm8965_vm6, %v1998_v10  ;;  %5623 = vmatpush3.bf16.msra.mxu1 %v2343_v20 }
 0x643   : > { %5624 = vmatprep.subr.bf16.mxu1 %v2345_v25 }
 0x646   : > { %5625 = vmatpush3.bf16.msra.mxu1 %v2345_v25 }
 0x647   : > { %5778 = vmatprep.subr.msk.bf16.mxu1 %vm8947_vm0, %v7460_v40 }
 0x649   : > { %5607 = vmatmul.mubr.msk.bf16.gmra.mrb[76].mxu0 %vm8966_vm2, %v2000_v57 }
 0x6ae   : > { %v7465_v60 = vpop.f32.mrb[48].mxu0 }
 0x6af   : > { %8967 = vst [vmem:[#allocation16_spill] sm:$0xff] %v7465_v60  ;;  %v7467_v0 = vpop.f32.mrb[49].mxu0 }
 0x6b0   : > { %8968 = vst [vmem:[#allocation39_spill] sm:$0xff] %v7467_v0  ;;  %v7469_v37 = vpop.f32.mrb[50].mxu0 }
 0x6b1   : > { %8969 = vst [vmem:[#allocation40_spill] sm:$0xff] %v7469_v37  ;;  %v7473_v50 = vpop.f32.mrb[51].mxu0 }
 0x6b2   : > { %8970 = vst [vmem:[#allocation41_spill] sm:$0xff] %v7473_v50 }
 0x6e6   : > { %v7477_v58 = vpop.f32.mrb[52].mxu0 }
 0x6e7   : > { %8971 = vst [vmem:[#allocation42_spill] sm:$0xff] %v7477_v58  ;;  %v7479_v45 = vpop.f32.mrb[53].mxu0 }
 0x6e8   : > { %8972 = vst [vmem:[#allocation43_spill] sm:$0xff] %v7479_v45  ;;  %v7481_v56 = vpop.f32.mrb[54].mxu0 }
 0x6e9   : > { %8973 = vst [vmem:[#allocation44_spill] sm:$0xff] %v7481_v56  ;;  %v7485_v17 = vpop.f32.mrb[55].mxu0 }
 0x6ea   : > { %8974 = vst [vmem:[#allocation45_spill] sm:$0xff] %v7485_v17 }
 0x6f4   : > { %v7489_v62 = vpop.f32.mrb[56].mxu0 }
 0x6f5   : > { %8975 = vst [vmem:[#allocation46_spill] sm:$0xff] %v7489_v62  ;;  %v7491_v6 = vpop.f32.mrb[57].mxu0 }
 0x6f6   : > { %8976 = vst [vmem:[#allocation47_spill] sm:$0xff] %v7491_v6  ;;  %v7493_v59 = vpop.f32.mrb[58].mxu0  ;;  %v8995_v6 = vld [vmem:[#allocation6_spill] sm:$0xff] }
 0x6f7   : > { %8977 = vst [vmem:[#allocation48_spill] sm:$0xff] %v7493_v59  ;;  %v7497_v30 = vpop.f32.mrb[59].mxu0 }
 0x6f8   : > { %8978 = vst [vmem:[#allocation49_spill] sm:$0xff] %v7497_v30  ;;  %v8996_v30 = vld [vmem:[#allocation14_spill] sm:$0xff] }
 0x6f9   : > { %vm8997_vm0 = vnez %v8996_v30 }
 0x6fc   : > { %v7501_v38 = vpop.f32.mrb[60].mxu0 }
 0x6fd   : > { %8979 = vst [vmem:[#allocation50_spill] sm:$0xff] %v7501_v38  ;;  %v7503_v42 = vpop.f32.mrb[61].mxu0 }
 0x6fe   : > { %8980 = vst [vmem:[#allocation51_spill] sm:$0xff] %v7503_v42  ;;  %v7505_v32 = vpop.f32.mrb[62].mxu0 }
 0x6ff   : > { %8981 = vst [vmem:[#allocation52_spill] sm:$0xff] %v7505_v32  ;;  %v7509_v27 = vpop.f32.mrb[63].mxu0 }
 0x700   : > { %8982 = vst [vmem:[#allocation53_spill] sm:$0xff] %v7509_v27 }
 0x704   : > { %v5596_v11 = vpop.f32.mrb[64].mxu0 }
 0x705   : > { %v2164_v24 = vsel %vm6836_vm9, -1e+09, %v5596_v11  ;;  %v2099_v10 = vpop.f32.mrb[65].mxu0 }
 0x706   : > { %2182 = vmax.xlane.f32.xlu0 %v2164_v24  ;;  %v5597_v14 = vpop.f32.mrb[66].mxu0  ;;  %v2162_v29 = vsel %vm6842_vm10, -1e+09, %v2099_v10 }
 0x707   : > { %v2102_v34 = vpop.f32.mrb[67].mxu0  ;;  %v2165_v54 = vsel %vm6861_vm13, -1e+09, %v5597_v14 }
 0x708   : > { %v2163_v57 = vsel %vm6868_vm14, -1e+09, %v2102_v34 }
 0x709   : > { %2180 = vmax.xlane.f32.xlu1 %v2163_v57 }
 0x70a   : > { %2178 = vmax.xlane.f32.xlu0 %v2162_v29 }
 0x70c   : > { %v5600_v26 = vpop.f32.mrb[68].mxu0 }
 0x70d   : > { %v2115_v22 = vpop.f32.mrb[69].mxu0  ;;  %v7528_v11 = vsel %vm6887_vm3, -1e+09, %v5600_v26 }
 0x70e   : > { %2184 = vmax.xlane.f32.xlu0 %v2165_v54  ;;  %v5601_v35 = vpop.f32.mrb[70].mxu0  ;;  %v7538_v34 = vsel %vm8927_vm4, -1e+09, %v2115_v22 }
 0x70f   : > { %v7523_v20 = vsel %vm6895_vm5, -1e+09, %v5601_v35  ;;  %v2118_v25 = vpop.f32.mrb[71].mxu0 }
 0x710   : > { %2192 = vmax.xlane.f32.xlu1 %v7523_v20  ;;  %v7533_v10 = vsel %vm6921_vm15, -1e+09, %v2118_v25  ;;  %v8984_v25 = vld [vmem:[#allocation17_spill] sm:$0xff] }
 0x711   : > { %vm8985_vm7 = vnez %v8984_v25 }
 0x712   : > { %2190 = vmax.xlane.f32.xlu0 %v7528_v11 }
 0x714   : > { %2188 = vmax.xlane.f32.xlu1 %v7533_v10  ;;  %v5604_v14 = vpop.f32.mrb[72].mxu0 }
 0x715   : > { %v2131_v35 = vpop.f32.mrb[73].mxu0  ;;  %v7548_v7 = vsel %vm8985_vm7, -1e+09, %v5604_v14  ;;  %v8990_v14 = vld [vmem:[#allocation21_spill] sm:$0xff] }
 0x716   : > { %2186 = vmax.xlane.f32.xlu0 %v7538_v34  ;;  %v5605_v16 = vpop.f32.mrb[74].mxu0  ;;  %vm8991_vm11 = vnez %v8990_v14 }
 0x717   : > { %v7543_v26 = vsel %vm6947_vm8, -1e+09, %v5605_v16  ;;  %v2134_v9 = vpop.f32.mrb[75].mxu0  ;;  %v7558_v16 = vsel %vm8989_vm12, -1e+09, %v2131_v35  ;;  %v8994_v35 = vld [vmem:[#allocation7_spill] sm:$0xff] }
 0x718   : > { %2200 = vmax.xlane.f32.xlu1 %v7543_v26  ;;  %v7553_v22 = vsel %vm8987_vm1, -1e+09, %v2134_v9  ;;  %v8992_v9 = vld [vmem:[#allocation22_spill] sm:$0xff] }
 0x719   : > { %vm8993_vm6 = vnez %v8992_v9 }
 0x71a   : > { %2198 = vmax.xlane.f32.xlu0 %v7548_v7 }
 0x71c   : > { %2196 = vmax.xlane.f32.xlu1 %v7553_v22  ;;  %v5608_v12 = vpop.f32.mrb[76].mxu0 }
 0x71d   : > { %v2147_v13 = vpop.f32.mrb[77].mxu0  ;;  %v7563_v38 = vsel %vm8991_vm11, -1e+09, %v5608_v12  ;;  %v8998_v12 = vld [vmem:[#allocation15_spill] sm:$0xff] }
 0x71e   : > { %2194 = vmax.xlane.f32.xlu0 %v7558_v16  ;;  %v5609_v42 = vpop.f32.mrb[78].mxu0  ;;  %v7568_v32 = vsel %vm8993_vm6, -1e+09, %v2147_v13  ;;  %vm8999_vm2 = vnez %v8998_v12  ;;  %v7585_v13 = vpop.permute.xlu1 %2542 }
 0x71f   : > { %v2150_v27 = vpop.f32.mrb[79].mxu0  ;;  %v7577_v62 = vsel %vm8997_vm0, -1e+09, %v5609_v42 }
 0x720   : > { %v7582_v59 = vsel %vm8999_vm2, -1e+09, %v2150_v27  ;;  %vm9002_vm2 = vcmask 261120  }
 0x721   : > { %vm9003_vm0 = vmmov %vm9002_vm2 }
 0x722   : > { %2206 = vmax.xlane.f32.xlu0 %v7563_v38  ;;  %vm9004_vm6 = vmmov %vm9003_vm0 }
 0x723   : > { %vm9005_vm11 = vmmov %vm9003_vm0 }
 0x724   : > { %vm9006_vm12 = vmmov %vm9003_vm0 }
 0x725   : > { %vm9007_vm1 = vmmov %vm9003_vm0 }
 0x726   : > { %2202 = vmax.xlane.f32.xlu0 %v7568_v32  ;;  %vm9008_vm7 = vmmov %vm9003_vm0 }
 0x72d   : > { %2546 = vrot.lane.b32.xlu1 %v8994_v35, %s8831_s12 }
 0x73c   : > { %2544 = vrot.lane.b32.xlu0 %v8995_v6, %s8831_s12 }
 0x751   : > { %2208 = vmax.xlane.f32.xlu1 %v7577_v62 }
 0x755   : > { %2204 = vmax.xlane.f32.xlu1 %v7582_v59 }
 0x793   : > { %v2183_v45 = vpop.xlane.xlu0 %2182 }
 0x794   : > { %v2212_v17 = vsub.f32 %v2164_v24, %v2183_v45 }
 0x796   : > { %v2230_v35 = vmul.f32 1.442695, %v2212_v17  ;;  %v2181_v58 = vpop.xlane.xlu1 %2180 }
 0x797   : > { %v2211_v56 = vsub.f32 %v2163_v57, %v2181_v58  ;;  %v2179_v6 = vpop.xlane.xlu0 %2178 }
 0x798   : > { %6174 = vpow2.f32 %v2230_v35  ;;  %v2210_v0 = vsub.f32 %v2162_v29, %v2179_v6 }
 0x799   : > { %v2228_v42 = vmul.f32 1.442695, %v2211_v56 }
 0x79a   : > { %v2226_v50 = vmul.f32 1.442695, %v2210_v0 }
 0x79b   : > { %6176 = vpow2.f32 %v2228_v42  ;;  %v2185_v60 = vpop.xlane.xlu0 %2184 }
 0x79c   : > { %6178 = vpow2.f32 %v2226_v50  ;;  %v2213_v37 = vsub.f32 %v2165_v54, %v2185_v60  ;;  %v9000_v60 = vld [vmem:[#allocation13_spill] sm:$0xff] }
 0x79d   : > { %v2193_v56 = vpop.xlane.xlu1 %2192 }
 0x79e   : > { %v2232_v27 = vmul.f32 1.442695, %v2213_v37  ;;  %v9001_v37 = vld [vmem:[#allocation10_spill] sm:$0xff]  ;;  %v2217_v12 = vsub.f32 %v7523_v20, %v2193_v56 }
 0x79f   : > { %v2191_v0 = vpop.xlane.xlu0 %2190 }
 0x7a0   : > { %6180 = vpow2.f32 %v2232_v27  ;;  %v2216_v24 = vsub.f32 %v7528_v11, %v2191_v0  ;;  %v2240_v18 = vmul.f32 1.442695, %v2217_v12 }
 0x7a1   : > { %v2189_v57 = vpop.xlane.xlu1 %2188 }
 0x7a2   : > { %v7587_v31 = vpop.eup %6174  ;;  %v2238_v54 = vmul.f32 1.442695, %v2216_v24  ;;  %v2215_v6 = vsub.f32 %v7533_v10, %v2189_v57 }
 0x7a3   : > { %2262 = vadd.xlane.f32.xlu1 %v7587_v31  ;;  %v2187_v50 = vpop.xlane.xlu0 %2186 }
 0x7a4   : > { %v2214_v35 = vsub.f32 %v7538_v34, %v2187_v50  ;;  %6182 = vpow2.f32 %v2238_v54  ;;  %v2236_v30 = vmul.f32 1.442695, %v2215_v6 }
 0x7a5   : > { %v7590_v28 = vpop.eup %6176  ;;  %v2201_v42 = vpop.xlane.xlu1 %2200 }
 0x7a6   : > { %v7592_v45 = vpop.eup %6178  ;;  %2260 = vadd.xlane.f32.xlu0 %v7590_v28  ;;  %v2221_v20 = vsub.f32 %v7543_v26, %v2201_v42 }
 0x7a7   : > { %2258 = vadd.xlane.f32.xlu1 %v7592_v45  ;;  %v2199_v17 = vpop.xlane.xlu0 %2198 }
 0x7a9   : > { %v2197_v15 = vpop.xlane.xlu1 %2196 }
 0x7aa   : > { %v7596_v58 = vpop.eup %6180 }
 0x7ab   : > { %2264 = vadd.xlane.f32.xlu1 %v7596_v58  ;;  %v2195_v29 = vpop.xlane.xlu0 %2194 }
 0x7ac   : > { %v2218_v34 = vsub.f32 %v7558_v16, %v2195_v29  ;;  %v2219_v16 = vsub.f32 %v7553_v22, %v2197_v15 }
 0x7ae   : > { %v2242_v56 = vmul.f32 1.442695, %v2218_v34  ;;  %v7612_v57 = vpop.eup %6182  ;;  %v2581_v34 = vsel %vm9002_vm2, %v7460_v40, 0  ;;  %vm9009_vm2 = vmmov %vm9003_vm0 }
 0x7af   : > { %v2207_v27 = vpop.xlane.xlu0 %2206 }
 0x7b0   : > { %v2224_v11 = vsub.f32 %v7563_v38, %v2207_v27  ;;  %v2248_v38 = vmul.f32 1.442695, %v2221_v20 }
 0x7b2   : > { %v2254_v10 = vmul.f32 1.442695, %v2224_v11 }
 0x7b3   : > { %v2203_v50 = vpop.xlane.xlu0 %2202 }
 0x7b4   : > { %v2222_v24 = vsub.f32 %v7568_v32, %v2203_v50 }
 0x7bc   : > { %2550 = vrot.lane.b32.xlu1 %v9000_v60, %s8831_s12  ;;  %2548 = vrot.lane.b32.xlu0 %v9001_v37, %s8831_s12  ;;  %v2234_v60 = vmul.f32 1.442695, %v2214_v35  ;;  %v2220_v37 = vsub.f32 %v7548_v7, %v2199_v17  ;;  %v7614_v7 = vpop.permute.xlu1 %2546  ;;  %v2244_v17 = vmul.f32 1.442695, %v2219_v16 }
 0x7be   : > { %6184 = vpow2.f32 %v2234_v60  ;;  %v2246_v0 = vmul.f32 1.442695, %v2220_v37 }
 0x7bf   : > { %6186 = vpow2.f32 %v2236_v30  ;;  %v2250_v30 = vmul.f32 1.442695, %v2222_v24 }
 0x7c0   : > { %6188 = vpow2.f32 %v2240_v18 }
 0x7c1   : > { %6190 = vpow2.f32 %v2246_v0 }
 0x7c2   : > { %6192 = vpow2.f32 %v2254_v10 }
 0x7c3   : > { %6194 = vpow2.f32 %v2242_v56 }
 0x7c4   : > { %6196 = vpow2.f32 %v2250_v30 }
 0x7c5   : > { %6198 = vpow2.f32 %v2248_v38 }
 0x7c8   : > { %v7618_v18 = vpop.eup %6184 }
 0x7c9   : > { %v7620_v32 = vpop.eup %6186 }
 0x7ca   : > { %v7625_v54 = vpop.eup %6188 }
 0x7cb   : > { %v7627_v15 = vpop.eup %6190 }
 0x7cc   : > { %v7632_v6 = vpop.eup %6192 }
 0x7cd   : > { %v7634_v42 = vpop.eup %6194 }
 0x7ce   : > { %v7638_v27 = vpop.eup %6196 }
 0x7cf   : > { %v7640_v60 = vpop.eup %6198 }
 0x7db   : > { %2270 = vadd.xlane.f32.xlu0 %v7612_v57 }
 0x7de   : > { %v2209_v12 = vpop.xlane.xlu1 %2208 }
 0x7df   : > { %v2225_v26 = vsub.f32 %v7577_v62, %v2209_v12  ;;  %2266 = vadd.xlane.f32.xlu0 %v7618_v18 }
 0x7e0   : > { %2268 = vadd.xlane.f32.xlu1 %v7620_v32 }
 0x7e1   : > { %v2256_v29 = vmul.f32 1.442695, %v2225_v26 }
 0x7e2   : > { %v2205_v35 = vpop.xlane.xlu1 %2204 }
 0x7e3   : > { %6200 = vpow2.f32 %v2256_v29  ;;  %v2223_v22 = vsub.f32 %v7582_v59, %v2205_v35  ;;  %2272 = vadd.xlane.f32.xlu0 %v7625_v54 }
 0x7e4   : > { %2278 = vadd.xlane.f32.xlu1 %v7627_v15  ;;  %6202 = vpow2.f32 %v2244_v17 }
 0x7e5   : > { %v2252_v62 = vmul.f32 1.442695, %v2223_v22 }
 0x7e7   : > { %2286 = vadd.xlane.f32.xlu0 %v7632_v6  ;;  %6204 = vpow2.f32 %v2252_v62 }
 0x7e8   : > { %2274 = vadd.xlane.f32.xlu1 %v7634_v42 }
 0x7eb   : > { %2282 = vadd.xlane.f32.xlu0 %v7638_v27 }
 0x7ec   : > { %2280 = vadd.xlane.f32.xlu1 %v7640_v60 }
 0x7ed   : > { %v7644_v59 = vpop.eup %6200 }
 0x7ee   : > { %v7646_v37 = vpop.eup %6202 }
 0x7ef   : > { %2288 = vadd.xlane.f32.xlu0 %v7644_v59 }
 0x7f0   : > { %2276 = vadd.xlane.f32.xlu1 %v7646_v37 }
 0x7f1   : > { %v7650_v11 = vpop.eup %6204 }
 0x7f4   : > { %2284 = vadd.xlane.f32.xlu1 %v7650_v11 }
 0x805   : > { %2552 = vrot.lane.b32.xlu0 %v6746_v48, %s8831_s12  ;;  %2554 = vrot.lane.b32.xlu1 %v6752_v61, %s8831_s12 }
 0x809   : > { %2524 = vrot.lane.b32.xlu0 %v6654_v39, %s8831_s12  ;;  %2526 = vrot.lane.b32.xlu1 %v6761_v63, %s8831_s12  ;;  %v2545_v39 = vpop.permute.xlu0 %2544 }
 0x80d   : > { %2528 = vrot.lane.b32.xlu0 %v6766_v3, %s8831_s12  ;;  %2530 = vrot.lane.b32.xlu1 %v6775_v4, %s8831_s12 }
 0x811   : > { %2532 = vrot.lane.b32.xlu0 %v6777_v41, %s8831_s12  ;;  %2534 = vrot.lane.b32.xlu1 %v6783_v43, %s8831_s12 }
 0x815   : > { %2536 = vrot.lane.b32.xlu0 %v6785_v44, %s8831_s12  ;;  %2538 = vrot.lane.b32.xlu1 %v6791_v51, %s8831_s12 }
 0x819   : > { %2869 = vrot.lane.b32.xlu0 %v6682_v55, %s8831_s12  ;;  %2871 = vrot.lane.b32.xlu1 %v6680_v52, %s8831_s12 }
 0x81d   : > { %2873 = vrot.lane.b32.xlu0 %v6702_v5, %s8831_s12 }
 0x821   : > { %2875 = vrot.lane.b32.xlu0 %v6699_v1, %s8831_s12 }
 0x830   : > { %v2263_v48 = vpop.xlane.xlu1 %2262 }
 0x833   : > { %v2261_v61 = vpop.xlane.xlu0 %2260 }
 0x834   : > { %6206 = vrcp.f32 %v2261_v61  ;;  %v2259_v63 = vpop.xlane.xlu1 %2258 }
 0x835   : > { %6208 = vrcp.f32 %v2259_v63 }
 0x836   : > { %6210 = vrcp.f32 %v2263_v48 }
 0x837   : > { %v2549_v40 = vpop.permute.xlu0 %2548 }
 0x838   : > { %v2265_v3 = vpop.xlane.xlu1 %2264  ;;  %v2593_v50 = vsel %vm9003_vm0, %v2549_v40, 0 }
 0x839   : > { %6212 = vrcp.f32 %v2265_v3 }
 0x83e   : > { %v6207_v55 = vpop.eup %6206 }
 0x83f   : > { %v6209_v4 = vpop.eup %6208  ;;  %v2293_v52 = vmul.f32 %v6207_v55, %v7590_v28  ;;  %v2584_v28 = vsel %vm9004_vm6, %v7585_v13, 0  ;;  %vm9010_vm6 = vmmov %vm9003_vm0 }
 0x840   : > { %v2291_v5 = vmul.f32 %v6209_v4, %v7592_v45  ;;  %v6211_v41 = vpop.eup %6210  ;;  %v2590_v45 = vsel %vm9008_vm7, %v7614_v7, 0  ;;  %vm9012_vm7 = vmmov %vm9003_vm0 }
 0x841   : > { %v2295_v44 = vmul.f32 %v6211_v41, %v7587_v31  ;;  %v2587_v31 = vsel %vm9006_vm12, %v2545_v39, 0  ;;  %vm9013_vm12 = vmmov %vm9003_vm0 }
 0x842   : > { %v2322_v43 = vpack.c.bf16 %v2293_v52, %v2291_v5 }
 0x843   : > { %v6213_v1 = vpop.eup %6212 }
 0x844   : > { %v2297_v51 = vmul.f32 %v6213_v1, %v7596_v58  ;;  %5626 = vmatprep.mubr.bf16.mxu1 %v2322_v43  ;;  %5171 = vst [vmem:[%s7143_s29 + $0x80] sm:$0xff] %v2322_v43  }
 0x846   : > { %v2323_v0 = vpack.c.bf16 %v2297_v51, %v2295_v44 }
 0x848   : > { %5627 = vmatmul.mubr.bf16.vlgmr.msra.gmra.mrb[48].mxu1 %v2323_v0  ;;  %5172 = vst [vmem:[%s7143_s29 + $0x88] sm:$0xff] %v2323_v0  }
 0x849   : > { %5643 = vmatpush3.bf16.xpose.msra.mxu1 %v2581_v34 }
 0x84a   : > { %5779 = vmatprep.subr.msk.bf16.mxu1 %vm9003_vm0, %v7585_v13  ;;  %v2551_v13 = vpop.permute.xlu1 %2550 }
 0x851   : > { %5645 = vmatpush3.bf16.xpose.msra.mxu1 %v2584_v28 }
 0x852   : > { %5780 = vmatprep.subr.msk.bf16.mxu1 %vm9005_vm11, %v2545_v39  ;;  %vm9014_vm11 = vmmov %vm9003_vm0 }
 0x859   : > { %5647 = vmatpush3.bf16.xpose.msra.mxu1 %v2587_v31 }
 0x85a   : > { %5781 = vmatprep.subr.msk.bf16.mxu1 %vm9007_vm1, %v7614_v7  ;;  %vm9011_vm1 = vmmov %vm9003_vm0 }
 0x85b   : > { %v2596_v56 = vsel %vm9011_vm1, %v2551_v13, 0  ;;  %vm9017_vm1 = vmmov %vm9003_vm0 }
 0x861   : > { %5649 = vmatpush3.bf16.xpose.msra.mxu1 %v2590_v45 }
 0x862   : > { %5782 = vmatprep.subr.msk.bf16.mxu1 %vm9009_vm2, %v2549_v40  ;;  %vm9015_vm2 = vmmov %vm9003_vm0 }
 0x868   : > { %v2271_v58 = vpop.xlane.xlu0 %2270 }
 0x869   : > { %5651 = vmatpush3.bf16.xpose.msra.mxu1 %v2593_v50 }
 0x86a   : > { %5783 = vmatprep.subr.msk.bf16.mxu1 %vm9010_vm6, %v2551_v13  ;;  %vm9016_vm6 = vmmov %vm9003_vm0 }
 0x86c   : > { %v2267_v10 = vpop.xlane.xlu0 %2266 }
 0x86d   : > { %6214 = vrcp.f32 %v2267_v10  ;;  %v2269_v24 = vpop.xlane.xlu1 %2268 }
 0x86e   : > { %6216 = vrcp.f32 %v2269_v24 }
 0x86f   : > { %6218 = vrcp.f32 %v2271_v58 }
 0x870   : > { %v2273_v20 = vpop.xlane.xlu0 %2272 }
 0x871   : > { %6220 = vrcp.f32 %v2273_v20  ;;  %5653 = vmatpush3.bf16.xpose.msra.mxu1 %v2596_v56  ;;  %v2279_v7 = vpop.xlane.xlu1 %2278 }
 0x872   : > { %6222 = vrcp.f32 %v2279_v7 }
 0x874   : > { %v2287_v30 = vpop.xlane.xlu0 %2286 }
 0x875   : > { %v2275_v38 = vpop.xlane.xlu1 %2274 }
 0x877   : > { %v6215_v16 = vpop.eup %6214 }
 0x878   : > { %v6217_v12 = vpop.eup %6216  ;;  %v2283_v26 = vpop.xlane.xlu0 %2282  ;;  %v2299_v17 = vmul.f32 %v6215_v16, %v7618_v18 }
 0x879   : > { %v6219_v29 = vpop.eup %6218  ;;  %v2281_v35 = vpop.xlane.xlu1 %2280  ;;  %v2301_v22 = vmul.f32 %v6217_v12, %v7620_v32 }
 0x87a   : > { %6224 = vrcp.f32 %v2281_v35  ;;  %v2303_v61 = vmul.f32 %v6219_v29, %v7612_v57 }
 0x87b   : > { %v6221_v62 = vpop.eup %6220  ;;  %6226 = vrcp.f32 %v2287_v30  ;;  %v2324_v39 = vpack.c.bf16 %v2301_v22, %v2299_v17 }
 0x87c   : > { %6228 = vrcp.f32 %v2275_v38  ;;  %v2289_v48 = vpop.xlane.xlu0 %2288  ;;  %v2305_v63 = vmul.f32 %v6221_v62, %v7625_v54  ;;  %v6223_v52 = vpop.eup %6222 }
 0x87d   : > { %6230 = vrcp.f32 %v2289_v48  ;;  %5630 = vmatprep.mubr.bf16.mxu1 %v2324_v39  ;;  %5173 = vst [vmem:[%s7143_s29 + $0x90] sm:$0xff] %v2324_v39   ;;  %v2277_v3 = vpop.xlane.xlu1 %2276  ;;  %v2311_v43 = vmul.f32 %v6223_v52, %v7627_v15 }
 0x87e   : > { %6232 = vrcp.f32 %v2277_v3  ;;  %v2325_v18 = vpack.c.bf16 %v2305_v63, %v2303_v61 }
 0x87f   : > { %6234 = vrcp.f32 %v2283_v26 }
 0x880   : > { %v2553_v55 = vpop.permute.xlu0 %2552  ;;  %5631 = vmatmul.mubr.bf16.gmra.mrb[52].mxu1 %v2325_v18  ;;  %5174 = vst [vmem:[%s7143_s29 + $0x98] sm:$0xff] %v2325_v18  }
 0x881   : > { %5784 = vmatprep.subr.msk.bf16.mxu1 %vm9012_vm7, %v2553_v55  ;;  %v2285_v32 = vpop.xlane.xlu1 %2284  ;;  %v2599_v4 = vsel %vm9013_vm12, %v2553_v55, 0  ;;  %vm9018_vm7 = vmmov %vm9003_vm0 }
 0x882   : > { %6236 = vrcp.f32 %v2285_v32  ;;  %5655 = vmatpush3.bf16.xpose.msra.mxu1 %v2599_v4  ;;  %vm9019_vm12 = vmmov %vm9003_vm0 }
 0x884   : > { %v6225_v57 = vpop.eup %6224  ;;  %v2525_v54 = vpop.permute.xlu0 %2524 }
 0x885   : > { %v6227_v5 = vpop.eup %6226  ;;  %v2555_v41 = vpop.permute.xlu1 %2554  ;;  %v2313_v1 = vmul.f32 %v6225_v57, %v7640_v60 }
 0x886   : > { %v6229_v44 = vpop.eup %6228  ;;  %5785 = vmatprep.subr.msk.bf16.mxu1 %vm9014_vm11, %v2555_v41  ;;  %v2319_v31 = vmul.f32 %v6227_v5, %v7632_v6  ;;  %v2602_v58 = vsel %vm9015_vm2, %v2555_v41, 0  ;;  %vm9020_vm11 = vmmov %vm9003_vm0 }
 0x887   : > { %v6231_v51 = vpop.eup %6230  ;;  %v2327_v0 = vpack.c.bf16 %v2313_v1, %v2311_v43  ;;  %v2307_v15 = vmul.f32 %v6229_v44, %v7634_v42  ;;  %vm9021_vm2 = vmmov %vm9003_vm0 }
 0x888   : > { %v6233_v34 = vpop.eup %6232  ;;  %v2529_v28 = vpop.permute.xlu0 %2528  ;;  %v2321_v45 = vmul.f32 %v6231_v51, %v7644_v59 }
 0x889   : > { %v2527_v40 = vpop.permute.xlu1 %2526  ;;  %v2309_v60 = vmul.f32 %v6233_v34, %v7646_v37  ;;  %5176 = vst [vmem:[%s7143_s29 + $0xa8] sm:$0xff] %v2327_v0   ;;  %v6235_v50 = vpop.eup %6234 }
 0x88a   : > { %5657 = vmatpush3.bf16.xpose.msra.mxu1 %v2602_v58  ;;  %v2329_v13 = vpack.c.bf16 %v2321_v45, %v2319_v31  ;;  %v2315_v59 = vmul.f32 %v6235_v50, %v7638_v27 }
 0x88b   : > { %v2326_v10 = vpack.c.bf16 %v2309_v60, %v2307_v15 }
 0x88c   : > { %v6237_v24 = vpop.eup %6236  ;;  %v2533_v20 = vpop.permute.xlu0 %2532  ;;  %5178 = vst [vmem:[%s7143_s29 + $0xb8] sm:$0xff] %v2329_v13  }
 0x88d   : > { %5634 = vmatprep.mubr.bf16.mxu1 %v2326_v10  ;;  %5175 = vst [vmem:[%s7143_s29 + $0xa0] sm:$0xff] %v2326_v10   ;;  %v2531_v6 = vpop.permute.xlu1 %2530  ;;  %v2317_v56 = vmul.f32 %v6237_v24, %v7650_v11  ;;  %v9022_v11 = vmov 0  }
 0x88e   : > { %5635 = vmatmul.mubr.bf16.gmra.mrb[56].mxu1 %v2327_v0 }
 0x88f   : > { %v2328_v42 = vpack.c.bf16 %v2317_v56, %v2315_v59 }
 0x890   : > { %v2537_v7 = vpop.permute.xlu0 %2536 }
 0x891   : > { %5638 = vmatprep.mubr.bf16.mxu1 %v2328_v42  ;;  %5177 = vst [vmem:[%s7143_s29 + $0xb0] sm:$0xff] %v2328_v42   ;;  %v2535_v37 = vpop.permute.xlu1 %2534 }
 0x894   : > { %v2870_v30 = vpop.permute.xlu0 %2869 }
 0x895   : > { %5674 = vmatprep.subr.bf16.mxu0 %v2870_v30  ;;  %v2539_v38 = vpop.permute.xlu1 %2538 }
 0x896   : > { %5639 = vmatmul.mubr.bf16.gmra.mrb[60].mxu1 %v2329_v13  ;;  %5675 = vmatpush3.bf16.msra.mxu0 %v2870_v30  ;;  %v9030_v30 = vld [vmem:[#allocation14_spill] sm:$0xff] }
 0x897   : > { %5658 = vmatprep.mubr.msk.bf16.mxu1 %vm9003_vm0, %v2525_v54 }
 0x898   : > { %v2874_v16 = vpop.permute.xlu0 %2873 }
 0x899   : > { %v2872_v12 = vpop.permute.xlu1 %2871 }
 0x89a   : > { %5676 = vmatprep.subr.bf16.mxu0 %v2872_v12 }
 0x89b   : > { %5677 = vmatpush3.bf16.msra.mxu0 %v2872_v12 }
 0x89c   : > { %5678 = vmatprep.subr.bf16.mxu0 %v2874_v16  ;;  %v2876_v27 = vpop.permute.xlu0 %2875 }
 0x89e   : > { %5659 = vmatmul.mubr.msk.bf16.vlgmr.msra.gmra.mrb[64].mxu1 %vm9016_vm6, %v2527_v40  ;;  %vm3271_vm6 = vcmask 523264  }
 0x89f   : > { %5662 = vmatprep.mubr.msk.bf16.mxu1 %vm9017_vm1, %v2529_v28  ;;  %5679 = vmatpush3.bf16.msra.mxu0 %v2874_v16  ;;  %vm3288_vm1 = vcmask 785408  }
 0x8a0   : > { %5680 = vmatprep.subr.bf16.mxu0 %v2876_v27 }
 0x8a3   : > { %5681 = vmatpush3.bf16.msra.mxu0 %v2876_v27 }
 0x8a6   : > { %5663 = vmatmul.mubr.msk.bf16.gmra.mrb[68].mxu1 %vm9018_vm7, %v2531_v6  ;;  %vm9067_vm7 = vmmov %vm9003_vm0 }
 0x8a7   : > { %5666 = vmatprep.mubr.msk.bf16.mxu1 %vm9019_vm12, %v2533_v20  ;;  %vm9069_vm12 = vmmov %vm9003_vm0 }
 0x8ae   : > { %5667 = vmatmul.mubr.msk.bf16.gmra.mrb[72].mxu1 %vm9020_vm11, %v2535_v37  ;;  %v9029_v37 = vld [vmem:[#allocation9_spill] sm:$0xff]  ;;  %vm9071_vm11 = vmmov %vm9003_vm0 }
 0x8af   : > { %5670 = vmatprep.mubr.msk.bf16.mxu1 %vm9021_vm2, %v2537_v7  ;;  %vm9073_vm2 = vmmov %vm9003_vm0 }
 0x8b6   : > { %5671 = vmatmul.mubr.msk.bf16.gmra.mrb[76].mxu1 %vm9003_vm0, %v2539_v38 }
 0x8b7   : > { %3849 = vmatprep.mubr.bf16.mxu1 %v9022_v11 }
 0x91b   : > { %v7734_v26 = vpop.f32.mrb[48].mxu1 }
 0x91c   : > { %v7736_v17 = vpop.f32.mrb[49].mxu1 }
 0x91d   : > { %v7738_v29 = vpop.f32.mrb[50].mxu1 }
 0x91e   : > { %v5845_v35 = vpack.i.bf16 %v7738_v29, %v7734_v26  ;;  %v7742_v22 = vpop.f32.mrb[51].mxu1 }
 0x91f   : > { %v5840_v62 = vpack.i.bf16 %v7742_v22, %v7736_v17 }
 0x953   : > { %v7746_v39 = vpop.f32.mrb[52].mxu1 }
 0x954   : > { %v7748_v48 = vpop.f32.mrb[53].mxu1 }
 0x955   : > { %v7750_v61 = vpop.f32.mrb[54].mxu1 }
 0x956   : > { %v5875_v63 = vpack.i.bf16 %v7750_v61, %v7746_v39  ;;  %v7754_v3 = vpop.f32.mrb[55].mxu1 }
 0x957   : > { %v5870_v18 = vpack.i.bf16 %v7754_v3, %v7748_v48 }
 0x961   : > { %v7758_v55 = vpop.f32.mrb[56].mxu1 }
 0x962   : > { %v7760_v32 = vpop.f32.mrb[57].mxu1 }
 0x963   : > { %v7762_v4 = vpop.f32.mrb[58].mxu1 }
 0x964   : > { %v5905_v52 = vpack.i.bf16 %v7762_v4, %v7758_v55  ;;  %v7766_v57 = vpop.f32.mrb[59].mxu1  ;;  %v9057_v55 = vld [vmem:[#allocation50_spill] sm:$0xff] }
 0x965   : > { %v5900_v54 = vpack.i.bf16 %v7766_v57, %v7760_v32  ;;  %v9059_v32 = vld [vmem:[#allocation53_spill] sm:$0xff]  ;;  %v9060_v57 = vld [vmem:[#allocation51_spill] sm:$0xff] }
 0x969   : > { %v7770_v5 = vpop.f32.mrb[60].mxu1 }
 0x96a   : > { %v7772_v41 = vpop.f32.mrb[61].mxu1 }
 0x96b   : > { %v7774_v43 = vpop.f32.mrb[62].mxu1 }
 0x96c   : > { %v5935_v1 = vpack.i.bf16 %v7774_v43, %v7770_v5  ;;  %v7778_v44 = vpop.f32.mrb[63].mxu1 }
 0x96d   : > { %v5930_v51 = vpack.i.bf16 %v7778_v44, %v7772_v41  ;;  %v9064_v44 = vld [vmem:[#allocation24_spill] sm:$0xff] }
 0x971   : > { %v5660_v0 = vpop.f32.mrb[64].mxu1 }
 0x972   : > { %v2703_v34 = vsel %vm6836_vm9, -1e+09, %v5660_v0  ;;  %v2638_v28 = vpop.f32.mrb[65].mxu1  ;;  %vm9023_vm9 = vnez %v8984_v25 }
 0x973   : > { %2721 = vmax.xlane.f32.xlu0 %v2703_v34  ;;  %v5661_v31 = vpop.f32.mrb[66].mxu1  ;;  %v2701_v58 = vsel %vm6842_vm10, -1e+09, %v2638_v28  ;;  %vm9024_vm10 = vnez %v8986_v19 }
 0x974   : > { %v2641_v45 = vpop.f32.mrb[67].mxu1  ;;  %v2704_v60 = vsel %vm6861_vm13, -1e+09, %v5661_v31  ;;  %vm9025_vm13 = vnez %v8988_v49  ;;  %v9028_v49 = vld [vmem:[#allocation8_spill] sm:$0xff] }
 0x975   : > { %v2702_v40 = vsel %vm6868_vm14, -1e+09, %v2641_v45  ;;  %vm9026_vm14 = vnez %v8990_v14  ;;  %v9032_v14 = vld [vmem:[#allocation15_spill] sm:$0xff] }
 0x976   : > { %2719 = vmax.xlane.f32.xlu1 %v2702_v40 }
 0x977   : > { %2717 = vmax.xlane.f32.xlu0 %v2701_v58 }
 0x979   : > { %v5664_v15 = vpop.f32.mrb[68].mxu1 }
 0x97a   : > { %v2654_v50 = vpop.f32.mrb[69].mxu1  ;;  %v2707_v36 = vsel %vm6887_vm3, -1e+09, %v5664_v15  ;;  %vm9027_vm3 = vnez %v8992_v9 }
 0x97b   : > { %2723 = vmax.xlane.f32.xlu0 %v2704_v60  ;;  %v5665_v21 = vpop.f32.mrb[70].mxu1  ;;  %v2705_v24 = vsel %vm8927_vm4, -1e+09, %v2654_v50  ;;  %vm9065_vm4 = vmmov %vm9003_vm0 }
 0x97c   : > { %v2708_v13 = vsel %vm6895_vm5, -1e+09, %v5665_v21  ;;  %v2657_v10 = vpop.f32.mrb[71].mxu1  ;;  %vm9031_vm5 = vnez %v9030_v30 }
 0x97d   : > { %2731 = vmax.xlane.f32.xlu1 %v2708_v13  ;;  %v7796_v23 = vsel %vm6921_vm15, -1e+09, %v2657_v10  ;;  %vm9033_vm15 = vnez %v9032_v14 }
 0x97f   : > { %2729 = vmax.xlane.f32.xlu0 %v2707_v36 }
 0x981   : > { %2727 = vmax.xlane.f32.xlu1 %v7796_v23  ;;  %v5668_v33 = vpop.f32.mrb[72].mxu1 }
 0x982   : > { %v2670_v20 = vpop.f32.mrb[73].mxu1  ;;  %v7808_v8 = vsel %vm9023_vm9, -1e+09, %v5668_v33  ;;  %vm9076_vm9 = vmmov %vm9003_vm0 }
 0x983   : > { %2725 = vmax.xlane.f32.xlu0 %v2705_v24  ;;  %v5669_v53 = vpop.f32.mrb[74].mxu1  ;;  %v7818_v46 = vsel %vm9025_vm13, -1e+09, %v2670_v20  ;;  %vm9080_vm13 = vmmov %vm9003_vm0 }
 0x984   : > { %v7803_v6 = vsel %vm6947_vm8, -1e+09, %v5669_v53  ;;  %v2673_v47 = vpop.f32.mrb[75].mxu1  ;;  %vm9063_vm8 = vmmov %vm9003_vm0 }
 0x985   : > { %2739 = vmax.xlane.f32.xlu1 %v7803_v6  ;;  %v7813_v2 = vsel %vm9024_vm10, -1e+09, %v2673_v47  ;;  %vm9078_vm10 = vmmov %vm9003_vm0 }
 0x987   : > { %2737 = vmax.xlane.f32.xlu0 %v7808_v8 }
 0x989   : > { %2735 = vmax.xlane.f32.xlu1 %v7813_v2  ;;  %v5672_v59 = vpop.f32.mrb[76].mxu1 }
 0x98a   : > { %v2686_v56 = vpop.f32.mrb[77].mxu1  ;;  %v7823_v7 = vsel %vm9026_vm14, -1e+09, %v5672_v59  ;;  %vm9082_vm14 = vmmov %vm9003_vm0 }
 0x98b   : > { %2733 = vmax.xlane.f32.xlu0 %v7818_v46  ;;  %v5673_v42 = vpop.f32.mrb[78].mxu1  ;;  %v7828_v19 = vsel %vm9027_vm3, -1e+09, %v2686_v56  ;;  %vm9084_vm3 = vmmov %vm9003_vm0 }
 0x98c   : > { %v2689_v25 = vpop.f32.mrb[79].mxu1  ;;  %v7837_v38 = vsel %vm9031_vm5, -1e+09, %v5673_v42  ;;  %vm9086_vm5 = vmmov %vm9003_vm0 }
 0x98d   : > { %v7842_v16 = vsel %vm9033_vm15, -1e+09, %v2689_v25  ;;  %vm9088_vm15 = vmmov %vm9003_vm0 }
 0x98f   : > { %2745 = vmax.xlane.f32.xlu0 %v7823_v7 }
 0x993   : > { %2741 = vmax.xlane.f32.xlu0 %v7828_v19 }
 0x99a   : > { %2879 = vrot.lane.b32.xlu1 %v9028_v49, %s8831_s12 }
 0x9a9   : > { %2877 = vrot.lane.b32.xlu0 %v9029_v37, %s8831_s12 }
 0x9be   : > { %2747 = vmax.xlane.f32.xlu1 %v7837_v38 }
 0x9c2   : > { %2743 = vmax.xlane.f32.xlu1 %v7842_v16 }
 0xa00   : > { %v2722_v9 = vpop.xlane.xlu0 %2721 }
 0xa01   : > { %v2751_v12 = vsub.f32 %v2703_v34, %v2722_v9 }
 0xa03   : > { %v2769_v27 = vmul.f32 1.442695, %v2751_v12  ;;  %v2720_v28 = vpop.xlane.xlu1 %2719 }
 0xa04   : > { %v2718_v0 = vpop.xlane.xlu0 %2717  ;;  %v2750_v15 = vsub.f32 %v2702_v40, %v2720_v28 }
 0xa05   : > { %6238 = vpow2.f32 %v2769_v27  ;;  %v2749_v31 = vsub.f32 %v2701_v58, %v2718_v0 }
 0xa06   : > { %v2767_v20 = vmul.f32 1.442695, %v2750_v15 }
 0xa07   : > { %v2765_v45 = vmul.f32 1.442695, %v2749_v31 }
 0xa08   : > { %v2724_v50 = vpop.xlane.xlu0 %2723 }
 0xa09   : > { %6240 = vpow2.f32 %v2765_v45  ;;  %v2752_v21 = vsub.f32 %v2704_v60, %v2724_v50 }
 0xa0a   : > { %v2732_v10 = vpop.xlane.xlu1 %2731 }
 0xa0b   : > { %v2771_v33 = vmul.f32 1.442695, %v2752_v21  ;;  %v2756_v53 = vsub.f32 %v2708_v13, %v2732_v10  ;;  %v9034_v21 = vld [vmem:[#allocation11_spill] sm:$0xff]  ;;  %v9035_v10 = vld [vmem:[#allocation12_spill] sm:$0xff] }
 0xa0c   : > { %v2730_v47 = vpop.xlane.xlu0 %2729 }
 0xa0d   : > { %6242 = vpow2.f32 %v2771_v33  ;;  %v2755_v59 = vsub.f32 %v2707_v36, %v2730_v47  ;;  %v2779_v25 = vmul.f32 1.442695, %v2756_v53 }
 0xa0e   : > { %v2728_v56 = vpop.xlane.xlu1 %2727  ;;  %6244 = vpow2.f32 %v2767_v20 }
 0xa0f   : > { %v7845_v42 = vpop.eup %6238  ;;  %v2777_v34 = vmul.f32 1.442695, %v2755_v59  ;;  %v2754_v40 = vsub.f32 %v7796_v23, %v2728_v56 }
 0xa10   : > { %v2726_v49 = vpop.xlane.xlu0 %2725  ;;  %2801 = vadd.xlane.f32.xlu1 %v7845_v42 }
 0xa11   : > { %6246 = vpow2.f32 %v2777_v34  ;;  %v2753_v58 = vsub.f32 %v2705_v24, %v2726_v49  ;;  %v2775_v36 = vmul.f32 1.442695, %v2754_v40 }
 0xa12   : > { %6248 = vpow2.f32 %v2779_v25  ;;  %v2740_v12 = vpop.xlane.xlu1 %2739 }
 0xa13   : > { %v7849_v60 = vpop.eup %6240  ;;  %v2773_v37 = vmul.f32 1.442695, %v2753_v58  ;;  %v2760_v20 = vsub.f32 %v7803_v6, %v2740_v12 }
 0xa14   : > { %v2738_v13 = vpop.xlane.xlu0 %2737  ;;  %2797 = vadd.xlane.f32.xlu1 %v7849_v60 }
 0xa15   : > { %6250 = vpow2.f32 %v2773_v37  ;;  %v2787_v59 = vmul.f32 1.442695, %v2760_v20  ;;  %v2759_v56 = vsub.f32 %v7808_v8, %v2738_v13 }
 0xa16   : > { %6252 = vpow2.f32 %v2775_v36  ;;  %v2736_v28 = vpop.xlane.xlu1 %2735 }
 0xa17   : > { %v7852_v30 = vpop.eup %6242  ;;  %v2758_v53 = vsub.f32 %v7813_v2, %v2736_v28  ;;  %v2785_v49 = vmul.f32 1.442695, %v2759_v56 }
 0xa18   : > { %v2734_v14 = vpop.xlane.xlu0 %2733  ;;  %2803 = vadd.xlane.f32.xlu1 %v7852_v30  ;;  %v7855_v9 = vpop.eup %6244 }
 0xa19   : > { %v2757_v33 = vsub.f32 %v7818_v46, %v2734_v14  ;;  %v2783_v34 = vmul.f32 1.442695, %v2758_v53 }
 0xa1a   : > { %v2880_v50 = vpop.permute.xlu1 %2879 }
 0xa1b   : > { %v7857_v23 = vpop.eup %6246  ;;  %v2781_v47 = vmul.f32 1.442695, %v2757_v33 }
 0xa1c   : > { %v2746_v24 = vpop.xlane.xlu0 %2745  ;;  %2809 = vadd.xlane.f32.xlu0 %v7857_v23  ;;  %2799 = vadd.xlane.f32.xlu1 %v7855_v9  ;;  %v7861_v27 = vpop.eup %6248 }
 0xa1d   : > { %6254 = vpow2.f32 %v2781_v47  ;;  %v2763_v6 = vsub.f32 %v7823_v7, %v2746_v24 }
 0xa1e   : > { %6256 = vpow2.f32 %v2787_v59 }
 0xa1f   : > { %v7863_v0 = vpop.eup %6250  ;;  %6258 = vpow2.f32 %v2783_v34  ;;  %v2793_v13 = vmul.f32 1.442695, %v2763_v6 }
 0xa20   : > { %v2742_v31 = vpop.xlane.xlu0 %2741  ;;  %2805 = vadd.xlane.f32.xlu1 %v7863_v0  ;;  %2811 = vadd.xlane.f32.xlu0 %v7861_v27  ;;  %v7867_v45 = vpop.eup %6252  ;;  %6260 = vpow2.f32 %v2785_v49 }
 0xa21   : > { %v2761_v40 = vsub.f32 %v7828_v19, %v2742_v31  ;;  %v9036_v31 = vld [vmem:[#allocation40_spill] sm:$0xff] }
 0xa23   : > { %v2789_v2 = vmul.f32 1.442695, %v2761_v40 }
 0xa24   : > { %v2878_v15 = vpop.permute.xlu0 %2877  ;;  %2807 = vadd.xlane.f32.xlu0 %v7867_v45 }
 0xa25   : > { %5682 = vmatprep.subr.bf16.mxu0 %v2878_v15 }
 0xa26   : > { %5683 = vmatpush3.bf16.msra.mxu0 %v2878_v15  ;;  %v9037_v15 = vld [vmem:[#allocation16_spill] sm:$0xff] }
 0xa27   : > { %5684 = vmatprep.subr.bf16.mxu0 %v2880_v50  ;;  %v7882_v14 = vpop.eup %6254 }
 0xa28   : > { %v7885_v12 = vpop.eup %6256 }
 0xa29   : > { %v7887_v19 = vpop.eup %6258 }
 0xa2a   : > { %5685 = vmatpush3.bf16.msra.mxu0 %v2880_v50  ;;  %v7891_v7 = vpop.eup %6260  ;;  %v9038_v50 = vpack.i.bf16 %v9036_v31, %v9037_v15 }
 0xa31   : > { %2883 = vrot.lane.b32.xlu1 %v9034_v21, %s8831_s12  ;;  %v9039_v21 = vld [vmem:[#allocation41_spill] sm:$0xff] }
 0xa3a   : > { %2881 = vrot.lane.b32.xlu0 %v9035_v10, %s8831_s12  ;;  %v9040_v10 = vld [vmem:[#allocation39_spill] sm:$0xff] }
 0xa3b   : > { %v9041_v33 = vpack.i.bf16 %v9039_v21, %v9040_v10 }
 0xa4b   : > { %v2748_v25 = vpop.xlane.xlu1 %2747 }
 0xa4c   : > { %v2764_v37 = vsub.f32 %v7837_v38, %v2748_v25 }
 0xa4e   : > { %v2795_v8 = vmul.f32 1.442695, %v2764_v37 }
 0xa4f   : > { %v2744_v58 = vpop.xlane.xlu1 %2743 }
 0xa50   : > { %v2762_v46 = vsub.f32 %v7842_v16, %v2744_v58 }
 0xa52   : > { %v2791_v36 = vmul.f32 1.442695, %v2762_v46 }
 0xa54   : > { %6262 = vpow2.f32 %v2791_v36 }
 0xa55   : > { %2813 = vadd.xlane.f32.xlu1 %v7882_v14  ;;  %6264 = vpow2.f32 %v2789_v2 }
 0xa56   : > { %6266 = vpow2.f32 %v2795_v8 }
 0xa57   : > { %6268 = vpow2.f32 %v2793_v13 }
 0xa59   : > { %2819 = vadd.xlane.f32.xlu1 %v7885_v12  ;;  %2815 = vadd.xlane.f32.xlu0 %v7887_v19 }
 0xa5d   : > { %2817 = vadd.xlane.f32.xlu0 %v7891_v7 }
 0xa5e   : > { %v7894_v38 = vpop.eup %6262 }
 0xa5f   : > { %2823 = vadd.xlane.f32.xlu1 %v7894_v38  ;;  %v7897_v16 = vpop.eup %6264 }
 0xa60   : > { %v7900_v24 = vpop.eup %6266 }
 0xa61   : > { %2821 = vadd.xlane.f32.xlu0 %v7897_v16  ;;  %v7903_v28 = vpop.eup %6268 }
 0xa63   : > { %2827 = vadd.xlane.f32.xlu1 %v7900_v24 }
 0xa65   : > { %2825 = vadd.xlane.f32.xlu0 %v7903_v28 }
 0xa74   : > { %5836 = vrot.lane.b32.xlu1 %v9038_v50, %s8831_s12 }
 0xa78   : > { %5841 = vrot.lane.b32.xlu1 %v5840_v62, %s8829_s22 }
 0xa7b   : > { %5831 = vrot.lane.b32.xlu0 %v9041_v33, %s8831_s12 }
 0xa7c   : > { %5846 = vrot.lane.b32.xlu1 %v5845_v35, %s8829_s22 }
 0xa9d   : > { %v2802_v20 = vpop.xlane.xlu1 %2801 }
 0xa9e   : > { %6270 = vrcp.f32 %v2802_v20 }
 0xaa1   : > { %v2798_v53 = vpop.xlane.xlu1 %2797 }
 0xaa5   : > { %v2804_v47 = vpop.xlane.xlu1 %2803 }
 0xaa6   : > { %6272 = vrcp.f32 %v2804_v47 }
 0xaa7   : > { %6274 = vrcp.f32 %v2798_v53 }
 0xaa8   : > { %v6271_v62 = vpop.eup %6270 }
 0xaa9   : > { %v2810_v59 = vpop.xlane.xlu0 %2809  ;;  %v2800_v56 = vpop.xlane.xlu1 %2799  ;;  %v2834_v26 = vmul.f32 %v6271_v62, %v7845_v42 }
 0xaaa   : > { %6276 = vrcp.f32 %v2800_v56 }
 0xaab   : > { %6278 = vrcp.f32 %v2810_v59 }
 0xaad   : > { %v2812_v17 = vpop.xlane.xlu0 %2811  ;;  %v2806_v22 = vpop.xlane.xlu1 %2805 }
 0xaae   : > { %6280 = vrcp.f32 %v2812_v17 }
 0xaaf   : > { %6282 = vrcp.f32 %v2806_v22 }
 0xab0   : > { %v6273_v34 = vpop.eup %6272 }
 0xab1   : > { %v2836_v29 = vmul.f32 %v6273_v34, %v7852_v30  ;;  %v2808_v35 = vpop.xlane.xlu0 %2807  ;;  %v6275_v25 = vpop.eup %6274 }
 0xab2   : > { %6284 = vrcp.f32 %v2808_v35  ;;  %v2830_v46 = vmul.f32 %v6275_v25, %v7849_v60  ;;  %v2884_v2 = vpop.permute.xlu1 %2883 }
 0xab3   : > { %v2862_v49 = vpack.c.bf16 %v2836_v29, %v2834_v26 }
 0xab4   : > { %v6277_v40 = vpop.eup %6276 }
 0xab5   : > { %v2882_v58 = vpop.permute.xlu0 %2881  ;;  %5180 = vst [vmem:[%s7143_s29 + $0xc8] sm:$0xff] %v2862_v49   ;;  %v6279_v37 = vpop.eup %6278  ;;  %v2832_v6 = vmul.f32 %v6277_v40, %v7855_v9 }
 0xab6   : > { %5686 = vmatprep.subr.bf16.mxu0 %v2882_v58  ;;  %v2842_v36 = vmul.f32 %v6279_v37, %v7857_v23 }
 0xab7   : > { %5687 = vmatpush3.bf16.msra.mxu0 %v2882_v58  ;;  %v2861_v30 = vpack.c.bf16 %v2832_v6, %v2830_v46  ;;  %v5990_v46 = vld [vmem:[%s8753_s3] sm:$0xff]   ;;  %v5995_v6 = vld [vmem:[%s8753_s3 + $0x28] sm:$0xff]  }
 0xab8   : > { %v6281_v42 = vpop.eup %6280  ;;  %5688 = vmatprep.subr.bf16.mxu0 %v2884_v2 }
 0xab9   : > { %v2844_v8 = vmul.f32 %v6281_v42, %v7861_v27  ;;  %v6283_v13 = vpop.eup %6282  ;;  %5690 = vmatprep.mubr.bf16.mxu0 %v2861_v30  ;;  %5179 = vst [vmem:[%s7143_s29 + $0xc0] sm:$0xff] %v2861_v30   ;;  %v5997_v42 = vld [vmem:[%s8753_s3 + $0x38] sm:$0xff]  }
 0xaba   : > { %v2838_v60 = vmul.f32 %v6283_v13, %v7863_v0 }
 0xabb   : > { %5689 = vmatpush3.bf16.msra.mxu0 %v2884_v2  ;;  %v2864_v31 = vpack.c.bf16 %v2844_v8, %v2842_v36  ;;  %v5996_v2 = vld [vmem:[%s8753_s3 + $0x30] sm:$0xff]  }
 0xabc   : > { %v6285_v15 = vpop.eup %6284  ;;  %5706 = vmatprep.subr.bf16.mxu0 %v5990_v46 }
 0xabd   : > { %v2840_v9 = vmul.f32 %v6285_v15, %v7867_v45  ;;  %5182 = vst [vmem:[%s7143_s29 + $0xd8] sm:$0xff] %v2864_v31  }
 0xabe   : > { %5691 = vmatmul.mubr.bf16.vlgmr.msra.gmra.mrb[80].mxu0 %v2862_v49 }
 0xabf   : > { %v2863_v50 = vpack.c.bf16 %v2840_v9, %v2838_v60  ;;  %5707 = vmatpush3.bf16.msra.mxu0 %v5990_v46  ;;  %v9043_v9 = vld [vmem:[#allocation44_spill] sm:$0xff] }
 0xac1   : > { %5694 = vmatprep.mubr.bf16.mxu0 %v2863_v50  ;;  %5181 = vst [vmem:[%s7143_s29 + $0xd0] sm:$0xff] %v2863_v50   ;;  %v9044_v50 = vld [vmem:[#allocation42_spill] sm:$0xff] }
 0xac6   : > { %5695 = vmatmul.mubr.bf16.gmra.mrb[84].mxu0 %v2864_v31 }
 0xae2   : > { %v2814_v21 = vpop.xlane.xlu1 %2813 }
 0xae3   : > { %6286 = vrcp.f32 %v2814_v21  ;;  %v9045_v21 = vpack.i.bf16 %v9043_v9, %v9044_v50 }
 0xae6   : > { %v2816_v23 = vpop.xlane.xlu0 %2815  ;;  %v2820_v27 = vpop.xlane.xlu1 %2819 }
 0xae7   : > { %6288 = vrcp.f32 %v2816_v23 }
 0xae8   : > { %6290 = vrcp.f32 %v2820_v27  ;;  %v9046_v27 = vld [vmem:[#allocation45_spill] sm:$0xff] }
 0xaea   : > { %v2818_v10 = vpop.xlane.xlu0 %2817 }
 0xaeb   : > { %6292 = vrcp.f32 %v2818_v10  ;;  %v9047_v10 = vld [vmem:[#allocation43_spill] sm:$0xff] }
 0xaec   : > { %v2824_v33 = vpop.xlane.xlu1 %2823 }
 0xaed   : > { %6294 = vrcp.f32 %v2824_v33  ;;  %v6287_v20 = vpop.eup %6286  ;;  %v9048_v33 = vpack.i.bf16 %v9046_v27, %v9047_v10 }
 0xaee   : > { %v2822_v0 = vpop.xlane.xlu0 %2821  ;;  %v2846_v59 = vmul.f32 %v6287_v20, %v7882_v14 }
 0xaef   : > { %6296 = vrcp.f32 %v2822_v0 }
 0xaf0   : > { %v2828_v45 = vpop.xlane.xlu1 %2827 }
 0xaf1   : > { %v6289_v53 = vpop.eup %6288  ;;  %6298 = vrcp.f32 %v2828_v45 }
 0xaf2   : > { %v2826_v47 = vpop.xlane.xlu0 %2825  ;;  %v2848_v56 = vmul.f32 %v6289_v53, %v7887_v19  ;;  %v6291_v17 = vpop.eup %6290 }
 0xaf3   : > { %6300 = vrcp.f32 %v2826_v47  ;;  %v2852_v26 = vmul.f32 %v6291_v17, %v7885_v12  ;;  %v9050_v47 = vld [vmem:[#allocation48_spill] sm:$0xff]  ;;  %v9053_v17 = vld [vmem:[#allocation49_spill] sm:$0xff] }
 0xaf4   : > { %v2865_v22 = vpack.c.bf16 %v2848_v56, %v2846_v59  ;;  %v9051_v59 = vld [vmem:[#allocation46_spill] sm:$0xff] }
 0xaf5   : > { %v6293_v62 = vpop.eup %6292  ;;  %v9052_v56 = vpack.i.bf16 %v9050_v47, %v9051_v59 }
 0xaf6   : > { %5698 = vmatprep.mubr.bf16.mxu0 %v2865_v22  ;;  %5183 = vst [vmem:[%s7143_s29 + $0xe0] sm:$0xff] %v2865_v22   ;;  %v2850_v34 = vmul.f32 %v6293_v62, %v7891_v7  ;;  %v9054_v22 = vld [vmem:[#allocation47_spill] sm:$0xff] }
 0xaf7   : > { %v6295_v29 = vpop.eup %6294  ;;  %v9055_v62 = vpack.i.bf16 %v9053_v17, %v9054_v22 }
 0xaf8   : > { %v2866_v35 = vpack.c.bf16 %v2852_v26, %v2850_v34  ;;  %v2856_v19 = vmul.f32 %v6295_v29, %v7894_v38  ;;  %v5991_v38 = vld [vmem:[%s8753_s3 + $0x8] sm:$0xff]   ;;  %v9056_v26 = vld [vmem:[#allocation52_spill] sm:$0xff] }
 0xaf9   : > { %v6297_v25 = vpop.eup %6296  ;;  %5708 = vmatprep.subr.bf16.mxu0 %v5991_v38  ;;  %v9058_v4 = vpack.i.bf16 %v9056_v26, %v9057_v55  ;;  %v9074_v55 = vld [vmem:[#allocation30_spill] sm:$0xff] }
 0xafa   : > { %5699 = vmatmul.mubr.bf16.gmra.mrb[88].mxu0 %v2866_v35  ;;  %5184 = vst [vmem:[%s7143_s29 + $0xe8] sm:$0xff] %v2866_v35   ;;  %v2854_v14 = vmul.f32 %v6297_v25, %v7897_v16  ;;  %v5992_v16 = vld [vmem:[%s8753_s3 + $0x10] sm:$0xff]  }
 0xafb   : > { %v6299_v49 = vpop.eup %6298  ;;  %5709 = vmatpush3.bf16.msra.mxu0 %v5991_v38 }
 0xafc   : > { %v2867_v40 = vpack.c.bf16 %v2856_v19, %v2854_v14  ;;  %v2860_v7 = vmul.f32 %v6299_v49, %v7900_v24  ;;  %5710 = vmatprep.subr.bf16.mxu0 %v5992_v16  ;;  %v5993_v24 = vld [vmem:[%s8753_s3 + $0x18] sm:$0xff]   ;;  %v5837_v19 = vpop.permute.xlu1 %5836 }
 0xafd   : > { %v6301_v58 = vpop.eup %6300  ;;  %v5838_v46 = vunpack.i.l.bf16 %v5837_v19 }
 0xafe   : > { %5702 = vmatprep.mubr.bf16.mxu0 %v2867_v40  ;;  %5185 = vst [vmem:[%s7143_s29 + $0xf0] sm:$0xff] %v2867_v40   ;;  %v2858_v37 = vmul.f32 %v6301_v58, %v7903_v28  ;;  %v5994_v28 = vld [vmem:[%s8753_s3 + $0x20] sm:$0xff]   ;;  %v5832_v40 = vpop.permute.xlu0 %5831 }
 0xaff   : > { %5711 = vmatpush3.bf16.msra.mxu0 %v5992_v16  ;;  %v9062_v16 = vld [vmem:[#allocation26_spill] sm:$0xff] }
 0xb00   : > { %v2868_v12 = vpack.c.bf16 %v2860_v7, %v2858_v37  ;;  %5712 = vmatprep.subr.bf16.mxu0 %v5993_v24  ;;  %v5842_v49 = vpop.permute.xlu1 %5841  ;;  %v5834_v37 = vunpack.i.h.bf16 %v5832_v40  ;;  %v5833_v7 = vunpack.i.l.bf16 %v5832_v40 }
 0xb01   : > { %v5844_v43 = vunpack.i.h.bf16 %v5842_v49 }
 0xb02   : > { %5703 = vmatmul.mubr.bf16.gmra.mrb[92].mxu0 %v2868_v12  ;;  %5186 = vst [vmem:[%s7143_s29 + $0xf8] sm:$0xff] %v2868_v12   ;;  %v5839_v12 = vunpack.i.h.bf16 %v5837_v19  ;;  %v3256_v41 = vsel %vm9063_vm8, %v9062_v16, %v5834_v37  ;;  %vm9090_vm8 = vmmov %vm9003_vm0 }
 0xb03   : > { %5713 = vmatpush3.bf16.msra.mxu0 %v5993_v24  ;;  %v3273_v9 = vsel %vm3271_vm6, %v3256_v41, %v5844_v43 }
 0xb04   : > { %5714 = vmatprep.subr.bf16.mxu0 %v5994_v28  ;;  %v5847_v58 = vpop.permute.xlu1 %5846 }
 0xb05   : > { %v5849_v38 = vunpack.i.h.bf16 %v5847_v58  ;;  %v5848_v5 = vunpack.i.l.bf16 %v5847_v58 }
 0xb07   : > { %5715 = vmatpush3.bf16.msra.mxu0 %v5994_v28  ;;  %v9066_v28 = vld [vmem:[#allocation25_spill] sm:$0xff] }
 0xb08   : > { %5716 = vmatprep.subr.bf16.mxu0 %v5995_v6 }
 0xb0b   : > { %5717 = vmatpush3.bf16.msra.mxu0 %v5995_v6  ;;  %v3258_v6 = vsel %vm9067_vm7, %v9066_v28, %v5839_v12 }
 0xb0c   : > { %5718 = vmatprep.subr.bf16.mxu0 %v5996_v2 }
 0xb0f   : > { %5719 = vmatpush3.bf16.msra.mxu0 %v5996_v2  ;;  %v9068_v2 = vld [vmem:[#allocation23_spill] sm:$0xff] }
 0xb10   : > { %5720 = vmatprep.subr.bf16.mxu0 %v5997_v42 }
 0xb13   : > { %5721 = vmatpush3.bf16.msra.mxu0 %v5997_v42  ;;  %v3257_v42 = vsel %vm9069_vm12, %v9068_v2, %v5838_v46 }
 0xb91   : > { %v5692_v30 = vpop.f32.mrb[80].mxu0 }
 0xb92   : > { %v2927_v36 = vpop.f32.mrb[81].mxu0 }
 0xb93   : > { %v5693_v8 = vpop.f32.mrb[82].mxu0 }
 0xb94   : > { %v5855_v13 = vpack.i.bf16 %v5693_v8, %v5692_v30  ;;  %v2930_v31 = vpop.f32.mrb[83].mxu0 }
 0xb95   : > { %v5850_v15 = vpack.i.bf16 %v2930_v31, %v2927_v36  ;;  %v3275_v31 = vsel %vm3271_vm6, %v3258_v6, %v5849_v38 }
 0xb96   : > { %5856 = vrot.lane.b32.xlu1 %v5855_v13, %s6439_s0  ;;  %v3274_v13 = vsel %vm3271_vm6, %v3257_v42, %v5848_v5 }
 0xb97   : > { %5851 = vrot.lane.b32.xlu0 %v5850_v15, %s6439_s0 }
 0xb99   : > { %v5696_v60 = vpop.f32.mrb[84].mxu0 }
 0xb9a   : > { %5866 = vrot.lane.b32.xlu1 %v9045_v21, %s9042_s13  ;;  %v2943_v23 = vpop.f32.mrb[85].mxu0 }
 0xb9b   : > { %5861 = vrot.lane.b32.xlu0 %v9048_v33, %s9042_s13  ;;  %v5697_v0 = vpop.f32.mrb[86].mxu0 }
 0xb9c   : > { %v5885_v20 = vpack.i.bf16 %v5697_v0, %v5696_v60  ;;  %v2946_v45 = vpop.f32.mrb[87].mxu0 }
 0xb9d   : > { %v5880_v53 = vpack.i.bf16 %v2946_v45, %v2943_v23 }
 0xb9e   : > { %5876 = vrot.lane.b32.xlu1 %v5875_v63, %s9049_s30 }
 0xb9f   : > { %5871 = vrot.lane.b32.xlu0 %v5870_v18, %s9049_s30 }
 0xba2   : > { %5886 = vrot.lane.b32.xlu1 %v5885_v20, %s6439_s0 }
 0xba3   : > { %5881 = vrot.lane.b32.xlu0 %v5880_v53, %s6439_s0 }
 0xba6   : > { %5896 = vrot.lane.b32.xlu1 %v9052_v56, %s9042_s13 }
 0xba7   : > { %5891 = vrot.lane.b32.xlu0 %v9055_v62, %s9042_s13 }
 0xbaa   : > { %5906 = vrot.lane.b32.xlu1 %v5905_v52, %s9049_s30 }
 0xbab   : > { %5901 = vrot.lane.b32.xlu0 %v5900_v54, %s9049_s30  ;;  %v9061_v54 = vpack.i.bf16 %v9059_v32, %v9060_v57 }
 0xbcd   : > { %v5700_v39 = vpop.f32.mrb[88].mxu0 }
 0xbce   : > { %v2959_v48 = vpop.f32.mrb[89].mxu0 }
 0xbcf   : > { %v5701_v61 = vpop.f32.mrb[90].mxu0 }
 0xbd0   : > { %v5915_v63 = vpack.i.bf16 %v5701_v61, %v5700_v39  ;;  %v2962_v3 = vpop.f32.mrb[91].mxu0 }
 0xbd1   : > { %v5910_v18 = vpack.i.bf16 %v2962_v3, %v2959_v48 }
 0xbd2   : > { %5916 = vrot.lane.b32.xlu1 %v5915_v63, %s6439_s0  ;;  %v9070_v63 = vld [vmem:[#allocation29_spill] sm:$0xff] }
 0xbd3   : > { %5911 = vrot.lane.b32.xlu0 %v5910_v18, %s6439_s0  ;;  %v9072_v18 = vld [vmem:[#allocation27_spill] sm:$0xff] }
 0xbd5   : > { %v5704_v34 = vpop.f32.mrb[92].mxu0 }
 0xbd6   : > { %5926 = vrot.lane.b32.xlu1 %v9058_v4, %s9042_s13  ;;  %v2975_v52 = vpop.f32.mrb[93].mxu0 }
 0xbd7   : > { %5921 = vrot.lane.b32.xlu0 %v9061_v54, %s9042_s13  ;;  %v5705_v29 = vpop.f32.mrb[94].mxu0 }
 0xbd8   : > { %v5945_v35 = vpack.i.bf16 %v5705_v29, %v5704_v34  ;;  %v2978_v25 = vpop.f32.mrb[95].mxu0 }
 0xbd9   : > { %v5940_v14 = vpack.i.bf16 %v2978_v25, %v2975_v52  ;;  %v9075_v52 = vld [vmem:[#allocation28_spill] sm:$0xff] }
 0xbda   : > { %5936 = vrot.lane.b32.xlu1 %v5935_v1, %s9049_s30  ;;  %v5843_v1 = vunpack.i.l.bf16 %v5842_v49 }
 0xbdb   : > { %5931 = vrot.lane.b32.xlu0 %v5930_v51, %s9049_s30  ;;  %v3255_v51 = vsel %vm9065_vm4, %v9064_v44, %v5833_v7  ;;  %vm9092_vm4 = vmmov %vm9003_vm0 }
 0xbdc   : > { %v3272_v50 = vsel %vm3271_vm6, %v3255_v51, %v5843_v1 }
 0xbde   : > { %5946 = vrot.lane.b32.xlu1 %v5945_v35, %s6439_s0 }
 0xbdf   : > { %5941 = vrot.lane.b32.xlu0 %v5940_v14, %s6439_s0  ;;  %s4527_s0 = sshll.u32 %s7143_s29, 4  ;;  %s8630_s0 = int_to_ptr.vmem [resolvable:$true] %s4527_s0 }
 0xbe0   : > { %s6374_s22 = scalar_lea.vmem %s8630_s0, 4096 }
 0xbe1   : > { %p6375_p11 = scmp.ne.s32.totalorder %s8630_s0, %s6374_s22 }
 0xbe3   : > { %p6376_p12 = pnand %p6375_p11, %p6542_p5 }
 0xbe5   : > { %p6377_p13 = pneg %p6376_p12 }
 0xc08   : > { %v5857_v24 = vpop.permute.xlu1 %5856 }
 0xc09   : > { %v5859_v30 = vunpack.i.h.bf16 %v5857_v24  ;;  %v5858_v36 = vunpack.i.l.bf16 %v5857_v24  ;;  %v5852_v8 = vpop.permute.xlu0 %5851 }
 0xc0a   : > { %v5854_v15 = vunpack.i.h.bf16 %v5852_v8  ;;  %v5853_v60 = vunpack.i.l.bf16 %v5852_v8  ;;  %v9079_v8 = vld [vmem:[#allocation31_spill] sm:$0xff] }
 0xc0b   : > { %v3291_v21 = vsel %vm3288_vm1, %v3274_v13, %v5858_v36  ;;  %v3292_v23 = vsel %vm3288_vm1, %v3275_v31, %v5859_v30  ;;  %v9077_v30 = vld [vmem:[#allocation33_spill] sm:$0xff] }
 0xc0c   : > { %v3306_v27 = vpack.c.bf16 %v3292_v23, %v3291_v21  ;;  %v5867_v10 = vpop.permute.xlu1 %5866  ;;  %v3289_v33 = vsel %vm3288_vm1, %v3272_v50, %v5853_v60  ;;  %v3290_v0 = vsel %vm3288_vm1, %v3273_v9, %v5854_v15  ;;  %v9081_v15 = vld [vmem:[#allocation34_spill] sm:$0xff]  ;;  %v9083_v9 = vld [vmem:[#allocation32_spill] sm:$0xff] }
 0xc0d   : > { %v5862_v20 = vpop.permute.xlu0 %5861  ;;  %v3305_v45 = vpack.c.bf16 %v3290_v0, %v3289_v33  ;;  %v5869_v53 = vunpack.i.h.bf16 %v5867_v10  ;;  %v5868_v47 = vunpack.i.l.bf16 %v5867_v10 }
 0xc0e   : > { %v5864_v56 = vunpack.i.h.bf16 %v5862_v20  ;;  %v5863_v17 = vunpack.i.l.bf16 %v5862_v20 }
 0xc0f   : > { %5722 = vmatprep.mubr.bf16.mxu0 %v3305_v45  ;;  %v3262_v3 = vsel %vm9071_vm11, %v9070_v63, %v5869_v53  ;;  %v3261_v34 = vsel %vm9073_vm2, %v9072_v18, %v5868_v47 }
 0xc10   : > { %v5877_v59 = vpop.permute.xlu1 %5876  ;;  %5723 = vmatmul.mubr.bf16.vlgmr.msra.gmra.mrb[96].mxu0 %v3306_v27  ;;  %v3260_v4 = vsel %vm9003_vm0, %v9074_v55, %v5864_v56  ;;  %v3259_v32 = vsel %vm9076_vm9, %v9075_v52, %v5863_v17 }
 0xc11   : > { %v5872_v22 = vpop.permute.xlu0 %5871  ;;  %v5879_v62 = vunpack.i.h.bf16 %v5877_v59  ;;  %v5878_v39 = vunpack.i.l.bf16 %v5877_v59 }
 0xc12   : > { %v5874_v48 = vunpack.i.h.bf16 %v5872_v22  ;;  %v5873_v61 = vunpack.i.l.bf16 %v5872_v22 }
 0xc13   : > { %v3278_v35 = vsel %vm3271_vm6, %v3261_v34, %v5878_v39  ;;  %v3279_v25 = vsel %vm3271_vm6, %v3262_v3, %v5879_v62 }
 0xc14   : > { %v5887_v26 = vpop.permute.xlu1 %5886  ;;  %v3276_v49 = vsel %vm3271_vm6, %v3259_v32, %v5873_v61  ;;  %v3277_v40 = vsel %vm3271_vm6, %v3260_v4, %v5874_v48 }
 0xc15   : > { %v5889_v57 = vunpack.i.h.bf16 %v5887_v26  ;;  %v5888_v54 = vunpack.i.l.bf16 %v5887_v26  ;;  %v5882_v29 = vpop.permute.xlu0 %5881 }
 0xc16   : > { %v5884_v14 = vunpack.i.h.bf16 %v5882_v29  ;;  %v5883_v19 = vunpack.i.l.bf16 %v5882_v29  ;;  %v9087_v29 = vld [vmem:[#allocation35_spill] sm:$0xff] }
 0xc17   : > { %v3295_v58 = vsel %vm3288_vm1, %v3278_v35, %v5888_v54  ;;  %v3296_v37 = vsel %vm3288_vm1, %v3279_v25, %v5889_v57  ;;  %v9085_v57 = vld [vmem:[#allocation37_spill] sm:$0xff] }
 0xc18   : > { %v3293_v7 = vsel %vm3288_vm1, %v3276_v49, %v5883_v19  ;;  %v3294_v12 = vsel %vm3288_vm1, %v3277_v40, %v5884_v14  ;;  %v3308_v46 = vpack.c.bf16 %v3296_v37, %v3295_v58  ;;  %v5897_v5 = vpop.permute.xlu1 %5896  ;;  %v9089_v14 = vld [vmem:[#allocation38_spill] sm:$0xff]  ;;  %v9091_v49 = vld [vmem:[#allocation36_spill] sm:$0xff] }
 0xc19   : > { %v3307_v38 = vpack.c.bf16 %v3294_v12, %v3293_v7  ;;  %v5892_v43 = vpop.permute.xlu0 %5891  ;;  %v5899_v16 = vunpack.i.h.bf16 %v5897_v5  ;;  %v5898_v41 = vunpack.i.l.bf16 %v5897_v5 }
 0xc1a   : > { %v5894_v51 = vunpack.i.h.bf16 %v5892_v43  ;;  %v5893_v24 = vunpack.i.l.bf16 %v5892_v43 }
 0xc1b   : > { %5726 = vmatprep.mubr.bf16.mxu0 %v3307_v38  ;;  %v3266_v36 = vsel %vm9078_vm10, %v9077_v30, %v5899_v16  ;;  %v3265_v13 = vsel %vm9080_vm13, %v9079_v8, %v5898_v41  ;;  %v6367_v8 = vld [vmem:[%s6581_s26 + $0x8] sm:$0xff]  }
 0xc1c   : > { %5727 = vmatmul.mubr.bf16.gmra.mrb[100].mxu0 %v3308_v46  ;;  %v5907_v1 = vpop.permute.xlu1 %5906  ;;  %v3264_v60 = vsel %vm9082_vm14, %v9081_v15, %v5894_v51  ;;  %v3263_v50 = vsel %vm9084_vm3, %v9083_v9, %v5893_v24 }
 0xc1d   : > { %v5902_v44 = vpop.permute.xlu0 %5901  ;;  %v5909_v28 = vunpack.i.h.bf16 %v5907_v1  ;;  %v5908_v6 = vunpack.i.l.bf16 %v5907_v1 }
 0xc1e   : > { %v5904_v2 = vunpack.i.h.bf16 %v5902_v44  ;;  %v5903_v42 = vunpack.i.l.bf16 %v5902_v44 }
 0xc1f   : > { %v3282_v10 = vsel %vm3271_vm6, %v3265_v13, %v5908_v6  ;;  %v3283_v33 = vsel %vm3271_vm6, %v3266_v36, %v5909_v28  ;;  %v6366_v6 = vld [vmem:[%s6581_s26] sm:$0xff]   ;;  %v3331_v13 = vunpack.c.l.bf16 %v6367_v8 }
 0xc20   : > { %v3280_v45 = vsel %vm3271_vm6, %v3263_v50, %v5903_v42  ;;  %v3281_v53 = vsel %vm3271_vm6, %v3264_v60, %v5904_v2  ;;  %v3329_v2 = vunpack.c.l.bf16 %v6366_v6  ;;  %v3330_v30 = vunpack.c.h.bf16 %v6366_v6 }
 0xc44   : > { %v5917_v31 = vpop.permute.xlu1 %5916 }
 0xc45   : > { %v5919_v21 = vunpack.i.h.bf16 %v5917_v31  ;;  %v5918_v23 = vunpack.i.l.bf16 %v5917_v31  ;;  %v5912_v27 = vpop.permute.xlu0 %5911 }
 0xc46   : > { %v5914_v0 = vunpack.i.h.bf16 %v5912_v27  ;;  %v5913_v20 = vunpack.i.l.bf16 %v5912_v27  ;;  %v6368_v27 = vld [vmem:[%s6581_s26 + $0x10] sm:$0xff]  }
 0xc47   : > { %v3299_v47 = vsel %vm3288_vm1, %v3282_v10, %v5918_v23  ;;  %v3300_v59 = vsel %vm3288_vm1, %v3283_v33, %v5919_v21  ;;  %v3332_v21 = vunpack.c.h.bf16 %v6367_v8  ;;  %v3333_v10 = vunpack.c.l.bf16 %v6368_v27 }
 0xc48   : > { %v5927_v56 = vpop.permute.xlu1 %5926  ;;  %v3297_v17 = vsel %vm3288_vm1, %v3280_v45, %v5913_v20  ;;  %v3298_v22 = vsel %vm3288_vm1, %v3281_v53, %v5914_v0  ;;  %v3310_v62 = vpack.c.bf16 %v3300_v59, %v3299_v47  ;;  %v3334_v0 = vunpack.c.h.bf16 %v6368_v27  ;;  %v6369_v45 = vld [vmem:[%s6581_s26 + $0x18] sm:$0xff]  }
 0xc49   : > { %v5922_v39 = vpop.permute.xlu0 %5921  ;;  %v3309_v48 = vpack.c.bf16 %v3298_v22, %v3297_v17  ;;  %v5929_v61 = vunpack.i.h.bf16 %v5927_v56  ;;  %v5928_v63 = vunpack.i.l.bf16 %v5927_v56  ;;  %v3335_v53 = vunpack.c.l.bf16 %v6369_v45 }
 0xc4a   : > { %v5924_v18 = vunpack.i.h.bf16 %v5922_v39  ;;  %v5923_v34 = vunpack.i.l.bf16 %v5922_v39  ;;  %v3336_v17 = vunpack.c.h.bf16 %v6369_v45 }
 0xc4b   : > { %5730 = vmatprep.mubr.bf16.mxu0 %v3309_v48  ;;  %v3270_v54 = vsel %vm9086_vm5, %v9085_v57, %v5929_v61  ;;  %v3269_v35 = vsel %vm9088_vm15, %v9087_v29, %v5928_v63  ;;  %v6370_v48 = vld [vmem:[%s6581_s26 + $0x20] sm:$0xff]  }
 0xc4c   : > { %v5937_v3 = vpop.permute.xlu1 %5936  ;;  %5731 = vmatmul.mubr.bf16.gmra.mrb[104].mxu0 %v3310_v62  ;;  %v3268_v19 = vsel %vm9090_vm8, %v9089_v14, %v5924_v18  ;;  %v3267_v40 = vsel %vm9092_vm4, %v9091_v49, %v5923_v34  ;;  %v3337_v61 = vunpack.c.l.bf16 %v6370_v48  ;;  %v6371_v34 = vld [vmem:[%s6581_s26 + $0x28] sm:$0xff]  }
 0xc4d   : > { %v5932_v26 = vpop.permute.xlu0 %5931  ;;  %v5939_v55 = vunpack.i.h.bf16 %v5937_v3  ;;  %v5938_v4 = vunpack.i.l.bf16 %v5937_v3  ;;  %v3338_v3 = vunpack.c.h.bf16 %v6370_v48 }
 0xc4e   : > { %v5934_v52 = vunpack.i.h.bf16 %v5932_v26  ;;  %v5933_v32 = vunpack.i.l.bf16 %v5932_v26  ;;  %v3339_v26 = vunpack.c.l.bf16 %v6371_v34 }
 0xc4f   : > { %v3286_v12 = vsel %vm3271_vm6, %v3269_v35, %v5938_v4  ;;  %v3287_v46 = vsel %vm3271_vm6, %v3270_v54, %v5939_v55  ;;  %v6372_v35 = vld [vmem:[%s6581_s26 + $0x30] sm:$0xff]  }
 0xc50   : > { %v5947_v25 = vpop.permute.xlu1 %5946  ;;  %v3284_v43 = vsel %vm3271_vm6, %v3267_v40, %v5933_v32  ;;  %v3285_v1 = vsel %vm3271_vm6, %v3268_v19, %v5934_v52  ;;  %v3340_v32 = vunpack.c.h.bf16 %v6371_v34  ;;  %v3342_v19 = vunpack.c.h.bf16 %v6372_v35  ;;  %v6373_v40 = vld [vmem:[%s6581_s26 + $0x38] sm:$0xff]   ;;  %v6012_v34 = vld [vmem:[%s8756_s6 + $0x44] ss:$8 sps:$4 sm:$0xff]   ;;  %s4955_s26 = sshll.u32 %s6525_s21, 12  ;;  %s6442_s21 = smov [#allocation2]  }
 0xc51   : > { %v5949_v58 = vunpack.i.h.bf16 %v5947_v25  ;;  %v5948_v37 = vunpack.i.l.bf16 %v5947_v25  ;;  %v5942_v7 = vpop.permute.xlu0 %5941  ;;  %v3341_v25 = vunpack.c.l.bf16 %v6372_v35  ;;  %v6016_v35 = vld [vmem:[%s8756_s6 + $0x60] ss:$8 sps:$4 sm:$0xff]   ;;  %s8628_s15 = scalar_lea.hbm %s8761_s11, %s4955_s26  ;;  %s6378_s29 = sshll.u32 %s6442_s21, 4  ;;  %s6379_s29 = int_to_ptr.vmem [resolvable:$false] %s6378_s29 }
 0xc52   : > { %v5944_v38 = vunpack.i.h.bf16 %v5942_v7  ;;  %v5943_v5 = vunpack.i.l.bf16 %v5942_v7  ;;  %s6380_s12 = scalar_lea.vmem %s6379_s29, 8192  ;;  %p6381_p0 = scmp.lt.s32.totalorder %s8630_s0, %s6379_s29 }
 0xc53   : > { %v3303_v16 = vsel %vm3288_vm1, %v3286_v12, %v5948_v37  ;;  %v3304_v41 = vsel %vm3288_vm1, %v3287_v46, %v5949_v58  ;;  %v3343_v58 = vunpack.c.l.bf16 %v6373_v40  ;;  %v3344_v46 = vunpack.c.h.bf16 %v6373_v40  ;;  %p6382_p1 = scmp.lt.s32.totalorder %s6380_s12, %s6374_s22 }
 0xc54   : > { %v3301_v44 = vsel %vm3288_vm1, %v3284_v43, %v5943_v5  ;;  %v3302_v51 = vsel %vm3288_vm1, %v3285_v1, %v5944_v38  ;;  %v3312_v24 = vpack.c.bf16 %v3304_v41, %v3303_v16  ;;  %v5998_v1 = vld [vmem:[%s8756_s6] ss:$8 sps:$4 sm:$0xff]   ;;  %v6000_v16 = vld [vmem:[%s8756_s6 + $0x4] ss:$8 sps:$4 sm:$0xff]   ;;  %v6003_v41 = vld [vmem:[%s8756_s6 + $0x14] ss:$8 sps:$4 sm:$0xff]  }
 0xc55   : > { %v3311_v28 = vpack.c.bf16 %v3302_v51, %v3301_v44  ;;  %3817 = vmatprep.subr.bf16.mxu1 %v6000_v16  ;;  %v6001_v44 = vld [vmem:[%s8756_s6 + $0x10] ss:$8 sps:$4 sm:$0xff]   ;;  %p6383_p2 = por %p6382_p1, %p6381_p0 }
 0xc56   : > { %3818 = vmatpush1.bf16.msra.mxu1 %v5998_v1 }
 0xc57   : > { %5734 = vmatprep.mubr.bf16.mxu0 %v3311_v28  ;;  %3819 = vmatprep.subr.bf16.mxu1 %v6003_v41  ;;  %p6384_p3 = pnand %p6383_p2, %p6377_p13 }
 0xc58   : > { %5735 = vmatmul.mubr.bf16.gmra.mrb[108].mxu0 %v3312_v24 }
 0xc5a   : > { %3820 = vmatpush1.bf16.msra.mxu1 %v6001_v44 }
 0xce3   : > { %v5724_v42 = vpop.f32.mrb[96].mxu0 }
 0xce4   : > { %v3427_v36 = vpop.f32.mrb[97].mxu0  ;;  %v8097_v50 = vadd.f32 %v5724_v42, %v3331_v13 }
 0xce5   : > { %v8092_v31 = vadd.f32 %v3427_v36, %v3329_v2  ;;  %v5725_v15 = vpop.f32.mrb[98].mxu0 }
 0xce6   : > { %v3430_v60 = vpop.f32.mrb[99].mxu0  ;;  %v8101_v23 = vadd.f32 %v5725_v15, %v3332_v21 }
 0xce7   : > { %v8094_v9 = vadd.f32 %v3430_v60, %v3330_v30  ;;  %3490 = vadd.xlane.f32.xlu0 %v8092_v31 }
 0xce9   : > { %3492 = vadd.xlane.f32.xlu1 %v8094_v9 }
 0xceb   : > { %3494 = vadd.xlane.f32.xlu0 %v8097_v50 }
 0xcef   : > { %v5728_v33 = vpop.f32.mrb[100].mxu0  ;;  %3496 = vadd.xlane.f32.xlu0 %v8101_v23 }
 0xcf0   : > { %v3443_v20 = vpop.f32.mrb[101].mxu0  ;;  %v8111_v62 = vadd.f32 %v5728_v33, %v3335_v53 }
 0xcf1   : > { %v8106_v47 = vadd.f32 %v3443_v20, %v3333_v10  ;;  %v5729_v59 = vpop.f32.mrb[102].mxu0 }
 0xcf2   : > { %v3446_v56 = vpop.f32.mrb[103].mxu0  ;;  %v8114_v39 = vadd.f32 %v5729_v59, %v3336_v17 }
 0xcf3   : > { %v8108_v22 = vadd.f32 %v3446_v56, %v3334_v0  ;;  %3498 = vadd.xlane.f32.xlu0 %v8106_v47 }
 0xcf5   : > { %3500 = vadd.xlane.f32.xlu1 %v8108_v22 }
 0xcf7   : > { %3502 = vadd.xlane.f32.xlu0 %v8111_v62 }
 0xcf9   : > { %3504 = vadd.xlane.f32.xlu1 %v8114_v39 }
 0xd1f   : > { %v5732_v63 = vpop.f32.mrb[104].mxu0 }
 0xd20   : > { %v3459_v18 = vpop.f32.mrb[105].mxu0  ;;  %v8125_v54 = vadd.f32 %v5732_v63, %v3339_v26  ;;  %v6006_v63 = vld [vmem:[%s8756_s6 + $0x24] ss:$8 sps:$4 sm:$0xff]   ;;  %v6010_v26 = vld [vmem:[%s8756_s6 + $0x40] ss:$8 sps:$4 sm:$0xff]  }
 0xd21   : > { %v8120_v55 = vadd.f32 %v3459_v18, %v3337_v61  ;;  %v5733_v4 = vpop.f32.mrb[106].mxu0  ;;  %3821 = vmatprep.subr.bf16.mxu1 %v6006_v63  ;;  %v6007_v18 = vld [vmem:[%s8756_s6 + $0x30] ss:$8 sps:$4 sm:$0xff]   ;;  %v8333_v63 = vld [vmem:[%s8757_s7 + $0x68] sm:$0xff]  }
 0xd22   : > { %v3462_v52 = vpop.f32.mrb[107].mxu0  ;;  %v8128_v29 = vadd.f32 %v5733_v4, %v3340_v32  ;;  %v6015_v4 = vld [vmem:[%s8756_s6 + $0x54] ss:$8 sps:$4 sm:$0xff]   ;;  %v6018_v32 = vld [vmem:[%s8756_s6 + $0x64] ss:$8 sps:$4 sm:$0xff]  }
 0xd23   : > { %v8122_v57 = vadd.f32 %v3462_v52, %v3338_v3  ;;  %3506 = vadd.xlane.f32.xlu0 %v8120_v55  ;;  %v6013_v52 = vld [vmem:[%s8756_s6 + $0x50] ss:$8 sps:$4 sm:$0xff]  }
 0xd25   : > { %3508 = vadd.xlane.f32.xlu1 %v8122_v57 }
 0xd27   : > { %3510 = vadd.xlane.f32.xlu0 %v8125_v54 }
 0xd29   : > { %3512 = vadd.xlane.f32.xlu1 %v8128_v29 }
 0xd2b   : > { %v5736_v14 = vpop.f32.mrb[108].mxu0 }
 0xd2c   : > { %v3475_v49 = vpop.f32.mrb[109].mxu0  ;;  %v8139_v5 = vadd.f32 %v5736_v14, %v3343_v58  ;;  %v6019_v14 = vld [vmem:[%s8756_s6 + $0x70] ss:$8 sps:$4 sm:$0xff]  }
 0xd2d   : > { %v8134_v37 = vadd.f32 %v3475_v49, %v3341_v25  ;;  %v5737_v7 = vpop.f32.mrb[110].mxu0  ;;  %v6021_v25 = vld [vmem:[%s8756_s6 + $0x74] ss:$8 sps:$4 sm:$0xff]  }
 0xd2e   : > { %v3478_v12 = vpop.f32.mrb[111].mxu0  ;;  %v8142_v43 = vadd.f32 %v5737_v7, %v3344_v46 }
 0xd2f   : > { %v8136_v38 = vadd.f32 %v3478_v12, %v3342_v19  ;;  %3514 = vadd.xlane.f32.xlu0 %v8134_v37 }
 0xd31   : > { %3516 = vadd.xlane.f32.xlu1 %v8136_v38 }
 0xd33   : > { %3518 = vadd.xlane.f32.xlu0 %v8139_v5 }
 0xd35   : > { %3520 = vadd.xlane.f32.xlu1 %v8142_v43 }
 0xd74   : > { %v3491_v51 = vpop.xlane.xlu0 %3490 }
 0xd75   : > { %v3523_v24 = vmul.f32 0.0078125, %v3491_v51 }
 0xd76   : > { %v3493_v28 = vpop.xlane.xlu1 %3492 }
 0xd77   : > { %v8159_v6 = vsub.f32 %v8092_v31, %v3523_v24  ;;  %v3524_v2 = vmul.f32 0.0078125, %v3493_v28 }
 0xd78   : > { %v3495_v42 = vpop.xlane.xlu0 %3494 }
 0xd79   : > { %v8162_v30 = vsub.f32 %v8094_v9, %v3524_v2  ;;  %v3525_v36 = vmul.f32 0.0078125, %v3495_v42  ;;  %v3555_v8 = vmul.f32 %v8159_v6, %v8159_v6 }
 0xd7b   : > { %v8167_v13 = vsub.f32 %v8097_v50, %v3525_v36  ;;  %3571 = vadd.xlane.f32.xlu0 %v3555_v8  ;;  %v3556_v15 = vmul.f32 %v8162_v30, %v8162_v30 }
 0xd7c   : > { %v3497_v60 = vpop.xlane.xlu0 %3496 }
 0xd7d   : > { %v3526_v21 = vmul.f32 0.0078125, %v3497_v60  ;;  %3573 = vadd.xlane.f32.xlu1 %v3556_v15  ;;  %v3557_v31 = vmul.f32 %v8167_v13, %v8167_v13 }
 0xd7f   : > { %v8174_v9 = vsub.f32 %v8101_v23, %v3526_v21  ;;  %3575 = vadd.xlane.f32.xlu0 %v3557_v31 }
 0xd80   : > { %v3499_v27 = vpop.xlane.xlu0 %3498 }
 0xd81   : > { %v3527_v10 = vmul.f32 0.0078125, %v3499_v27  ;;  %v3558_v50 = vmul.f32 %v8174_v9, %v8174_v9 }
 0xd82   : > { %v3501_v33 = vpop.xlane.xlu1 %3500 }
 0xd83   : > { %v8179_v0 = vsub.f32 %v8106_v47, %v3527_v10  ;;  %v3528_v20 = vmul.f32 0.0078125, %v3501_v33  ;;  %3577 = vadd.xlane.f32.xlu1 %v3558_v50 }
 0xd84   : > { %v3503_v45 = vpop.xlane.xlu0 %3502 }
 0xd85   : > { %v8182_v53 = vsub.f32 %v8108_v22, %v3528_v20  ;;  %v3529_v59 = vmul.f32 0.0078125, %v3503_v45  ;;  %v3559_v23 = vmul.f32 %v8179_v0, %v8179_v0  ;;  %v8280_v20 = vld [vmem:[%s8757_s7] sm:$0xff]   ;;  %v8291_v45 = vld [vmem:[%s8757_s7 + $0x8] sm:$0xff]  }
 0xd86   : > { %v3505_v56 = vpop.xlane.xlu1 %3504 }
 0xd87   : > { %v8187_v17 = vsub.f32 %v8111_v62, %v3529_v59  ;;  %v3530_v48 = vmul.f32 0.0078125, %v3505_v56  ;;  %3579 = vadd.xlane.f32.xlu0 %v3559_v23  ;;  %v3560_v47 = vmul.f32 %v8182_v53, %v8182_v53  ;;  %v6004_v62 = vld [vmem:[%s8756_s6 + $0x20] ss:$8 sps:$4 sm:$0xff]   ;;  %v8297_v59 = vld [vmem:[%s8757_s7 + $0x50] sm:$0xff]   ;;  %v8309_v56 = vld [vmem:[%s8757_s7 + $0x58] sm:$0xff]  }
 0xd88   : > { %3822 = vmatpush1.bf16.msra.mxu1 %v6004_v62  ;;  %v8303_v23 = vld [vmem:[%s8757_s7 + $0x10] sm:$0xff]  }
 0xd89   : > { %v8192_v61 = vsub.f32 %v8114_v39, %v3530_v48  ;;  %3581 = vadd.xlane.f32.xlu1 %v3560_v47  ;;  %v3561_v22 = vmul.f32 %v8187_v17, %v8187_v17  ;;  %v6009_v39 = vld [vmem:[%s8756_s6 + $0x34] ss:$8 sps:$4 sm:$0xff]   ;;  %v8321_v47 = vld [vmem:[%s8757_s7 + $0x60] sm:$0xff]  }
 0xd8a   : > { %3823 = vmatprep.subr.bf16.mxu1 %v6009_v39  ;;  %v8315_v48 = vld [vmem:[%s8757_s7 + $0x18] sm:$0xff]   ;;  %v8339_v39 = vld [vmem:[%s8757_s7 + $0x28] sm:$0xff]  }
 0xd8b   : > { %3583 = vadd.xlane.f32.xlu0 %v3561_v22  ;;  %v3562_v3 = vmul.f32 %v8192_v61, %v8192_v61  ;;  %v8327_v22 = vld [vmem:[%s8757_s7 + $0x20] sm:$0xff]  }
 0xd8c   : > { %3824 = vmatpush1.bf16.msra.mxu1 %v6007_v18 }
 0xd8d   : > { %3585 = vadd.xlane.f32.xlu1 %v3562_v3  ;;  %3825 = vmatprep.subr.bf16.mxu1 %v6012_v34 }
 0xd90   : > { %3826 = vmatpush1.bf16.msra.mxu1 %v6010_v26 }
 0xd91   : > { %3827 = vmatprep.subr.bf16.mxu1 %v6015_v4 }
 0xd94   : > { %3828 = vmatpush1.bf16.msra.mxu1 %v6013_v52 }
 0xd95   : > { %3829 = vmatprep.subr.bf16.mxu1 %v6018_v32 }
 0xd98   : > { %3830 = vmatpush1.bf16.msra.mxu1 %v6016_v35 }
 0xd99   : > { %3831 = vmatprep.subr.bf16.mxu1 %v6021_v25 }
 0xd9c   : > { %3832 = vmatpush1.bf16.msra.mxu1 %v6019_v14 }
 0xdb0   : > { %v3507_v19 = vpop.xlane.xlu0 %3506 }
 0xdb1   : > { %v3531_v49 = vmul.f32 0.0078125, %v3507_v19 }
 0xdb2   : > { %v3509_v40 = vpop.xlane.xlu1 %3508 }
 0xdb3   : > { %v8235_v58 = vsub.f32 %v8120_v55, %v3531_v49  ;;  %v3532_v7 = vmul.f32 0.0078125, %v3509_v40 }
 0xdb4   : > { %v3511_v12 = vpop.xlane.xlu0 %3510 }
 0xdb5   : > { %v8238_v46 = vsub.f32 %v8122_v57, %v3532_v7  ;;  %v3533_v1 = vmul.f32 0.0078125, %v3511_v12  ;;  %v3563_v16 = vmul.f32 %v8235_v58, %v8235_v58 }
 0xdb6   : > { %v3513_v41 = vpop.xlane.xlu1 %3512 }
 0xdb7   : > { %v8243_v44 = vsub.f32 %v8125_v54, %v3533_v1  ;;  %v3534_v51 = vmul.f32 0.0078125, %v3513_v41  ;;  %3587 = vadd.xlane.f32.xlu0 %v3563_v16  ;;  %v3564_v24 = vmul.f32 %v8238_v46, %v8238_v46  ;;  %v8346_v1 = vld [vmem:[%s8754_s4] ss:$0 sm:$0xff] }
 0xdb9   : > { %v8248_v55 = vsub.f32 %v8128_v29, %v3534_v51  ;;  %3589 = vadd.xlane.f32.xlu1 %v3564_v24  ;;  %v3565_v57 = vmul.f32 %v8243_v44, %v8243_v44 }
 0xdbb   : > { %3591 = vadd.xlane.f32.xlu0 %v3565_v57  ;;  %v3566_v28 = vmul.f32 %v8248_v55, %v8248_v55 }
 0xdbc   : > { %v3515_v2 = vpop.xlane.xlu0 %3514 }
 0xdbd   : > { %v3535_v42 = vmul.f32 0.0078125, %v3515_v2  ;;  %3593 = vadd.xlane.f32.xlu1 %v3566_v28 }
 0xdbe   : > { %v3517_v54 = vpop.xlane.xlu1 %3516 }
 0xdbf   : > { %v8255_v36 = vsub.f32 %v8134_v37, %v3535_v42  ;;  %v3536_v8 = vmul.f32 0.0078125, %v3517_v54 }
 0xdc0   : > { %v3519_v15 = vpop.xlane.xlu0 %3518 }
 0xdc1   : > { %v8258_v29 = vsub.f32 %v8136_v38, %v3536_v8  ;;  %v3537_v60 = vmul.f32 0.0078125, %v3519_v15  ;;  %v3567_v21 = vmul.f32 %v8255_v36, %v8255_v36 }
 0xdc2   : > { %v3521_v31 = vpop.xlane.xlu1 %3520 }
 0xdc3   : > { %v8263_v27 = vsub.f32 %v8139_v5, %v3537_v60  ;;  %v3538_v10 = vmul.f32 0.0078125, %v3521_v31  ;;  %3595 = vadd.xlane.f32.xlu0 %v3567_v21  ;;  %v3568_v50 = vmul.f32 %v8258_v29, %v8258_v29  ;;  %v6022_v5 = vld [vmem:[%s8757_s7 + $0x40] sm:$0xff]  }
 0xdc4   : > { %5354 = vmatprep.subr.bf16.mxu0 %v6022_v5  ;;  %5738 = vmatprep.subr.bf16.mxu1 %v6022_v5  ;;  %v8354_v21 = vld [vmem:[%s8755_s5] ss:$0 sm:$0xff] }
 0xdc5   : > { %v8268_v37 = vsub.f32 %v8142_v43, %v3538_v10  ;;  %3597 = vadd.xlane.f32.xlu1 %v3568_v50  ;;  %v3569_v38 = vmul.f32 %v8263_v27, %v8263_v27  ;;  %v8285_v43 = vld [vmem:[%s8757_s7 + $0x48] sm:$0xff]   ;;  %5355 = vmatpush3.bf16.msra.mxu0 %v8280_v20 }
 0xdc6   : > { %5356 = vmatprep.subr.bf16.mxu0 %v8285_v43 }
 0xdc7   : > { %3599 = vadd.xlane.f32.xlu0 %v3569_v38  ;;  %v3570_v33 = vmul.f32 %v8268_v37, %v8268_v37 }
 0xdc9   : > { %3601 = vadd.xlane.f32.xlu1 %v3570_v33  ;;  %5357 = vmatpush3.bf16.msra.mxu0 %v8291_v45 }
 0xdca   : > { %5358 = vmatprep.subr.bf16.mxu0 %v8297_v59 }
 0xdcd   : > { %5359 = vmatpush3.bf16.msra.mxu0 %v8303_v23 }
 0xdce   : > { %5360 = vmatprep.subr.bf16.mxu0 %v8309_v56 }
 0xdd1   : > { %5361 = vmatpush3.bf16.msra.mxu0 %v8315_v48 }
 0xdd2   : > { %5362 = vmatprep.subr.bf16.mxu0 %v8321_v47 }
 0xdd5   : > { %5363 = vmatpush3.bf16.msra.mxu0 %v8327_v22 }
 0xdd6   : > { %5364 = vmatprep.subr.bf16.mxu0 %v8333_v63 }
 0xdd9   : > { %5365 = vmatpush3.bf16.msra.mxu0 %v8339_v39 }
 0xe08   : > { %v3572_v62 = vpop.xlane.xlu0 %3571 }
 0xe09   : > { %v3603_v3 = vmul.f32 0.0078125, %v3572_v62 }
 0xe0a   : > { %v3574_v18 = vpop.xlane.xlu1 %3573 }
 0xe0b   : > { %v3619_v34 = vadd.f32 1e-05, %v3603_v3  ;;  %v3604_v26 = vmul.f32 0.0078125, %v3574_v18 }
 0xe0c   : > { %v3576_v4 = vpop.xlane.xlu0 %3575 }
 0xe0d   : > { %6302 = vrsqrt.f32 %v3619_v34  ;;  %v3620_v52 = vadd.f32 1e-05, %v3604_v26  ;;  %v3605_v32 = vmul.f32 0.0078125, %v3576_v4 }
 0xe0f   : > { %6304 = vrsqrt.f32 %v3620_v52  ;;  %v3621_v35 = vadd.f32 1e-05, %v3605_v32 }
 0xe10   : > { %v3578_v25 = vpop.xlane.xlu1 %3577 }
 0xe11   : > { %6306 = vrsqrt.f32 %v3621_v35  ;;  %v3606_v14 = vmul.f32 0.0078125, %v3578_v25 }
 0xe13   : > { %v3622_v19 = vadd.f32 1e-05, %v3606_v14 }
 0xe14   : > { %v3580_v49 = vpop.xlane.xlu0 %3579 }
 0xe15   : > { %6308 = vrsqrt.f32 %v3622_v19  ;;  %v3607_v40 = vmul.f32 0.0078125, %v3580_v49 }
 0xe16   : > { %v3582_v7 = vpop.xlane.xlu1 %3581 }
 0xe17   : > { %v6303_v12 = vpop.eup %6302  ;;  %v3623_v16 = vadd.f32 1e-05, %v3607_v40  ;;  %v3608_v41 = vmul.f32 0.0078125, %v3582_v7 }
 0xe18   : > { %v3651_v51 = vmul.f32 %v6303_v12, %v8159_v6  ;;  %v3584_v24 = vpop.xlane.xlu0 %3583 }
 0xe19   : > { %v6305_v57 = vpop.eup %6304  ;;  %6310 = vrsqrt.f32 %v3623_v16  ;;  %v3624_v28 = vadd.f32 1e-05, %v3608_v41  ;;  %v3609_v2 = vmul.f32 0.0078125, %v3584_v24 }
 0xe1a   : > { %v3674_v42 = vmul.f32 %v8346_v1, %v3651_v51  ;;  %v3652_v54 = vmul.f32 %v6305_v57, %v8162_v30  ;;  %v3586_v8 = vpop.xlane.xlu1 %3585 }
 0xe1b   : > { %v6307_v15 = vpop.eup %6306  ;;  %6312 = vrsqrt.f32 %v3624_v28  ;;  %v3610_v60 = vmul.f32 0.0078125, %v3586_v8  ;;  %v3625_v31 = vadd.f32 1e-05, %v3609_v2 }
 0xe1c   : > { %v3675_v6 = vmul.f32 %v8346_v1, %v3652_v54  ;;  %v8358_v50 = vadd.f32 %v8354_v21, %v3674_v42  ;;  %v3653_v30 = vmul.f32 %v6307_v15, %v8167_v13 }
 0xe1d   : > { %v3626_v10 = vadd.f32 1e-05, %v3610_v60 }
 0xe1e   : > { %v8361_v38 = vadd.f32 %v8354_v21, %v3675_v6  ;;  %v3676_v3 = vmul.f32 %v8346_v1, %v3653_v30 }
 0xe1f   : > { %v6309_v33 = vpop.eup %6308  ;;  %6314 = vrsqrt.f32 %v3626_v10 }
 0xe20   : > { %v3713_v5 = vpack.c.bf16 %v8361_v38, %v8358_v50  ;;  %v3654_v62 = vmul.f32 %v6309_v33, %v8174_v9  ;;  %6316 = vrsqrt.f32 %v3625_v31  ;;  %v8376_v4 = vadd.f32 %v8354_v21, %v3676_v3 }
 0xe22   : > { %3850 = vmatmul.mubr.bf16.vlgmr.msra.gmra.mrb[80].mxu1 %v3713_v5  ;;  %v3677_v18 = vmul.f32 %v8346_v1, %v3654_v62 }
 0xe23   : > { %v6311_v34 = vpop.eup %6310  ;;  %3859 = vmatprep.mubr.bf16.mxu1 %v9022_v11  ;;  %5746 = vmatpush3.bf16.msra.mxu1 %v8280_v20 }
 0xe24   : > { %v8372_v13 = vadd.f32 %v8354_v21, %v3677_v18  ;;  %5739 = vmatprep.subr.bf16.mxu1 %v8285_v43  ;;  %v3655_v9 = vmul.f32 %v6311_v34, %v8179_v0 }
 0xe25   : > { %v6313_v26 = vpop.eup %6312 }
 0xe26   : > { %v3656_v52 = vmul.f32 %v6313_v26, %v8182_v53  ;;  %v3714_v32 = vpack.c.bf16 %v8372_v13, %v8376_v4  ;;  %v3678_v43 = vmul.f32 %v8346_v1, %v3655_v9 }
 0xe27   : > { %5747 = vmatpush3.bf16.msra.mxu1 %v8291_v45 }
 0xe28   : > { %v3679_v20 = vmul.f32 %v8346_v1, %v3656_v52  ;;  %5740 = vmatprep.subr.bf16.mxu1 %v8297_v59  ;;  %v8394_v45 = vadd.f32 %v8354_v21, %v3678_v43 }
 0xe29   : > { %v6315_v35 = vpop.eup %6314 }
 0xe2a   : > { %3860 = vmatmul.mubr.bf16.gmra.mrb[84].mxu1 %v3714_v32  ;;  %v6317_v25 = vpop.eup %6316  ;;  %v8389_v0 = vadd.f32 %v8354_v21, %v3679_v20  ;;  %v3658_v53 = vmul.f32 %v6315_v35, %v8192_v61 }
 0xe2b   : > { %3869 = vmatprep.mubr.bf16.mxu1 %v9022_v11  ;;  %5748 = vmatpush3.bf16.msra.mxu1 %v8303_v23  ;;  %v3657_v59 = vmul.f32 %v6317_v25, %v8187_v17 }
 0xe2c   : > { %5741 = vmatprep.subr.bf16.mxu1 %v8309_v56  ;;  %v3715_v14 = vpack.c.bf16 %v8389_v0, %v8394_v45  ;;  %v3681_v19 = vmul.f32 %v8346_v1, %v3658_v53 }
 0xe2d   : > { %v3680_v23 = vmul.f32 %v8346_v1, %v3657_v59 }
 0xe2e   : > { %v8406_v61 = vadd.f32 %v8354_v21, %v3681_v19 }
 0xe2f   : > { %5749 = vmatpush3.bf16.msra.mxu1 %v8315_v48  ;;  %v8410_v17 = vadd.f32 %v8354_v21, %v3680_v23 }
 0xe30   : > { %5742 = vmatprep.subr.bf16.mxu1 %v8321_v47 }
 0xe31   : > { %v3716_v56 = vpack.c.bf16 %v8406_v61, %v8410_v17 }
 0xe32   : > { %3870 = vmatmul.mubr.bf16.gmra.mrb[88].mxu1 %v3715_v14 }
 0xe33   : > { %3879 = vmatprep.mubr.bf16.mxu1 %v9022_v11  ;;  %5750 = vmatpush3.bf16.msra.mxu1 %v8327_v22 }
 0xe34   : > { %5743 = vmatprep.subr.bf16.mxu1 %v8333_v63 }
 0xe37   : > { %5751 = vmatpush3.bf16.msra.mxu1 %v8339_v39 }
 0xe3a   : > { %3880 = vmatmul.mubr.bf16.gmra.mrb[92].mxu1 %v3716_v56 }
 0xe3b   : > { %3889 = vmatprep.mubr.bf16.mxu1 %v9022_v11 }
 0xe44   : > { %v3588_v48 = vpop.xlane.xlu0 %3587 }
 0xe45   : > { %v3611_v47 = vmul.f32 0.0078125, %v3588_v48 }
 0xe46   : > { %v3590_v49 = vpop.xlane.xlu1 %3589 }
 0xe47   : > { %v3627_v22 = vadd.f32 1e-05, %v3611_v47  ;;  %v3612_v40 = vmul.f32 0.0078125, %v3590_v49 }
 0xe48   : > { %v3592_v7 = vpop.xlane.xlu0 %3591 }
 0xe49   : > { %6318 = vrsqrt.f32 %v3627_v22  ;;  %v3628_v12 = vadd.f32 1e-05, %v3612_v40  ;;  %v3613_v63 = vmul.f32 0.0078125, %v3592_v7 }
 0xe4a   : > { %v3594_v16 = vpop.xlane.xlu1 %3593 }
 0xe4b   : > { %6320 = vrsqrt.f32 %v3628_v12  ;;  %v3629_v41 = vadd.f32 1e-05, %v3613_v63  ;;  %v3614_v51 = vmul.f32 0.0078125, %v3594_v16 }
 0xe4d   : > { %6322 = vrsqrt.f32 %v3629_v41  ;;  %v3630_v39 = vadd.f32 1e-05, %v3614_v51 }
 0xe4f   : > { %6324 = vrsqrt.f32 %v3630_v39 }
 0xe50   : > { %v3596_v24 = vpop.xlane.xlu0 %3595 }
 0xe51   : > { %v3615_v57 = vmul.f32 0.0078125, %v3596_v24 }
 0xe52   : > { %v3598_v28 = vpop.xlane.xlu1 %3597 }
 0xe53   : > { %v6319_v2 = vpop.eup %6318  ;;  %v3631_v42 = vadd.f32 1e-05, %v3615_v57  ;;  %v3616_v54 = vmul.f32 0.0078125, %v3598_v28 }
 0xe54   : > { %v3600_v8 = vpop.xlane.xlu0 %3599  ;;  %v3659_v15 = vmul.f32 %v6319_v2, %v8235_v58 }
 0xe55   : > { %v6321_v60 = vpop.eup %6320  ;;  %6326 = vrsqrt.f32 %v3631_v42  ;;  %v3632_v6 = vadd.f32 1e-05, %v3616_v54  ;;  %v3617_v31 = vmul.f32 0.0078125, %v3600_v8 }
 0xe56   : > { %v3602_v10 = vpop.xlane.xlu1 %3601  ;;  %v3660_v30 = vmul.f32 %v6321_v60, %v8238_v46  ;;  %v3682_v33 = vmul.f32 %v8346_v1, %v3659_v15 }
 0xe57   : > { %v6323_v5 = vpop.eup %6322  ;;  %6328 = vrsqrt.f32 %v3632_v6  ;;  %v3618_v62 = vmul.f32 0.0078125, %v3602_v10  ;;  %v3633_v34 = vadd.f32 1e-05, %v3617_v31 }
 0xe58   : > { %v3683_v3 = vmul.f32 %v8346_v1, %v3660_v30  ;;  %v8421_v9 = vadd.f32 %v8354_v21, %v3682_v33  ;;  %v3661_v52 = vmul.f32 %v6323_v5, %v8243_v44 }
 0xe59   : > { %v6325_v18 = vpop.eup %6324  ;;  %v3634_v26 = vadd.f32 1e-05, %v3618_v62 }
 0xe5a   : > { %v8424_v58 = vadd.f32 %v8354_v21, %v3683_v3  ;;  %v3662_v46 = vmul.f32 %v6325_v18, %v8248_v55  ;;  %v3684_v35 = vmul.f32 %v8346_v1, %v3661_v52 }
 0xe5b   : > { %6330 = vrsqrt.f32 %v3634_v26 }
 0xe5c   : > { %v3717_v32 = vpack.c.bf16 %v8424_v58, %v8421_v9  ;;  %v3685_v20 = vmul.f32 %v8346_v1, %v3662_v46  ;;  %6332 = vrsqrt.f32 %v3633_v34  ;;  %v8437_v44 = vadd.f32 %v8354_v21, %v3684_v35 }
 0xe5e   : > { %3890 = vmatmul.mubr.bf16.gmra.mrb[96].mxu1 %v3717_v32  ;;  %v8434_v25 = vadd.f32 %v8354_v21, %v3685_v20 }
 0xe5f   : > { %v6327_v43 = vpop.eup %6326  ;;  %3899 = vmatprep.mubr.bf16.mxu1 %v9022_v11 }
 0xe60   : > { %v3663_v55 = vmul.f32 %v6327_v43, %v8255_v36  ;;  %v3718_v14 = vpack.c.bf16 %v8434_v25, %v8437_v44 }
 0xe61   : > { %v6329_v53 = vpop.eup %6328 }
 0xe62   : > { %v3664_v59 = vmul.f32 %v6329_v53, %v8258_v29  ;;  %v3686_v56 = vmul.f32 %v8346_v1, %v3663_v55 }
 0xe64   : > { %v3687_v19 = vmul.f32 %v8346_v1, %v3664_v59  ;;  %v8451_v36 = vadd.f32 %v8354_v21, %v3686_v56 }
 0xe65   : > { %v6331_v23 = vpop.eup %6330 }
 0xe66   : > { %3900 = vmatmul.mubr.bf16.gmra.mrb[100].mxu1 %v3718_v14  ;;  %v6333_v48 = vpop.eup %6332  ;;  %v8447_v47 = vadd.f32 %v8354_v21, %v3687_v19  ;;  %v3666_v49 = vmul.f32 %v6331_v23, %v8268_v37 }
 0xe67   : > { %3909 = vmatprep.mubr.bf16.mxu1 %v9022_v11  ;;  %v3665_v29 = vmul.f32 %v6333_v48, %v8263_v27  ;;  %v6034_v27 = vld [vmem:[%s8757_s7 + $0x70] sm:$0xff]  }
 0xe68   : > { %v3719_v22 = vpack.c.bf16 %v8447_v47, %v8451_v36  ;;  %v3689_v40 = vmul.f32 %v8346_v1, %v3666_v49  ;;  %5366 = vmatprep.subr.bf16.mxu0 %v6034_v27  ;;  %5744 = vmatprep.subr.bf16.mxu1 %v6034_v27 }
 0xe69   : > { %v3688_v7 = vmul.f32 %v8346_v1, %v3665_v29  ;;  %v6035_v1 = vld [vmem:[%s8757_s7 + $0x30] sm:$0xff]  }
 0xe6a   : > { %v8460_v12 = vadd.f32 %v8354_v21, %v3689_v40  ;;  %5367 = vmatpush3.bf16.msra.mxu0 %v6035_v1  ;;  %5752 = vmatpush3.bf16.msra.mxu1 %v6035_v1 }
 0xe6b   : > { %v8463_v37 = vadd.f32 %v8354_v21, %v3688_v7  ;;  %v6037_v21 = vld [vmem:[%s8757_s7 + $0x38] sm:$0xff]  }
 0xe6d   : > { %v3720_v63 = vpack.c.bf16 %v8460_v12, %v8463_v37 }
 0xe6e   : > { %3910 = vmatmul.mubr.bf16.gmra.mrb[104].mxu1 %v3719_v22 }
 0xe6f   : > { %3919 = vmatprep.mubr.bf16.mxu1 %v9022_v11  ;;  %v6036_v11 = vld [vmem:[%s8757_s7 + $0x78] sm:$0xff]  }
 0xe70   : > { %5368 = vmatprep.subr.bf16.mxu0 %v6036_v11  ;;  %5745 = vmatprep.subr.bf16.mxu1 %v6036_v11 }
 0xe71   : > { %5369 = vmatpush3.bf16.msra.mxu0 %v6037_v21  ;;  %5753 = vmatpush3.bf16.msra.mxu1 %v6037_v21 }
 0xe76   : > { %3920 = vmatmul.mubr.bf16.gmra.mrb[108].mxu1 %v3720_v63 }
 0xef5   : > { %v3851_v16 = vpop.f32.mrb[80].mxu1 }
 0xef6   : > { %v3853_v41 = vpop.f32.mrb[81].mxu1  ;;  %v3930_v39 = vmax.f32 %v3851_v16, 0.0 }
 0xef7   : > { %v3855_v51 = vpop.f32.mrb[82].mxu1  ;;  %v3931_v28 = vmax.f32 %v3853_v41, 0.0 }
 0xef8   : > { %v3932_v24 = vmax.f32 %v3855_v51, 0.0  ;;  %v3857_v57 = vpop.f32.mrb[83].mxu1 }
 0xef9   : > { %v3933_v2 = vmax.f32 %v3857_v57, 0.0 }
 0xefa   : > { %v3962_v42 = vpack.c.bf16 %v3932_v24, %v3930_v39 }
 0xefb   : > { %v3963_v54 = vpack.c.bf16 %v3933_v2, %v3931_v28 }
 0xefd   : > { %v3861_v8 = vpop.f32.mrb[84].mxu1  ;;  %4138 = vmatprep.mubr.bf16.mxu0 %v3963_v54 }
 0xefe   : > { %v3863_v15 = vpop.f32.mrb[85].mxu1  ;;  %4139 = vmatmul.mubr.bf16.vlgmr.msra.gmra.mrb[112].mxu0 %v3962_v42  ;;  %v3934_v6 = vmax.f32 %v3861_v8, 0.0 }
 0xeff   : > { %v3865_v60 = vpop.f32.mrb[86].mxu1  ;;  %v3935_v30 = vmax.f32 %v3863_v15, 0.0 }
 0xf00   : > { %v3936_v31 = vmax.f32 %v3865_v60, 0.0  ;;  %v3867_v10 = vpop.f32.mrb[87].mxu1 }
 0xf01   : > { %v3937_v33 = vmax.f32 %v3867_v10, 0.0 }
 0xf02   : > { %v3964_v5 = vpack.c.bf16 %v3936_v31, %v3934_v6 }
 0xf03   : > { %v3965_v62 = vpack.c.bf16 %v3937_v33, %v3935_v30 }
 0xf05   : > { %v3871_v3 = vpop.f32.mrb[88].mxu1  ;;  %4146 = vmatprep.mubr.bf16.mxu0 %v3965_v62 }
 0xf06   : > { %v3873_v18 = vpop.f32.mrb[89].mxu1  ;;  %4147 = vmatmul.mubr.bf16.gmra.mrb[116].mxu0 %v3964_v5  ;;  %v3938_v26 = vmax.f32 %v3871_v3, 0.0 }
 0xf07   : > { %v3875_v34 = vpop.f32.mrb[90].mxu1  ;;  %v3939_v32 = vmax.f32 %v3873_v18, 0.0 }
 0xf08   : > { %v3940_v52 = vmax.f32 %v3875_v34, 0.0  ;;  %v3877_v46 = vpop.f32.mrb[91].mxu1 }
 0xf09   : > { %v3941_v20 = vmax.f32 %v3877_v46, 0.0 }
 0xf0a   : > { %v3966_v35 = vpack.c.bf16 %v3940_v52, %v3938_v26 }
 0xf0b   : > { %v3967_v43 = vpack.c.bf16 %v3941_v20, %v3939_v32 }
 0xf0d   : > { %v3881_v53 = vpop.f32.mrb[92].mxu1  ;;  %4154 = vmatprep.mubr.bf16.mxu0 %v3967_v43 }
 0xf0e   : > { %v3883_v55 = vpop.f32.mrb[93].mxu1  ;;  %4155 = vmatmul.mubr.bf16.gmra.mrb[120].mxu0 %v3966_v35  ;;  %v3942_v14 = vmax.f32 %v3881_v53, 0.0 }
 0xf0f   : > { %v3885_v59 = vpop.f32.mrb[94].mxu1  ;;  %v3943_v56 = vmax.f32 %v3883_v55, 0.0 }
 0xf10   : > { %v3944_v19 = vmax.f32 %v3885_v59, 0.0  ;;  %v3887_v23 = vpop.f32.mrb[95].mxu1 }
 0xf11   : > { %v3945_v48 = vmax.f32 %v3887_v23, 0.0 }
 0xf12   : > { %v3968_v49 = vpack.c.bf16 %v3944_v19, %v3942_v14 }
 0xf13   : > { %v3969_v29 = vpack.c.bf16 %v3945_v48, %v3943_v56 }
 0xf15   : > { %4162 = vmatprep.mubr.bf16.mxu0 %v3969_v29 }
 0xf16   : > { %4163 = vmatmul.mubr.bf16.gmra.mrb[124].mxu0 %v3968_v49 }
 0xf31   : > { %v3891_v22 = vpop.f32.mrb[96].mxu1 }
 0xf32   : > { %v3893_v40 = vpop.f32.mrb[97].mxu1  ;;  %v3946_v63 = vmax.f32 %v3891_v22, 0.0 }
 0xf33   : > { %v3895_v7 = vpop.f32.mrb[98].mxu1  ;;  %v3947_v11 = vmax.f32 %v3893_v40, 0.0 }
 0xf34   : > { %v3948_v27 = vmax.f32 %v3895_v7, 0.0  ;;  %v3897_v1 = vpop.f32.mrb[99].mxu1 }
 0xf35   : > { %v3949_v21 = vmax.f32 %v3897_v1, 0.0 }
 0xf36   : > { %v3970_v16 = vpack.c.bf16 %v3948_v27, %v3946_v63 }
 0xf37   : > { %v3971_v41 = vpack.c.bf16 %v3949_v21, %v3947_v11 }
 0xf39   : > { %v3901_v51 = vpop.f32.mrb[100].mxu1  ;;  %4170 = vmatprep.mubr.bf16.mxu0 %v3971_v41 }
 0xf3a   : > { %v3903_v39 = vpop.f32.mrb[101].mxu1  ;;  %4171 = vmatmul.mubr.bf16.gmra.mrb[128].mxu0 %v3970_v16  ;;  %v3950_v57 = vmax.f32 %v3901_v51, 0.0 }
 0xf3b   : > { %v3905_v24 = vpop.f32.mrb[102].mxu1  ;;  %v3951_v42 = vmax.f32 %v3903_v39, 0.0 }
 0xf3c   : > { %v3952_v28 = vmax.f32 %v3905_v24, 0.0  ;;  %v3907_v2 = vpop.f32.mrb[103].mxu1 }
 0xf3d   : > { %v3953_v54 = vmax.f32 %v3907_v2, 0.0 }
 0xf3e   : > { %v3972_v8 = vpack.c.bf16 %v3952_v28, %v3950_v57 }
 0xf3f   : > { %v3973_v15 = vpack.c.bf16 %v3953_v54, %v3951_v42 }
 0xf41   : > { %v3911_v60 = vpop.f32.mrb[104].mxu1  ;;  %4178 = vmatprep.mubr.bf16.mxu0 %v3973_v15 }
 0xf42   : > { %v3913_v6 = vpop.f32.mrb[105].mxu1  ;;  %4179 = vmatmul.mubr.bf16.gmra.mrb[132].mxu0 %v3972_v8  ;;  %v3954_v10 = vmax.f32 %v3911_v60, 0.0 }
 0xf43   : > { %v3915_v31 = vpop.f32.mrb[106].mxu1  ;;  %v3955_v5 = vmax.f32 %v3913_v6, 0.0 }
 0xf44   : > { %v3956_v30 = vmax.f32 %v3915_v31, 0.0  ;;  %v3917_v33 = vpop.f32.mrb[107].mxu1 }
 0xf45   : > { %v3957_v62 = vmax.f32 %v3917_v33, 0.0 }
 0xf46   : > { %v3974_v3 = vpack.c.bf16 %v3956_v30, %v3954_v10 }
 0xf47   : > { %v3975_v18 = vpack.c.bf16 %v3957_v62, %v3955_v5 }
 0xf49   : > { %v3921_v34 = vpop.f32.mrb[108].mxu1  ;;  %4186 = vmatprep.mubr.bf16.mxu1 %v3975_v18 }
 0xf4a   : > { %v3923_v26 = vpop.f32.mrb[109].mxu1  ;;  %4187 = vmatmul.mubr.bf16.vlgmr.msra.gmra.mrb[112].mxu1 %v3974_v3  ;;  %v3958_v46 = vmax.f32 %v3921_v34, 0.0 }
 0xf4b   : > { %v3925_v52 = vpop.f32.mrb[110].mxu1  ;;  %v3959_v35 = vmax.f32 %v3923_v26, 0.0 }
 0xf4c   : > { %v3960_v32 = vmax.f32 %v3925_v52, 0.0  ;;  %v3927_v20 = vpop.f32.mrb[111].mxu1 }
 0xf4d   : > { %v3961_v43 = vmax.f32 %v3927_v20, 0.0 }
 0xf4e   : > { %v3976_v53 = vpack.c.bf16 %v3960_v32, %v3958_v46 }
 0xf4f   : > { %v3977_v55 = vpack.c.bf16 %v3961_v43, %v3959_v35 }
 0xf51   : > { %4194 = vmatprep.mubr.bf16.mxu1 %v3977_v55 }
 0xf52   : > { %4195 = vmatmul.mubr.bf16.gmra.mrb[116].mxu1 %v3976_v53 }
 0xfd1   : > { %v5370_v59 = vpop.f32.mrb[112].mxu0 }
 0xfd2   : > { %v5371_v14 = vpop.f32.mrb[113].mxu0 }
 0xfd3   : > { %v5372_v19 = vadd.f32 %v5371_v14, %v5370_v59  ;;  %v5373_v23 = vpop.f32.mrb[114].mxu0 }
 0xfd4   : > { %v5374_v56 = vpop.f32.mrb[115].mxu0 }
 0xfd5   : > { %v8480_v48 = vadd.f32 %v5372_v19, %v8358_v50  ;;  %v5375_v49 = vadd.f32 %v5374_v56, %v5373_v23 }
 0xfd7   : > { %v8483_v29 = vadd.f32 %v5375_v49, %v8361_v38  ;;  %4203 = vadd.xlane.f32.xlu0 %v8480_v48 }
 0xfd9   : > { %4205 = vadd.xlane.f32.xlu1 %v8483_v29  ;;  %v5376_v22 = vpop.f32.mrb[116].mxu0 }
 0xfda   : > { %v5377_v40 = vpop.f32.mrb[117].mxu0 }
 0xfdb   : > { %v5378_v7 = vadd.f32 %v5377_v40, %v5376_v22  ;;  %v5379_v63 = vpop.f32.mrb[118].mxu0 }
 0xfdc   : > { %v5380_v27 = vpop.f32.mrb[119].mxu0 }
 0xfdd   : > { %v8488_v1 = vadd.f32 %v5378_v7, %v8376_v4  ;;  %v5381_v11 = vadd.f32 %v5380_v27, %v5379_v63 }
 0xfdf   : > { %v8491_v50 = vadd.f32 %v5381_v11, %v8372_v13  ;;  %4207 = vadd.xlane.f32.xlu0 %v8488_v1 }
 0xfe1   : > { %4209 = vadd.xlane.f32.xlu1 %v8491_v50  ;;  %v5382_v38 = vpop.f32.mrb[120].mxu0 }
 0xfe2   : > { %v5383_v21 = vpop.f32.mrb[121].mxu0 }
 0xfe3   : > { %v5384_v16 = vadd.f32 %v5383_v21, %v5382_v38  ;;  %v5385_v41 = vpop.f32.mrb[122].mxu0 }
 0xfe4   : > { %v5386_v51 = vpop.f32.mrb[123].mxu0 }
 0xfe5   : > { %v8496_v39 = vadd.f32 %v5384_v16, %v8394_v45  ;;  %v5387_v24 = vadd.f32 %v5386_v51, %v5385_v41 }
 0xfe7   : > { %v8499_v4 = vadd.f32 %v5387_v24, %v8389_v0  ;;  %4211 = vadd.xlane.f32.xlu0 %v8496_v39 }
 0xfe9   : > { %4213 = vadd.xlane.f32.xlu1 %v8499_v4  ;;  %v5388_v13 = vpop.f32.mrb[124].mxu0 }
 0xfea   : > { %v5389_v57 = vpop.f32.mrb[125].mxu0 }
 0xfeb   : > { %v5390_v28 = vadd.f32 %v5389_v57, %v5388_v13  ;;  %v5391_v2 = vpop.f32.mrb[126].mxu0 }
 0xfec   : > { %v5392_v42 = vpop.f32.mrb[127].mxu0 }
 0xfed   : > { %v8504_v54 = vadd.f32 %v5390_v28, %v8410_v17  ;;  %v5393_v8 = vadd.f32 %v5392_v42, %v5391_v2 }
 0xfef   : > { %v8507_v45 = vadd.f32 %v5393_v8, %v8406_v61  ;;  %4215 = vadd.xlane.f32.xlu0 %v8504_v54 }
 0xff1   : > { %4217 = vadd.xlane.f32.xlu1 %v8507_v45 }
0x100d   : > { %v5394_v0 = vpop.f32.mrb[128].mxu0 }
0x100e   : > { %v5395_v15 = vpop.f32.mrb[129].mxu0 }
0x100f   : > { %v5396_v60 = vadd.f32 %v5395_v15, %v5394_v0  ;;  %v5397_v6 = vpop.f32.mrb[130].mxu0 }
0x1010   : > { %v5398_v31 = vpop.f32.mrb[131].mxu0 }
0x1011   : > { %v8512_v10 = vadd.f32 %v5396_v60, %v8421_v9  ;;  %v5399_v30 = vadd.f32 %v5398_v31, %v5397_v6 }
0x1013   : > { %v8515_v17 = vadd.f32 %v5399_v30, %v8424_v58  ;;  %4219 = vadd.xlane.f32.xlu0 %v8512_v10 }
0x1015   : > { %4221 = vadd.xlane.f32.xlu1 %v8515_v17  ;;  %v5400_v61 = vpop.f32.mrb[132].mxu0 }
0x1016   : > { %v5401_v33 = vpop.f32.mrb[133].mxu0 }
0x1017   : > { %v5402_v5 = vadd.f32 %v5401_v33, %v5400_v61  ;;  %v5403_v62 = vpop.f32.mrb[134].mxu0 }
0x1018   : > { %v5404_v3 = vpop.f32.mrb[135].mxu0 }
0x1019   : > { %v8520_v18 = vadd.f32 %v5402_v5, %v8437_v44  ;;  %v5405_v34 = vadd.f32 %v5404_v3, %v5403_v62 }
0x101b   : > { %v8523_v9 = vadd.f32 %v5405_v34, %v8434_v25  ;;  %4223 = vadd.xlane.f32.xlu0 %v8520_v18 }
0x101d   : > { %4225 = vadd.xlane.f32.xlu1 %v8523_v9  ;;  %v5406_v58 = vpop.f32.mrb[112].mxu1 }
0x101e   : > { %v5407_v26 = vpop.f32.mrb[113].mxu1 }
0x101f   : > { %v5408_v52 = vadd.f32 %v5407_v26, %v5406_v58  ;;  %v5409_v46 = vpop.f32.mrb[114].mxu1 }
0x1020   : > { %v5410_v32 = vpop.f32.mrb[115].mxu1 }
0x1021   : > { %v8528_v20 = vadd.f32 %v5408_v52, %v8451_v36  ;;  %v5411_v35 = vadd.f32 %v5410_v32, %v5409_v46 }
0x1023   : > { %v8531_v44 = vadd.f32 %v5411_v35, %v8447_v47  ;;  %4227 = vadd.xlane.f32.xlu0 %v8528_v20 }
0x1025   : > { %4229 = vadd.xlane.f32.xlu1 %v8531_v44  ;;  %v5412_v25 = vpop.f32.mrb[116].mxu1 }
0x1026   : > { %v5413_v43 = vpop.f32.mrb[117].mxu1 }
0x1027   : > { %v5414_v53 = vadd.f32 %v5413_v43, %v5412_v25  ;;  %v5415_v55 = vpop.f32.mrb[118].mxu1 }
0x1028   : > { %v5416_v59 = vpop.f32.mrb[119].mxu1 }
0x1029   : > { %v8536_v14 = vadd.f32 %v5414_v53, %v8463_v37  ;;  %v5417_v19 = vadd.f32 %v5416_v59, %v5415_v55 }
0x102b   : > { %v8539_v36 = vadd.f32 %v5417_v19, %v8460_v12  ;;  %4231 = vadd.xlane.f32.xlu0 %v8536_v14 }
0x102d   : > { %4233 = vadd.xlane.f32.xlu1 %v8539_v36 }
0x1064   : > { %v4204_v47 = vpop.xlane.xlu0 %4203 }
0x1065   : > { %v4235_v23 = vmul.f32 0.0078125, %v4204_v47 }
0x1066   : > { %v4206_v56 = vpop.xlane.xlu1 %4205 }
0x1067   : > { %v8544_v49 = vsub.f32 %v8480_v48, %v4235_v23  ;;  %v4236_v22 = vmul.f32 0.0078125, %v4206_v56 }
0x1069   : > { %v8547_v40 = vsub.f32 %v8483_v29, %v4236_v22  ;;  %v4267_v37 = vmul.f32 %v8544_v49, %v8544_v49 }
0x106b   : > { %4283 = vadd.xlane.f32.xlu0 %v4267_v37  ;;  %v4268_v12 = vmul.f32 %v8547_v40, %v8547_v40 }
0x106c   : > { %v4208_v7 = vpop.xlane.xlu0 %4207 }
0x106d   : > { %v4237_v63 = vmul.f32 0.0078125, %v4208_v7  ;;  %4285 = vadd.xlane.f32.xlu1 %v4268_v12 }
0x106e   : > { %v4210_v27 = vpop.xlane.xlu1 %4209 }
0x106f   : > { %v8554_v11 = vsub.f32 %v8488_v1, %v4237_v63  ;;  %v4238_v48 = vmul.f32 0.0078125, %v4210_v27 }
0x1071   : > { %v8557_v38 = vsub.f32 %v8491_v50, %v4238_v48  ;;  %v4269_v29 = vmul.f32 %v8554_v11, %v8554_v11 }
0x1073   : > { %4287 = vadd.xlane.f32.xlu0 %v4269_v29  ;;  %v4270_v21 = vmul.f32 %v8557_v38, %v8557_v38 }
0x1074   : > { %v4212_v16 = vpop.xlane.xlu0 %4211 }
0x1075   : > { %v4239_v41 = vmul.f32 0.0078125, %v4212_v16  ;;  %4289 = vadd.xlane.f32.xlu1 %v4270_v21 }
0x1076   : > { %v4214_v51 = vpop.xlane.xlu1 %4213 }
0x1077   : > { %v8564_v24 = vsub.f32 %v8496_v39, %v4239_v41  ;;  %v4240_v1 = vmul.f32 0.0078125, %v4214_v51 }
0x1079   : > { %v8567_v13 = vsub.f32 %v8499_v4, %v4240_v1  ;;  %v4271_v50 = vmul.f32 %v8564_v24, %v8564_v24 }
0x107b   : > { %4291 = vadd.xlane.f32.xlu0 %v4271_v50  ;;  %v4272_v57 = vmul.f32 %v8567_v13, %v8567_v13 }
0x107c   : > { %v4216_v28 = vpop.xlane.xlu0 %4215 }
0x107d   : > { %v4241_v2 = vmul.f32 0.0078125, %v4216_v28  ;;  %4293 = vadd.xlane.f32.xlu1 %v4272_v57 }
0x107e   : > { %v4218_v42 = vpop.xlane.xlu1 %4217 }
0x107f   : > { %v8574_v8 = vsub.f32 %v8504_v54, %v4241_v2  ;;  %v4242_v39 = vmul.f32 0.0078125, %v4218_v42 }
0x1081   : > { %v8577_v0 = vsub.f32 %v8507_v45, %v4242_v39  ;;  %v4273_v4 = vmul.f32 %v8574_v8, %v8574_v8 }
0x1083   : > { %4295 = vadd.xlane.f32.xlu0 %v4273_v4  ;;  %v4274_v15 = vmul.f32 %v8577_v0, %v8577_v0 }
0x1085   : > { %4297 = vadd.xlane.f32.xlu1 %v4274_v15 }
0x10a0   : > { %v4220_v60 = vpop.xlane.xlu0 %4219 }
0x10a1   : > { %v4243_v6 = vmul.f32 0.0078125, %v4220_v60 }
0x10a2   : > { %v4222_v31 = vpop.xlane.xlu1 %4221 }
0x10a3   : > { %v8584_v30 = vsub.f32 %v8512_v10, %v4243_v6  ;;  %v4244_v54 = vmul.f32 0.0078125, %v4222_v31 }
0x10a5   : > { %v8587_v61 = vsub.f32 %v8515_v17, %v4244_v54  ;;  %v4275_v45 = vmul.f32 %v8584_v30, %v8584_v30 }
0x10a7   : > { %4299 = vadd.xlane.f32.xlu0 %v4275_v45  ;;  %v4276_v33 = vmul.f32 %v8587_v61, %v8587_v61 }
0x10a8   : > { %v4224_v5 = vpop.xlane.xlu0 %4223 }
0x10a9   : > { %v4245_v62 = vmul.f32 0.0078125, %v4224_v5  ;;  %4301 = vadd.xlane.f32.xlu1 %v4276_v33 }
0x10aa   : > { %v4226_v3 = vpop.xlane.xlu1 %4225 }
0x10ab   : > { %v8594_v34 = vsub.f32 %v8520_v18, %v4245_v62  ;;  %v4246_v10 = vmul.f32 0.0078125, %v4226_v3 }
0x10ad   : > { %v8597_v58 = vsub.f32 %v8523_v9, %v4246_v10  ;;  %v4277_v17 = vmul.f32 %v8594_v34, %v8594_v34 }
0x10af   : > { %4303 = vadd.xlane.f32.xlu0 %v4277_v17  ;;  %v4278_v26 = vmul.f32 %v8597_v58, %v8597_v58 }
0x10b0   : > { %v4228_v52 = vpop.xlane.xlu0 %4227 }
0x10b1   : > { %v4247_v46 = vmul.f32 0.0078125, %v4228_v52  ;;  %4305 = vadd.xlane.f32.xlu1 %v4278_v26 }
0x10b2   : > { %v4230_v32 = vpop.xlane.xlu1 %4229 }
0x10b3   : > { %v8604_v35 = vsub.f32 %v8528_v20, %v4247_v46  ;;  %v4248_v18 = vmul.f32 0.0078125, %v4230_v32 }
0x10b5   : > { %v8607_v25 = vsub.f32 %v8531_v44, %v4248_v18  ;;  %v4279_v9 = vmul.f32 %v8604_v35, %v8604_v35 }
0x10b7   : > { %4307 = vadd.xlane.f32.xlu0 %v4279_v9  ;;  %v4280_v43 = vmul.f32 %v8607_v25, %v8607_v25 }
0x10b8   : > { %v4232_v53 = vpop.xlane.xlu0 %4231 }
0x10b9   : > { %v4249_v55 = vmul.f32 0.0078125, %v4232_v53  ;;  %4309 = vadd.xlane.f32.xlu1 %v4280_v43 }
0x10ba   : > { %v4234_v20 = vpop.xlane.xlu1 %4233 }
0x10bb   : > { %v8614_v59 = vsub.f32 %v8536_v14, %v4249_v55  ;;  %v4250_v19 = vmul.f32 0.0078125, %v4234_v20 }
0x10bd   : > { %v8617_v44 = vsub.f32 %v8539_v36, %v4250_v19  ;;  %v4281_v47 = vmul.f32 %v8614_v59, %v8614_v59 }
0x10bf   : > { %4311 = vadd.xlane.f32.xlu0 %v4281_v47  ;;  %v4282_v23 = vmul.f32 %v8617_v44, %v8617_v44 }
0x10c1   : > { %4313 = vadd.xlane.f32.xlu1 %v4282_v23 }
0x10c2   : > { %6387 = shalt.err (!%p6384_p3)
}
0x10c3   : > { %s6388_s13 = scalar_lea.hbm %s8628_s15, 4096  ;;  %s6392_s14 = scalar_lea.hbm %s8761_s11, 8192 }
0x10c4   : > { %p6389_p4 = scmp.ne.s32.totalorder %s8628_s15, %s6388_s13  ;;  %p6393_p9 = scmp.lt.u32.totalorder %s8628_s15, %s8761_s11 }
0x10c5   : > { %p6394_p10 = scmp.lt.u32.totalorder %s6392_s14, %s6388_s13  ;;  %p6396_p12 = scmp.lt.u32.totalorder %s6388_s13, %s8628_s15 }
0x10c6   : > { %p6390_p7 = pnand %p6389_p4, %p6542_p5 }
0x10c7   : > { %p6395_p11 = por %p6394_p10, %p6393_p9 }
0x10c8   : > { %p6391_p8 = pneg %p6390_p7 }
0x10c9   : > { %p6397_p13 = por %p6396_p12, %p6395_p11 }
0x10cb   : > { %p6398_p0 = pnand %p6397_p13, %p6391_p8 }
0x10cd   : > { %6401 = shalt.err (!%p6398_p0)
}
0x10ce   : > { %s6443_s22 = smov 4   ;;  %v8663_v41 = vld [vmem:[%s8758_s8] ss:$0 sm:$0xff] }
0x10cf   : > { %5786 = dma.vmem_to_hbm [thread:$0]  (%p6542_p5), %s8630_s0, 4096, %s8628_s15, %s8634_s25, %s9049_s30, %s9049_s30, %s6443_s22  }
0x10d0   : > { %v8671_v39 = vld [vmem:[%s8759_s9] ss:$0 sm:$0xff]  ;;  %s9094_s15 = sshll.u32 %s6564_s16, 6 }
0x10d1   : > { %s8681_s13 = scalar_lea.vmem %s8760_s10, %s9094_s15 }
0x10f8   : > { %v4284_v14 = vpop.xlane.xlu0 %4283 }
0x10f9   : > { %v4315_v36 = vmul.f32 0.0078125, %v4284_v14 }
0x10fa   : > { %v4286_v56 = vpop.xlane.xlu1 %4285 }
0x10fb   : > { %v4331_v22 = vadd.f32 1e-05, %v4315_v36  ;;  %v4316_v37 = vmul.f32 0.0078125, %v4286_v56 }
0x10fd   : > { %6334 = vrsqrt.f32 %v4331_v22  ;;  %v4332_v12 = vadd.f32 1e-05, %v4316_v37 }
0x10ff   : > { %6336 = vrsqrt.f32 %v4332_v12 }
0x1100   : > { %v4288_v7 = vpop.xlane.xlu0 %4287 }
0x1101   : > { %v4317_v63 = vmul.f32 0.0078125, %v4288_v7 }
0x1102   : > { %v4290_v27 = vpop.xlane.xlu1 %4289 }
0x1103   : > { %v4333_v48 = vadd.f32 1e-05, %v4317_v63  ;;  %v4318_v29 = vmul.f32 0.0078125, %v4290_v27 }
0x1105   : > { %6338 = vrsqrt.f32 %v4333_v48  ;;  %v4334_v21 = vadd.f32 1e-05, %v4318_v29 }
0x1107   : > { %v6335_v16 = vpop.eup %6334  ;;  %6340 = vrsqrt.f32 %v4334_v21 }
0x1108   : > { %v4363_v51 = vmul.f32 %v6335_v16, %v8544_v49  ;;  %v4292_v1 = vpop.xlane.xlu0 %4291 }
0x1109   : > { %v6337_v50 = vpop.eup %6336  ;;  %v4319_v57 = vmul.f32 0.0078125, %v4292_v1 }
0x110a   : > { %v4386_v28 = vmul.f32 %v8663_v41, %v4363_v51  ;;  %v4364_v2 = vmul.f32 %v6337_v50, %v8547_v40  ;;  %v4294_v42 = vpop.xlane.xlu1 %4293 }
0x110b   : > { %v4335_v4 = vadd.f32 1e-05, %v4319_v57  ;;  %v4320_v15 = vmul.f32 0.0078125, %v4294_v42 }
0x110c   : > { %v4387_v60 = vmul.f32 %v8663_v41, %v4364_v2  ;;  %v4409_v6 = vadd.f32 %v8671_v39, %v4386_v28 }
0x110d   : > { %6342 = vrsqrt.f32 %v4335_v4  ;;  %v4336_v49 = vadd.f32 1e-05, %v4320_v15 }
0x110e   : > { %v4410_v31 = vadd.f32 %v8671_v39, %v4387_v60 }
0x110f   : > { %v6339_v54 = vpop.eup %6338  ;;  %6344 = vrsqrt.f32 %v4336_v49 }
0x1110   : > { %v5119_v40 = vpack.c.bf16 %v4410_v31, %v4409_v6  ;;  %v4365_v45 = vmul.f32 %v6339_v54, %v8554_v11  ;;  %v4296_v33 = vpop.xlane.xlu0 %4295 }
0x1111   : > { %v6341_v5 = vpop.eup %6340  ;;  %v4321_v62 = vmul.f32 0.0078125, %v4296_v33 }
0x1112   : > { %5120 = vst [vmem:[%s8681_s13] sm:$0xff] %v5119_v40   ;;  %v4388_v3 = vmul.f32 %v8663_v41, %v4365_v45  ;;  %v4366_v10 = vmul.f32 %v6341_v5, %v8557_v38  ;;  %v4298_v17 = vpop.xlane.xlu1 %4297 }
0x1113   : > { %v4337_v26 = vadd.f32 1e-05, %v4321_v62  ;;  %v4322_v52 = vmul.f32 0.0078125, %v4298_v17 }
0x1114   : > { %v4389_v46 = vmul.f32 %v8663_v41, %v4366_v10  ;;  %v4411_v18 = vadd.f32 %v8671_v39, %v4388_v3 }
0x1115   : > { %6346 = vrsqrt.f32 %v4337_v26  ;;  %v4338_v32 = vadd.f32 1e-05, %v4322_v52 }
0x1116   : > { %v4412_v11 = vadd.f32 %v8671_v39, %v4389_v46 }
0x1117   : > { %v6343_v9 = vpop.eup %6342  ;;  %6348 = vrsqrt.f32 %v4338_v32 }
0x1118   : > { %v5124_v43 = vpack.c.bf16 %v4412_v11, %v4411_v18  ;;  %v4367_v53 = vmul.f32 %v6343_v9, %v8564_v24 }
0x1119   : > { %v6345_v55 = vpop.eup %6344 }
0x111a   : > { %5187 = vst [vmem:[%s8681_s13 + $0x8] sm:$0xff] %v5124_v43   ;;  %v4390_v38 = vmul.f32 %v8663_v41, %v4367_v53  ;;  %v4368_v20 = vmul.f32 %v6345_v55, %v8567_v13 }
0x111c   : > { %v4391_v19 = vmul.f32 %v8663_v41, %v4368_v20  ;;  %v4413_v47 = vadd.f32 %v8671_v39, %v4390_v38 }
0x111e   : > { %v4414_v23 = vadd.f32 %v8671_v39, %v4391_v19 }
0x111f   : > { %v6347_v14 = vpop.eup %6346 }
0x1120   : > { %v5129_v36 = vpack.c.bf16 %v4414_v23, %v4413_v47  ;;  %v4369_v56 = vmul.f32 %v6347_v14, %v8574_v8 }
0x1121   : > { %v6349_v22 = vpop.eup %6348 }
0x1122   : > { %5188 = vst [vmem:[%s8681_s13 + $0x10] sm:$0xff] %v5129_v36   ;;  %v4392_v24 = vmul.f32 %v8663_v41, %v4369_v56  ;;  %v4370_v37 = vmul.f32 %v6349_v22, %v8577_v0 }
0x1124   : > { %v4393_v12 = vmul.f32 %v8663_v41, %v4370_v37  ;;  %v4415_v13 = vadd.f32 %v8671_v39, %v4392_v24 }
0x1126   : > { %v4416_v7 = vadd.f32 %v8671_v39, %v4393_v12 }
0x1128   : > { %v5134_v63 = vpack.c.bf16 %v4416_v7, %v4415_v13 }
0x112a   : > { %5189 = vst [vmem:[%s8681_s13 + $0x18] sm:$0xff] %v5134_v63  }
0x1134   : > { %v4300_v27 = vpop.xlane.xlu0 %4299 }
0x1135   : > { %v4323_v48 = vmul.f32 0.0078125, %v4300_v27 }
0x1136   : > { %v4302_v29 = vpop.xlane.xlu1 %4301 }
0x1137   : > { %v4339_v21 = vadd.f32 1e-05, %v4323_v48  ;;  %v4324_v16 = vmul.f32 0.0078125, %v4302_v29 }
0x1139   : > { %6350 = vrsqrt.f32 %v4339_v21  ;;  %v4340_v8 = vadd.f32 1e-05, %v4324_v16 }
0x113b   : > { %6352 = vrsqrt.f32 %v4340_v8 }
0x113c   : > { %v4304_v51 = vpop.xlane.xlu0 %4303 }
0x113d   : > { %v4325_v1 = vmul.f32 0.0078125, %v4304_v51 }
0x113e   : > { %v4306_v50 = vpop.xlane.xlu1 %4305 }
0x113f   : > { %v4341_v0 = vadd.f32 1e-05, %v4325_v1  ;;  %v4326_v57 = vmul.f32 0.0078125, %v4306_v50 }
0x1141   : > { %6354 = vrsqrt.f32 %v4341_v0  ;;  %v4342_v28 = vadd.f32 1e-05, %v4326_v57 }
0x1143   : > { %v6351_v2 = vpop.eup %6350  ;;  %6356 = vrsqrt.f32 %v4342_v28 }
0x1144   : > { %v4371_v42 = vmul.f32 %v6351_v2, %v8584_v30  ;;  %v4308_v4 = vpop.xlane.xlu0 %4307 }
0x1145   : > { %v6353_v15 = vpop.eup %6352  ;;  %v4327_v60 = vmul.f32 0.0078125, %v4308_v4 }
0x1146   : > { %v4394_v49 = vmul.f32 %v8663_v41, %v4371_v42  ;;  %v4372_v6 = vmul.f32 %v6353_v15, %v8587_v61  ;;  %v4310_v31 = vpop.xlane.xlu1 %4309 }
0x1147   : > { %v4343_v54 = vadd.f32 1e-05, %v4327_v60  ;;  %v4328_v40 = vmul.f32 0.0078125, %v4310_v31 }
0x1148   : > { %v4395_v45 = vmul.f32 %v8663_v41, %v4372_v6  ;;  %v4417_v5 = vadd.f32 %v8671_v39, %v4394_v49 }
0x1149   : > { %6358 = vrsqrt.f32 %v4343_v54  ;;  %v4344_v33 = vadd.f32 1e-05, %v4328_v40 }
0x114a   : > { %v4418_v62 = vadd.f32 %v8671_v39, %v4395_v45 }
0x114b   : > { %v6355_v30 = vpop.eup %6354  ;;  %6360 = vrsqrt.f32 %v4344_v33 }
0x114c   : > { %v5139_v3 = vpack.c.bf16 %v4418_v62, %v4417_v5  ;;  %v4373_v10 = vmul.f32 %v6355_v30, %v8594_v34  ;;  %v4312_v17 = vpop.xlane.xlu0 %4311 }
0x114d   : > { %v6357_v26 = vpop.eup %6356  ;;  %v4329_v61 = vmul.f32 0.0078125, %v4312_v17 }
0x114e   : > { %5190 = vst [vmem:[%s8681_s13 + $0x20] sm:$0xff] %v5139_v3   ;;  %v4396_v52 = vmul.f32 %v8663_v41, %v4373_v10  ;;  %v4374_v46 = vmul.f32 %v6357_v26, %v8597_v58  ;;  %v4314_v32 = vpop.xlane.xlu1 %4313 }
0x114f   : > { %v4345_v18 = vadd.f32 1e-05, %v4329_v61  ;;  %v4330_v11 = vmul.f32 0.0078125, %v4314_v32 }
0x1150   : > { %v4397_v9 = vmul.f32 %v8663_v41, %v4374_v46  ;;  %v4419_v53 = vadd.f32 %v8671_v39, %v4396_v52 }
0x1151   : > { %6362 = vrsqrt.f32 %v4345_v18  ;;  %v4346_v43 = vadd.f32 1e-05, %v4330_v11 }
0x1152   : > { %v4420_v34 = vadd.f32 %v8671_v39, %v4397_v9 }
0x1153   : > { %v6359_v55 = vpop.eup %6358  ;;  %6364 = vrsqrt.f32 %v4346_v43 }
0x1154   : > { %v5144_v38 = vpack.c.bf16 %v4420_v34, %v4419_v53  ;;  %v4375_v20 = vmul.f32 %v6359_v55, %v8604_v35 }
0x1155   : > { %v6361_v19 = vpop.eup %6360 }
0x1156   : > { %5191 = vst [vmem:[%s8681_s13 + $0x28] sm:$0xff] %v5144_v38   ;;  %v4398_v58 = vmul.f32 %v8663_v41, %v4375_v20  ;;  %v4376_v47 = vmul.f32 %v6361_v19, %v8607_v25 }
0x1158   : > { %v4399_v23 = vmul.f32 %v8663_v41, %v4376_v47  ;;  %v4421_v14 = vadd.f32 %v8671_v39, %v4398_v58 }
0x115a   : > { %v4422_v36 = vadd.f32 %v8671_v39, %v4399_v23 }
0x115b   : > { %v6363_v56 = vpop.eup %6362 }
0x115c   : > { %v5149_v22 = vpack.c.bf16 %v4422_v36, %v4421_v14  ;;  %v4377_v24 = vmul.f32 %v6363_v56, %v8614_v59 }
0x115d   : > { %v6365_v37 = vpop.eup %6364 }
0x115e   : > { %5192 = vst [vmem:[%s8681_s13 + $0x30] sm:$0xff] %v5149_v22   ;;  %v4400_v35 = vmul.f32 %v8663_v41, %v4377_v24  ;;  %v4378_v12 = vmul.f32 %v6365_v37, %v8617_v44 }
0x1160   : > { %v4401_v13 = vmul.f32 %v8663_v41, %v4378_v12  ;;  %v4423_v25 = vadd.f32 %v8671_v39, %v4400_v35 }
0x1162   : > { %v4424_v7 = vadd.f32 %v8671_v39, %v4401_v13 }
0x1164   : > { %v5154_v63 = vpack.c.bf16 %v4424_v7, %v4423_v25 }
0x1166   : > { %5193 = vst [vmem:[%s8681_s13 + $0x38] sm:$0xff] %v5154_v63  }
0x1167 PF: > { %p5792_p5 = scmp.ge.s32.totalorder %s6436_s20, 2  ;;  %s4550_s16 = sand.u32 1, %s6424_s17  }
0x1168   : > { %s4551_s26 = scalar_lea.sflag [#allocation3], %s4550_s16 }
0x1169   : > { %p5789_p1 = pnand %p5792_p5, %p6546_p6 }
0x116b   : > { %6419 = dma.done.wait (!%p5789_p1), %s4551_s26, 4096  }
0x116c   : > { %6421 = vsyncadd (!%p5789_p1), %s4551_s26, 4294963200  ;;  %s9095_s1 = sld [smem:[#allocation5_spill]]  ;;  %p22_p2 = scmp.ge.s32.totalorder %s6529_s23, 4  }
0x116d   : > { %s9096_s17 = smov %s6428_s18  ;;  %s9097_s18 = smov %s6432_s19 }
0x116e   : > { %s9099_s20 = smov %s6529_s23  ;;  %24 = sbr.rel (!%p22_p2) target bundleno = 6 (0x6), region = 113 }
0x1172   : > { %s9098_s19 = smov %s9095_s1 }
0x1175   :  { %4556 = vsyncpa [#allocation3], 1 }
0x1176   :  { %4558 = vsyncpa [#allocation3 + $0x1], 1 }

</bundles_post_ra>
